<compile_context>
chip_gen: v5e
topology: v5e:2x2
jax: 0.10.0
libtpu: 0.0.40
codegen_flags: <defaults>
</compile_context>

<pallas_src>
import functools

import jax
import jax.numpy as jnp
from jax.experimental import pallas as pl
from jax.experimental.pallas import tpu as pltpu

EPS = 1e-5


# ----------------------------- spike nonlinearities ------------------------
def _spike4(v):
    # Multispike forward: floor(clamp(v, 0, 4) + 0.5) / 4
    return jnp.floor(jnp.clip(v, 0.0, 4.0) + 0.5) * 0.25


def _spike2(v):
    # Multispike_att forward: floor(clamp(v, 0, 4) + 0.5) / 2
    return jnp.floor(jnp.clip(v, 0.0, 4.0) + 0.5) * 0.5


# --------------------------------- kernel ----------------------------------
def ms_block_kernel(x_ref, mask_rl_ref, mask_lr_ref, head_mask_ref,
                    wqkv_ref, bqkv_ref, wp_ref, bp_ref,
                    w1_ref, b1_ref, w2_ref, b2_ref, out_ref,
                    *, channels, samples):
    f32, bf16 = jnp.float32, jnp.bfloat16
    C = channels

    # Threshold math in f32; spike outputs (multiples of 0.25/0.5 in [0, 4])
    # are exact in bf16, so the cast is fused into the same elementwise chain.
    def spike4(v, dtype=bf16):
        return _spike4(v).astype(dtype)

    def spike2(v, dtype=bf16):
        return _spike2(v).astype(dtype)

    x = x_ref[...]                                      # (C, L) f32

    # -------------- attention branch (MS_Attention_Conv_qkv_id) ------------
    xs = spike4(x)                                      # head_lif -> bf16
    qkv = jnp.dot(wqkv_ref[...], xs,
                  preferred_element_type=f32) + bqkv_ref[...]        # (3C, L)
    q = qkv[0 * C:1 * C, :]
    k = qkv[1 * C:2 * C, :]
    v = qkv[2 * C:3 * C, :]

    qs = spike4(q)                                      # q_lif (C, L) bf16
    vs = spike4(v)                                      # v_lif (C, L) bf16
    # k_lif, pre-transposed: transpose the *small* (C, L) operand once so the
    # kv contraction below is a plain (C,L)x(L,R) dot (no implicit transpose
    # of the big replicated operand).
    ks_t = spike4(k.T)                                  # (L, C) bf16

    # Replicated, block-diagonal-over-samples operands; masks are {0,1} bf16
    # constants precomputed in the wrapper -> one vmul per operand.
    ks_bdt = jnp.tile(ks_t, (1, samples)) * mask_lr_ref[...]          # (L, R)
    qs_bd = jnp.tile(qs, (samples, 1)) * mask_rl_ref[...]             # (R, L)

    # kv[d, t*C + c] = sum_{n in sample t} v[d, n] * k[c, n]
    kv = jnp.dot(vs, ks_bdt, preferred_element_type=f32)              # (C, R)
    # head block-diagonal mask with the 0.125 attention scale folded in
    kv = kv * head_mask_ref[...]

    att = jnp.dot(kv, qs_bd.astype(f32), preferred_element_type=f32)  # (C, L)
    att_s = spike2(att)                                 # attn_lif -> bf16
    proj = jnp.dot(wp_ref[...], att_s,
                   preferred_element_type=f32) + bp_ref[...]          # ls1 folded
    x1 = x + proj                                       # residual + layer_scale1

    # ------------------------------ MLP branch (MS_MLP) --------------------
    x1s = spike4(x1)                                    # fc1_lif
    h = jnp.dot(w1_ref[...], x1s,
                preferred_element_type=f32) + b1_ref[...]             # (4C, L)
    hs = spike4(h)                                      # fc2_lif
    o = jnp.dot(w2_ref[...], hs,
                preferred_element_type=f32) + b2_ref[...]             # ls2 folded
    out_ref[...] = x1 + o                               # residual + layer_scale2


# --------------------------------- wrapper ----------------------------------
def _build_masks(channels, tokens, samples, num_heads):
    """Constant block-diagonal masks (trace-time constants; no in-kernel iota)."""
    R = samples * channels
    L = samples * tokens
    r = jnp.arange(R)
    l = jnp.arange(L)
    same_sample = (r[:, None] // channels) == (l[None, :] // tokens)   # (R, L)
    mask_rl = same_sample.astype(jnp.bfloat16)                         # (R, L)
    mask_lr = same_sample.T.astype(jnp.bfloat16)                       # (L, R)
    ch = channels // num_heads
    d = jnp.arange(channels)
    c_in = r % channels
    head_mask = ((d[:, None] // ch) == (c_in[None, :] // ch)).astype(jnp.float32)
    head_mask = head_mask * 0.125                                      # (C, R)
    return mask_rl, mask_lr, head_mask


def _ms_block_pallas_impl(x_slab, params, *, num_heads, samples_per_block,
                          tokens):
    """x_slab: channel-major activation slab (C, T*B*N) -- no wrapper transposes."""
    C, LT = x_slab.shape
    total_samples = LT // tokens
    assert LT == total_samples * tokens
    assert total_samples % samples_per_block == 0
    L = samples_per_block * tokens
    assert L % 128 == 0 and C % 8 == 0, "tile must be (8,128)-aligned"
    grid = (total_samples // samples_per_block,)        # ~= #TensorCores

    mask_rl, mask_lr, head_mask = _build_masks(C, tokens, samples_per_block,
                                               num_heads)
    plist = [params[n] for n in
             ("wqkv", "bqkv", "wp", "bp", "w1", "b1", "w2", "b2")]
    consts = [mask_rl, mask_lr, head_mask] + plist

    in_specs = [pl.BlockSpec((C, L), lambda i: (0, i))]
    # Constant index_map -> masks/weights stay resident in VMEM (no re-DMA).
    in_specs += [pl.BlockSpec(c.shape, lambda i: (0, 0)) for c in consts]

    return pl.pallas_call(
        functools.partial(ms_block_kernel, channels=C,
                          samples=samples_per_block),
        out_shape=jax.ShapeDtypeStruct((C, LT), jnp.float32),
        grid=grid,
        in_specs=in_specs,
        out_specs=pl.BlockSpec((C, L), lambda i: (0, i)),
        input_output_aliases={0: 0},
        compiler_params=pltpu.CompilerParams(
            dimension_semantics=("parallel",),
            vmem_limit_bytes=48 * 1024 * 1024),
    )(x_slab, *consts)


ms_block_pallas = jax.jit(
    _ms_block_pallas_impl,
    static_argnames=("num_heads", "samples_per_block", "tokens"))


# ----------------------- parameter construction (glue) ---------------------
def _conv_w(key, cout, cin):
    return jax.random.normal(key, (cout, cin), jnp.float32) / jnp.sqrt(cin)


def _bn_p(key, c):
    k1, k2, k3, k4 = jax.random.split(key, 4)
    gamma = 1.0 + 0.1 * jax.random.normal(k1, (c,), jnp.float32)
    beta = 0.1 * jax.random.normal(k2, (c,), jnp.float32)
    mean = 0.1 * jax.random.normal(k3, (c,), jnp.float32)
    var = jax.random.uniform(k4, (c,), jnp.float32, minval=0.5, maxval=1.5)
    return (gamma, beta, mean, var)


def _repconv_bn_chain(key, cin, cout):
    # RepConv(cin, cout) then outer BatchNorm1d(cout):
    #   Conv1d(cin -> 1.5*cin, k=1) + BN, Conv1d(1.5*cin -> cout, k=1) + BN, BN
    mid = int(cin * 1.5)
    ks = jax.random.split(key, 5)
    return [("conv", _conv_w(ks[0], mid, cin)),
            ("bn", _bn_p(ks[1], mid)),
            ("conv", _conv_w(ks[2], cout, mid)),
            ("bn", _bn_p(ks[3], cout)),
            ("bn", _bn_p(ks[4], cout))]


def _fc_bn_chain(key, cin, cout):
    k1, k2 = jax.random.split(key)
    return [("conv", _conv_w(k1, cout, cin)), ("bn", _bn_p(k2, cout))]


def init_raw_params(key, dim, mlp_ratio=4.0, sr_ratio=1, init_values=1e-6):
    hidden = int(dim * mlp_ratio)
    keys = jax.random.split(key, 6)
    return {
        "q_chain": _repconv_bn_chain(keys[0], dim, dim),
        "k_chain": _repconv_bn_chain(keys[1], dim, dim),
        "v_chain": _repconv_bn_chain(keys[2], dim, dim * sr_ratio),
        "p_chain": _repconv_bn_chain(keys[3], sr_ratio * dim, dim),
        "fc1_chain": _fc_bn_chain(keys[4], dim, hidden),
        "fc2_chain": _fc_bn_chain(keys[5], hidden, dim),
        "ls1": init_values * jnp.ones((dim,), jnp.float32),
        "ls2": init_values * jnp.ones((dim,), jnp.float32),
    }


def fold_chain(chain):
    """Fold a sequence of 1x1-conv / eval-mode BN ops into (A, b[:, None])."""
    A, c = None, None
    for kind, p in chain:
        if kind == "conv":
            W = p
            A = W if A is None else W @ A
            c = jnp.zeros((W.shape[0],), jnp.float32) if c is None else W @ c
        else:
            g, b, m, v = p
            s = g / jnp.sqrt(v + EPS)
            A = A * s[:, None]
            c = s * c + (b - s * m)
    return A, c[:, None]


def fold_params(raw):
    wq, bq = fold_chain(raw["q_chain"])
    wk, bk = fold_chain(raw["k_chain"])
    wv, bv = fold_chain(raw["v_chain"])
    wp, bp = fold_chain(raw["p_chain"])
    w1, b1 = fold_chain(raw["fc1_chain"])
    w2, b2 = fold_chain(raw["fc2_chain"])

    # fuse Q/K/V into one stacked projection
    wqkv = jnp.concatenate([wq, wk, wv], axis=0)
    bqkv = jnp.concatenate([bq, bk, bv], axis=0)

    # fold layer scales into the linear ops that directly follow the branches
    ls1 = raw["ls1"][:, None]
    ls2 = raw["ls2"][:, None]
    wp, bp = wp * ls1, bp * ls1
    w2, b2 = w2 * ls2, b2 * ls2

    bf = lambda w: w.astype(jnp.bfloat16)   # bf16 matmul operands, f32 biases
    return {"wqkv": bf(wqkv), "bqkv": bqkv,
            "wp": bf(wp), "bp": bp,
            "w1": bf(w1), "b1": b1,
            "w2": bf(w2), "b2": b2}


# ------------------------- plain-JAX reference (unfolded) ------------------
def _conv1x1(x, w):
    return jnp.einsum("oc,bcn->bon", w, x)


def _bn_eval(x, p):
    g, b, m, v = p
    s = g / jnp.sqrt(v + EPS)
    return x * s[None, :, None] + (b - m * s)[None, :, None]


def _apply_chain(x, chain):
    for kind, p in chain:
        x = _conv1x1(x, p) if kind == "conv" else _bn_eval(x, p)
    return x


def ms_block_ref(x, raw, num_heads):
    T, B, C, N = x.shape
    H, Ch = num_heads, C // num_heads
    xf = x.reshape(T * B, C, N)

    xs = _spike4(xf)
    q = _spike4(_apply_chain(xs, raw["q_chain"]))
    k = _spike4(_apply_chain(xs, raw["k_chain"]))
    v = _spike4(_apply_chain(xs, raw["v_chain"]))

    def to_heads(t):  # (TB,C,N) -> (TB,H,N,Ch)
        return t.transpose(0, 2, 1).reshape(T * B, N, H, Ch).transpose(0, 2, 1, 3)

    qh, kh, vh = to_heads(q), to_heads(k), to_heads(v)
    att = jnp.einsum("bhnc,bhnd->bhcd", kh, vh)            # k^T @ v
    att = jnp.einsum("bhnc,bhcd->bhnd", qh, att) * 0.125   # q @ (.) * scale
    att = att.transpose(0, 1, 3, 2).reshape(T * B, C, N)
    att = _spike2(att)
    proj = _apply_chain(att, raw["p_chain"])
    x1 = xf + proj * raw["ls1"][None, :, None]

    h1 = _apply_chain(_spike4(x1), raw["fc1_chain"])
    o = _apply_chain(_spike4(h1), raw["fc2_chain"])
    out = x1 + o * raw["ls2"][None, :, None]
    return out.reshape(T, B, C, N)


# ----------------------------------- main -----------------------------------
if __name__ == "__main__":
    T, B, C, N = 2, 8, 32, 64
    num_heads = 4
    mlp_ratio = 4.0

    key = jax.random.PRNGKey(0)
    k_x, k_p = jax.random.split(key)
    x = jax.random.uniform(k_x, (T, B, C, N), jnp.float32, minval=0.0, maxval=4.0)

    raw = init_raw_params(k_p, C, mlp_ratio=mlp_ratio, sr_ratio=1, init_values=1e-6)
    params = fold_params(raw)

    # Test-harness-only layout conversion: in a real model the channel-major
    # (C, T*B*N) slab is the persistent inter-layer activation layout, so the
    # kernel wrapper itself performs no reshape/transpose HBM passes.
    x_slab = x.reshape(T * B, C, N).transpose(1, 0, 2).reshape(C, T * B * N)

    # samples_per_block = TB/2 -> grid = 2: one step per TensorCore on v7x,
    # two cheap sequential steps on v5e/v6e; L = 8*64 = 512 lanes per tile.
    samples_per_block = (T * B) // 2
    out_slab = ms_block_pallas(x_slab, params, num_heads=num_heads,
                               samples_per_block=samples_per_block, tokens=N)
    out_slab = jax.block_until_ready(out_slab)

    out = out_slab.reshape(C, T * B, N).transpose(1, 0, 2).reshape(T, B, C, N)
    ref = ms_block_ref(x, raw, num_heads)
    max_diff = float(jnp.max(jnp.abs(out - ref)))
    assert max_diff < 1e-4, f"mismatch vs reference: {max_diff}"
    print("KERNEL_OK")
</pallas_src>

<mosaic_0001>
module attributes {stable_mosaic.version = 11 : i64} {
  func.func @ms_block_kernel(%arg0: i32, %arg1: memref<32x512xf32, #tpu.memory_space<vmem>>, %arg2: memref<256x512xbf16, #tpu.memory_space<vmem>>, %arg3: memref<512x256xbf16, #tpu.memory_space<vmem>>, %arg4: memref<32x256xf32, #tpu.memory_space<vmem>>, %arg5: memref<96x32xbf16, #tpu.memory_space<vmem>>, %arg6: memref<96x1xf32, #tpu.memory_space<vmem>>, %arg7: memref<32x32xbf16, #tpu.memory_space<vmem>>, %arg8: memref<32x1xf32, #tpu.memory_space<vmem>>, %arg9: memref<128x32xbf16, #tpu.memory_space<vmem>>, %arg10: memref<128x1xf32, #tpu.memory_space<vmem>>, %arg11: memref<32x128xbf16, #tpu.memory_space<vmem>>, %arg12: memref<32x1xf32, #tpu.memory_space<vmem>>, %arg13: memref<32x512xf32, #tpu.memory_space<vmem>>) attributes {dimension_semantics = [#tpu.dimension_semantics<parallel>], iteration_bounds = array<i64: 2>, scalar_prefetch = 0 : i64, scratch_operands = 0 : i64, tpu.core_type = #tpu.core_type<tc>, window_params = [{transform_indices = @transform_0, window_bounds = array<i64: 32, 512>}, {pipeline_mode = #tpu.pipeline_mode<synchronous>, transform_indices = @transform_1, window_bounds = array<i64: 256, 512>}, {pipeline_mode = #tpu.pipeline_mode<synchronous>, transform_indices = @transform_2, window_bounds = array<i64: 512, 256>}, {pipeline_mode = #tpu.pipeline_mode<synchronous>, transform_indices = @transform_3, window_bounds = array<i64: 32, 256>}, {pipeline_mode = #tpu.pipeline_mode<synchronous>, transform_indices = @transform_4, window_bounds = array<i64: 96, 32>}, {pipeline_mode = #tpu.pipeline_mode<synchronous>, transform_indices = @transform_5, window_bounds = array<i64: 96, 1>}, {pipeline_mode = #tpu.pipeline_mode<synchronous>, transform_indices = @transform_6, window_bounds = array<i64: 32, 32>}, {pipeline_mode = #tpu.pipeline_mode<synchronous>, transform_indices = @transform_7, window_bounds = array<i64: 32, 1>}, {pipeline_mode = #tpu.pipeline_mode<synchronous>, transform_indices = @transform_8, window_bounds = array<i64: 128, 32>}, {pipeline_mode = #tpu.pipeline_mode<synchronous>, transform_indices = @transform_9, window_bounds = array<i64: 128, 1>}, {pipeline_mode = #tpu.pipeline_mode<synchronous>, transform_indices = @transform_10, window_bounds = array<i64: 32, 128>}, {pipeline_mode = #tpu.pipeline_mode<synchronous>, transform_indices = @transform_11, window_bounds = array<i64: 32, 1>}, {transform_indices = @transform_12, window_bounds = array<i64: 32, 512>}]} {
    %c0 = arith.constant 0 : index
    %c0_0 = arith.constant 0 : index
    %0 = vector.load %arg1[%c0, %c0_0] : memref<32x512xf32, #tpu.memory_space<vmem>>, vector<32x512xf32>
    %cst = arith.constant 0.000000e+00 : f32
    %cst_1 = arith.constant 4.000000e+00 : f32
    %1 = vector.broadcast %cst : f32 to vector<32x512xf32>
    %2 = arith.maximumf %1, %0 : vector<32x512xf32>
    %3 = vector.broadcast %cst_1 : f32 to vector<32x512xf32>
    %4 = arith.minimumf %3, %2 : vector<32x512xf32>
    %cst_2 = arith.constant 5.000000e-01 : f32
    %5 = vector.broadcast %cst_2 : f32 to vector<32x512xf32>
    %6 = arith.addf %4, %5 : vector<32x512xf32>
    %7 = math.floor %6 : vector<32x512xf32>
    %cst_3 = arith.constant 2.500000e-01 : f32
    %8 = vector.broadcast %cst_3 : f32 to vector<32x512xf32>
    %9 = arith.mulf %7, %8 : vector<32x512xf32>
    %10 = arith.truncf %9 : vector<32x512xf32> to vector<32x512xbf16>
    %c0_4 = arith.constant 0 : index
    %c0_5 = arith.constant 0 : index
    %11 = vector.load %arg5[%c0_4, %c0_5] : memref<96x32xbf16, #tpu.memory_space<vmem>>, vector<96x32xbf16>
    %cst_6 = arith.constant dense<0.000000e+00> : vector<96x512xf32>
    %12 = tpu.matmul %11, %10, %cst_6 {dimension_numbers = #tpu.dot_dimension_numbers<[1], [0], [0], [1], [0, 0, 1, 1], [], []>} : vector<96x32xbf16>, vector<32x512xbf16>, vector<96x512xf32> -> vector<96x512xf32>
    %c0_7 = arith.constant 0 : index
    %c0_8 = arith.constant 0 : index
    %13 = vector.load %arg6[%c0_7, %c0_8] : memref<96x1xf32, #tpu.memory_space<vmem>>, vector<96x1xf32>
    %14 = vector.broadcast %13 : vector<96x1xf32> to vector<96x512xf32>
    %15 = arith.addf %12, %14 : vector<96x512xf32>
    %16 = vector.extract_strided_slice %15 {offsets = [0, 0], sizes = [32, 512], strides = [1, 1]} : vector<96x512xf32> to vector<32x512xf32>
    %17 = vector.extract_strided_slice %15 {offsets = [32, 0], sizes = [32, 512], strides = [1, 1]} : vector<96x512xf32> to vector<32x512xf32>
    %18 = vector.extract_strided_slice %15 {offsets = [64, 0], sizes = [32, 512], strides = [1, 1]} : vector<96x512xf32> to vector<32x512xf32>
    %cst_9 = arith.constant 0.000000e+00 : f32
    %cst_10 = arith.constant 4.000000e+00 : f32
    %19 = vector.broadcast %cst_9 : f32 to vector<32x512xf32>
    %20 = arith.maximumf %19, %16 : vector<32x512xf32>
    %21 = vector.broadcast %cst_10 : f32 to vector<32x512xf32>
    %22 = arith.minimumf %21, %20 : vector<32x512xf32>
    %cst_11 = arith.constant 5.000000e-01 : f32
    %23 = vector.broadcast %cst_11 : f32 to vector<32x512xf32>
    %24 = arith.addf %22, %23 : vector<32x512xf32>
    %25 = math.floor %24 : vector<32x512xf32>
    %cst_12 = arith.constant 2.500000e-01 : f32
    %26 = vector.broadcast %cst_12 : f32 to vector<32x512xf32>
    %27 = arith.mulf %25, %26 : vector<32x512xf32>
    %28 = arith.truncf %27 : vector<32x512xf32> to vector<32x512xbf16>
    %cst_13 = arith.constant 0.000000e+00 : f32
    %cst_14 = arith.constant 4.000000e+00 : f32
    %29 = vector.broadcast %cst_13 : f32 to vector<32x512xf32>
    %30 = arith.maximumf %29, %18 : vector<32x512xf32>
    %31 = vector.broadcast %cst_14 : f32 to vector<32x512xf32>
    %32 = arith.minimumf %31, %30 : vector<32x512xf32>
    %cst_15 = arith.constant 5.000000e-01 : f32
    %33 = vector.broadcast %cst_15 : f32 to vector<32x512xf32>
    %34 = arith.addf %32, %33 : vector<32x512xf32>
    %35 = math.floor %34 : vector<32x512xf32>
    %cst_16 = arith.constant 2.500000e-01 : f32
    %36 = vector.broadcast %cst_16 : f32 to vector<32x512xf32>
    %37 = arith.mulf %35, %36 : vector<32x512xf32>
    %38 = arith.truncf %37 : vector<32x512xf32> to vector<32x512xbf16>
    %39 = tpu.transpose %17, [1, 0] : vector<32x512xf32> -> vector<512x32xf32>
    %cst_17 = arith.constant 0.000000e+00 : f32
    %cst_18 = arith.constant 4.000000e+00 : f32
    %40 = vector.broadcast %cst_17 : f32 to vector<512x32xf32>
    %41 = arith.maximumf %40, %39 : vector<512x32xf32>
    %42 = vector.broadcast %cst_18 : f32 to vector<512x32xf32>
    %43 = arith.minimumf %42, %41 : vector<512x32xf32>
    %cst_19 = arith.constant 5.000000e-01 : f32
    %44 = vector.broadcast %cst_19 : f32 to vector<512x32xf32>
    %45 = arith.addf %43, %44 : vector<512x32xf32>
    %46 = math.floor %45 : vector<512x32xf32>
    %cst_20 = arith.constant 2.500000e-01 : f32
    %47 = vector.broadcast %cst_20 : f32 to vector<512x32xf32>
    %48 = arith.mulf %46, %47 : vector<512x32xf32>
    %49 = arith.truncf %48 : vector<512x32xf32> to vector<512x32xbf16>
    %50 = tpu.concatenate %49, %49, %49, %49, %49, %49, %49, %49 in 1 : vector<512x32xbf16>, vector<512x32xbf16>, vector<512x32xbf16>, vector<512x32xbf16>, vector<512x32xbf16>, vector<512x32xbf16>, vector<512x32xbf16>, vector<512x32xbf16> -> vector<512x256xbf16>
    %c0_21 = arith.constant 0 : index
    %c0_22 = arith.constant 0 : index
    %51 = vector.load %arg3[%c0_21, %c0_22] : memref<512x256xbf16, #tpu.memory_space<vmem>>, vector<512x256xbf16>
    %52 = arith.mulf %50, %51 : vector<512x256xbf16>
    %53 = tpu.concatenate %28, %28, %28, %28, %28, %28, %28, %28 in 0 : vector<32x512xbf16>, vector<32x512xbf16>, vector<32x512xbf16>, vector<32x512xbf16>, vector<32x512xbf16>, vector<32x512xbf16>, vector<32x512xbf16>, vector<32x512xbf16> -> vector<256x512xbf16>
    %c0_23 = arith.constant 0 : index
    %c0_24 = arith.constant 0 : index
    %54 = vector.load %arg2[%c0_23, %c0_24] : memref<256x512xbf16, #tpu.memory_space<vmem>>, vector<256x512xbf16>
    %55 = arith.mulf %53, %54 : vector<256x512xbf16>
    %cst_25 = arith.constant dense<0.000000e+00> : vector<32x256xf32>
    %56 = tpu.matmul %38, %52, %cst_25 {dimension_numbers = #tpu.dot_dimension_numbers<[1], [0], [0], [1], [0, 0, 1, 1], [], []>} : vector<32x512xbf16>, vector<512x256xbf16>, vector<32x256xf32> -> vector<32x256xf32>
    %c0_26 = arith.constant 0 : index
    %c0_27 = arith.constant 0 : index
    %57 = vector.load %arg4[%c0_26, %c0_27] : memref<32x256xf32, #tpu.memory_space<vmem>>, vector<32x256xf32>
    %58 = arith.mulf %56, %57 : vector<32x256xf32>
    %59 = arith.extf %55 : vector<256x512xbf16> to vector<256x512xf32>
    %cst_28 = arith.constant dense<0.000000e+00> : vector<32x512xf32>
    %60 = tpu.matmul %58, %59, %cst_28 {dimension_numbers = #tpu.dot_dimension_numbers<[1], [0], [0], [1], [0, 0, 1, 1], [], []>} : vector<32x256xf32>, vector<256x512xf32>, vector<32x512xf32> -> vector<32x512xf32>
    %cst_29 = arith.constant 0.000000e+00 : f32
    %cst_30 = arith.constant 4.000000e+00 : f32
    %61 = vector.broadcast %cst_29 : f32 to vector<32x512xf32>
    %62 = arith.maximumf %61, %60 : vector<32x512xf32>
    %63 = vector.broadcast %cst_30 : f32 to vector<32x512xf32>
    %64 = arith.minimumf %63, %62 : vector<32x512xf32>
    %cst_31 = arith.constant 5.000000e-01 : f32
    %65 = vector.broadcast %cst_31 : f32 to vector<32x512xf32>
    %66 = arith.addf %64, %65 : vector<32x512xf32>
    %67 = math.floor %66 : vector<32x512xf32>
    %cst_32 = arith.constant 5.000000e-01 : f32
    %68 = vector.broadcast %cst_32 : f32 to vector<32x512xf32>
    %69 = arith.mulf %67, %68 : vector<32x512xf32>
    %70 = arith.truncf %69 : vector<32x512xf32> to vector<32x512xbf16>
    %c0_33 = arith.constant 0 : index
    %c0_34 = arith.constant 0 : index
    %71 = vector.load %arg7[%c0_33, %c0_34] : memref<32x32xbf16, #tpu.memory_space<vmem>>, vector<32x32xbf16>
    %cst_35 = arith.constant dense<0.000000e+00> : vector<32x512xf32>
    %72 = tpu.matmul %71, %70, %cst_35 {dimension_numbers = #tpu.dot_dimension_numbers<[1], [0], [0], [1], [0, 0, 1, 1], [], []>} : vector<32x32xbf16>, vector<32x512xbf16>, vector<32x512xf32> -> vector<32x512xf32>
    %c0_36 = arith.constant 0 : index
    %c0_37 = arith.constant 0 : index
    %73 = vector.load %arg8[%c0_36, %c0_37] : memref<32x1xf32, #tpu.memory_space<vmem>>, vector<32x1xf32>
    %74 = vector.broadcast %73 : vector<32x1xf32> to vector<32x512xf32>
    %75 = arith.addf %72, %74 : vector<32x512xf32>
    %76 = arith.addf %0, %75 : vector<32x512xf32>
    %cst_38 = arith.constant 0.000000e+00 : f32
    %cst_39 = arith.constant 4.000000e+00 : f32
    %77 = vector.broadcast %cst_38 : f32 to vector<32x512xf32>
    %78 = arith.maximumf %77, %76 : vector<32x512xf32>
    %79 = vector.broadcast %cst_39 : f32 to vector<32x512xf32>
    %80 = arith.minimumf %79, %78 : vector<32x512xf32>
    %cst_40 = arith.constant 5.000000e-01 : f32
    %81 = vector.broadcast %cst_40 : f32 to vector<32x512xf32>
    %82 = arith.addf %80, %81 : vector<32x512xf32>
    %83 = math.floor %82 : vector<32x512xf32>
    %cst_41 = arith.constant 2.500000e-01 : f32
    %84 = vector.broadcast %cst_41 : f32 to vector<32x512xf32>
    %85 = arith.mulf %83, %84 : vector<32x512xf32>
    %86 = arith.truncf %85 : vector<32x512xf32> to vector<32x512xbf16>
    %c0_42 = arith.constant 0 : index
    %c0_43 = arith.constant 0 : index
    %87 = vector.load %arg9[%c0_42, %c0_43] : memref<128x32xbf16, #tpu.memory_space<vmem>>, vector<128x32xbf16>
    %cst_44 = arith.constant dense<0.000000e+00> : vector<128x512xf32>
    %88 = tpu.matmul %87, %86, %cst_44 {dimension_numbers = #tpu.dot_dimension_numbers<[1], [0], [0], [1], [0, 0, 1, 1], [], []>} : vector<128x32xbf16>, vector<32x512xbf16>, vector<128x512xf32> -> vector<128x512xf32>
    %c0_45 = arith.constant 0 : index
    %c0_46 = arith.constant 0 : index
    %89 = vector.load %arg10[%c0_45, %c0_46] : memref<128x1xf32, #tpu.memory_space<vmem>>, vector<128x1xf32>
    %90 = vector.broadcast %89 : vector<128x1xf32> to vector<128x512xf32>
    %91 = arith.addf %88, %90 : vector<128x512xf32>
    %cst_47 = arith.constant 0.000000e+00 : f32
    %cst_48 = arith.constant 4.000000e+00 : f32
    %92 = vector.broadcast %cst_47 : f32 to vector<128x512xf32>
    %93 = arith.maximumf %92, %91 : vector<128x512xf32>
    %94 = vector.broadcast %cst_48 : f32 to vector<128x512xf32>
    %95 = arith.minimumf %94, %93 : vector<128x512xf32>
    %cst_49 = arith.constant 5.000000e-01 : f32
    %96 = vector.broadcast %cst_49 : f32 to vector<128x512xf32>
    %97 = arith.addf %95, %96 : vector<128x512xf32>
    %98 = math.floor %97 : vector<128x512xf32>
    %cst_50 = arith.constant 2.500000e-01 : f32
    %99 = vector.broadcast %cst_50 : f32 to vector<128x512xf32>
    %100 = arith.mulf %98, %99 : vector<128x512xf32>
    %101 = arith.truncf %100 : vector<128x512xf32> to vector<128x512xbf16>
    %c0_51 = arith.constant 0 : index
    %c0_52 = arith.constant 0 : index
    %102 = vector.load %arg11[%c0_51, %c0_52] : memref<32x128xbf16, #tpu.memory_space<vmem>>, vector<32x128xbf16>
    %cst_53 = arith.constant dense<0.000000e+00> : vector<32x512xf32>
    %103 = tpu.matmul %102, %101, %cst_53 {dimension_numbers = #tpu.dot_dimension_numbers<[1], [0], [0], [1], [0, 0, 1, 1], [], []>} : vector<32x128xbf16>, vector<128x512xbf16>, vector<32x512xf32> -> vector<32x512xf32>
    %c0_54 = arith.constant 0 : index
    %c0_55 = arith.constant 0 : index
    %104 = vector.load %arg12[%c0_54, %c0_55] : memref<32x1xf32, #tpu.memory_space<vmem>>, vector<32x1xf32>
    %105 = vector.broadcast %104 : vector<32x1xf32> to vector<32x512xf32>
    %106 = arith.addf %103, %105 : vector<32x512xf32>
    %107 = arith.addf %76, %106 : vector<32x512xf32>
    %c0_56 = arith.constant 0 : index
    %c0_57 = arith.constant 0 : index
    %108 = vector.load %arg13[%c0_56, %c0_57] : memref<32x512xf32, #tpu.memory_space<vmem>>, vector<32x512xf32>
    tpu.vector_store %arg13[%c0_56, %c0_57], %107 {strides = array<i32>} : memref<32x512xf32, #tpu.memory_space<vmem>>, vector<32x512xf32>,
    return
  }
  func.func @transform_0(%arg0: i32) -> (i32, i32) {
    %c0_i32 = arith.constant 0 : i32
    %c0_i32_0 = arith.constant 0 : i32
    return %c0_i32, %arg0 : i32, i32
  }
  func.func @transform_1(%arg0: i32) -> (i32, i32) {
    %c0_i32 = arith.constant 0 : i32
    %c0_i32_0 = arith.constant 0 : i32
    %c0_i32_1 = arith.constant 0 : i32
    return %c0_i32, %c0_i32_0 : i32, i32
  }
  func.func @transform_2(%arg0: i32) -> (i32, i32) {
    %c0_i32 = arith.constant 0 : i32
    %c0_i32_0 = arith.constant 0 : i32
    %c0_i32_1 = arith.constant 0 : i32
    return %c0_i32, %c0_i32_0 : i32, i32
  }
  func.func @transform_3(%arg0: i32) -> (i32, i32) {
    %c0_i32 = arith.constant 0 : i32
    %c0_i32_0 = arith.constant 0 : i32
    %c0_i32_1 = arith.constant 0 : i32
    return %c0_i32, %c0_i32_0 : i32, i32
  }
  func.func @transform_4(%arg0: i32) -> (i32, i32) {
    %c0_i32 = arith.constant 0 : i32
    %c0_i32_0 = arith.constant 0 : i32
    %c0_i32_1 = arith.constant 0 : i32
    return %c0_i32, %c0_i32_0 : i32, i32
  }
  func.func @transform_5(%arg0: i32) -> (i32, i32) {
    %c0_i32 = arith.constant 0 : i32
    %c0_i32_0 = arith.constant 0 : i32
    %c0_i32_1 = arith.constant 0 : i32
    return %c0_i32, %c0_i32_0 : i32, i32
  }
  func.func @transform_6(%arg0: i32) -> (i32, i32) {
    %c0_i32 = arith.constant 0 : i32
    %c0_i32_0 = arith.constant 0 : i32
    %c0_i32_1 = arith.constant 0 : i32
    return %c0_i32, %c0_i32_0 : i32, i32
  }
  func.func @transform_7(%arg0: i32) -> (i32, i32) {
    %c0_i32 = arith.constant 0 : i32
    %c0_i32_0 = arith.constant 0 : i32
    %c0_i32_1 = arith.constant 0 : i32
    return %c0_i32, %c0_i32_0 : i32, i32
  }
  func.func @transform_8(%arg0: i32) -> (i32, i32) {
    %c0_i32 = arith.constant 0 : i32
    %c0_i32_0 = arith.constant 0 : i32
    %c0_i32_1 = arith.constant 0 : i32
    return %c0_i32, %c0_i32_0 : i32, i32
  }
  func.func @transform_9(%arg0: i32) -> (i32, i32) {
    %c0_i32 = arith.constant 0 : i32
    %c0_i32_0 = arith.constant 0 : i32
    %c0_i32_1 = arith.constant 0 : i32
    return %c0_i32, %c0_i32_0 : i32, i32
  }
  func.func @transform_10(%arg0: i32) -> (i32, i32) {
    %c0_i32 = arith.constant 0 : i32
    %c0_i32_0 = arith.constant 0 : i32
    %c0_i32_1 = arith.constant 0 : i32
    return %c0_i32, %c0_i32_0 : i32, i32
  }
  func.func @transform_11(%arg0: i32) -> (i32, i32) {
    %c0_i32 = arith.constant 0 : i32
    %c0_i32_0 = arith.constant 0 : i32
    %c0_i32_1 = arith.constant 0 : i32
    return %c0_i32, %c0_i32_0 : i32, i32
  }
  func.func @transform_12(%arg0: i32) -> (i32, i32) {
    %c0_i32 = arith.constant 0 : i32
    %c0_i32_0 = arith.constant 0 : i32
    return %c0_i32, %arg0 : i32, i32
  }
}

</mosaic_0001>

<bundles_post_ra>
// kernel: _ms_block_pallas_impl.1
= control target key start
LH: loop header
LB: loop body
LE: loop exit
PB: predicated region body
PF: predicated region fallthrough
CT: control target
= control target key end

     0   :  { %17 = vsyncpa [#allocation3], 0  ;;  %s8107_s0 = inlined_call_operand.hbm [shape: f32[32,1024], index: 0, kind: input, shape index: {}, may-alias: {0,12}]   ;;  %s8108_s1 = inlined_call_operand.vmem [shape: bf16[256,512], index: 1, kind: input, shape index: {}]   ;;  %s8109_s2 = inlined_call_operand.vmem [shape: bf16[512,256], index: 2, kind: input, shape index: {}]   ;;  %s8110_s3 = inlined_call_operand.vmem [shape: f32[32,256], index: 3, kind: input, shape index: {}]   ;;  %s8111_s4 = inlined_call_operand.vmem [shape: bf16[96,32], index: 4, kind: input, shape index: {}]   ;;  %s8112_s5 = inlined_call_operand.vmem [shape: f32[96,1], index: 5, kind: input, shape index: {}]   ;;  %s8113_s6 = inlined_call_operand.vmem [shape: bf16[32,32], index: 6, kind: input, shape index: {}]   ;;  %s8114_s7 = inlined_call_operand.vmem [shape: f32[32,1], index: 7, kind: input, shape index: {}]   ;;  %s8115_s8 = inlined_call_operand.vmem [shape: bf16[128,32], index: 8, kind: input, shape index: {}]   ;;  %s8116_s9 = inlined_call_operand.vmem [shape: f32[128,1], index: 9, kind: input, shape index: {}]   ;;  %s8117_s10 = inlined_call_operand.vmem [shape: bf16[32,128], index: 10, kind: input, shape index: {}]   ;;  %s8118_s11 = inlined_call_operand.vmem [shape: f32[32,1], index: 11, kind: input, shape index: {}]   ;;  %s8119_s12 = inlined_call_operand.hbm [shape: f32[32,1024], index: 12, kind: output, shape index: {}, may-alias: {0,12}]  }
   0x1   :  { %19 = vsyncpa [#allocation3 + $0x1], 0 }
   0x2   :  { %20 = vsyncpa [#allocation4], 0 }
   0x3   :  { %22 = vsyncpa [#allocation4 + $0x1], 0  ;;  %s5234_s21 = smov 0   ;;  %s5236_s22 = smov 0  }
   0x4   :  { %s5238_s23 = smov 0   ;;  %s5240_s24 = smov 0  }
   0x5 LB: > { %8234 = sst [smem:[#allocation8_spill]] %s5146_s21  ;;  %s5255_s25 = sadd.s32 4294967295, %s5158_s24   ;;  %s5158_s24 = sphi %s5240_s24, %s8544_s24   ;;  %s5154_s23 = sphi %s5238_s23, %s8546_s23   ;;  %s5150_s22 = sphi %s5236_s22, %s8548_s22   ;;  %s5146_s21 = sphi %s5234_s21, %s8547_s21  }
   0x6   : > { %8235 = sst [smem:[#allocation9_spill]] %s5154_s23  ;;  %s4817_s26 = sadd.s32 4294967294, %s5158_s24  }
   0x7   : > { %s5259_s27 = sadd.s32 1, %s5158_s24   ;;  %s35_s28 = sadd.s32 1, %s5154_s23 }
   0x8   : > { %8236 = sst [smem:[#allocation10_spill]] %s5259_s27  ;;  %s32_s29 = ssub.s32 %s5158_s24, %s5259_s27 }
   0x9   : > { %p42_p0 = scmp.ne.s32.totalorder %s5154_s23, %s5150_s22  ;;  %p33_p1 = scmp.eq.s32.totalorder %s32_s29, 0 }
   0xa   : > { %p43_p2 = scmp.eq.s32.totalorder %s5158_s24, 0  ;;  %p48_p3 = scmp.ne.s32.totalorder %s5150_s22, %s5146_s21 }
   0xb   : > { %p49_p4 = scmp.eq.s32.totalorder %s5255_s25, 0  ;;  %p303_p7 = scmp.eq.s32.totalorder %s5255_s25, 1 }
   0xc   : > { %s5271_s30 = scalar_select %p33_p1, %s5154_s23, %s35_s28  }
   0xd   : > { %p5273_p5 = por %p43_p2, %p42_p0  ;;  %p5277_p6 = por %p49_p4, %p48_p3 }
   0xe   : > { %8237 = sst [smem:[#allocation11_spill]] %s5271_s30  ;;  %p309_p8 = scmp.eq.s32.totalorder %s4817_s26, 1 }
   0xf   : > { %p4819_p9 = scmp.ge.s32.totalorder %s5158_s24, 2  ;;  %p4999_p10 = scmp.lt.s32.totalorder %s5158_s24, 2 }
  0x10   : > { %p5284_p11 = por %p303_p7, %p42_p0  ;;  %p5288_p12 = por %p309_p8, %p48_p3 }
  0x11   : > { %s362_s17 = sand.u32 1, %s5154_s23   ;;  %s4967_s18 = sshll.u32 %s5158_s24, 5 }
  0x12   : > { %s8240_s15 = scalar_select %p5284_p11, 1, 0 }
  0x13   : > { %s8242_s16 = scalar_select %p5288_p12, 1, 0 }
  0x14   : > { %8241 = sst [smem:[#allocation12_spill]] %s8240_s15  ;;  %s4820_s19 = sshll.u32 %s362_s17, 7 }
  0x15   : > { %8243 = sst [smem:[#allocation13_spill]] %s8242_s16  ;;  %s371_s29 = scalar_lea.hbm %s8107_s0, %s4967_s18 }
  0x16   : > { %s372_s30 = sshll.u32 %s371_s29, 4  ;;  %s366_s27 = scalar_lea.vmem [#allocation2], %s4820_s19  ;;  %s373_s30 = int_to_ptr.hbm [resolvable:$true] %s372_s30 }
  0x17   : > { %s374_s26 = sshll.u32 %s366_s27, 4  ;;  %p5299_p13 = pnand %p4999_p10, %p5273_p5  ;;  %s375_s26 = int_to_ptr.vmem [resolvable:$true] %s374_s26 }
  0x18   : > { %p4823_p0 = scmp.ge.s32.totalorder %s5158_s24, 1  ;;  %s363_s16 = scalar_lea.sflag [#allocation3], %s362_s17 }
  0x19   : > { %s5062_s23 = sshra.s32 %s373_s30, 4  ;;  %p5066_p2 = pneg %p5299_p13  ;;  %s5063_s23 = int_to_ptr.hbm [resolvable:$true] %s5062_s23 }
  0x1a   : > { %s5064_s15 = scalar_lea.hbm %s5063_s23, 128  ;;  %s5069_s19 = scalar_lea.hbm %s8107_s0, 256 }
  0x1b   : > { %p5065_p1 = scmp.ne.s32.totalorder %s5063_s23, %s5064_s15  ;;  %p5070_p5 = scmp.lt.s32.totalorder %s5063_s23, %s8107_s0 }
  0x1c   : > { %p5071_p7 = scmp.lt.s32.totalorder %s5069_s19, %s5064_s15 }
  0x1d   : > { %p5067_p3 = pnand %p5066_p2, %p5065_p1 }
  0x1e   : > { %p5072_p8 = por %p5071_p7, %p5070_p5 }
  0x1f   : > { %p5068_p4 = pneg %p5067_p3 }
  0x21   : > { %p5073_p10 = pnand %p5072_p8, %p5068_p4 }
  0x23   : > { %5076 = shalt.err (!%p5073_p10)
}
  0x24   : > { %s5160_s17 = smov 1024   ;;  %s5161_s28 = smov 512  }
  0x25   : > { %s5162_s29 = smov 32   ;;  %p382_p1 = scmp.lt.s32.totalorder %s5158_s24, 3 }
  0x26   : > { %4994 = dma.hbm_to_vmem [thread:$0]  (!%p5299_p13), %s373_s30, 2048, %s375_s26, %s363_s16, %s5160_s17, %s5161_s28, %s5162_s29  }
  0x27   : > { %p383_p2 = pnand %p4823_p0, %p382_p1 }
  0x29   : > { %386 = sbr.rel (%p383_p2) target bundleno = 2044 (0x7fc), region = 68 }
  0x2e   : > { %s5318_s18 = sand.u32 1, %s5150_s22  }
  0x2f   : > { %s8158_s23 = sshll.u32 %s5318_s18, 7  ;;  %s389_s15 = scalar_lea.sflag [#allocation3], %s5318_s18 }
  0x30   : > { %s5324_s27 = scalar_lea.vmem [#allocation2], %s8158_s23 }
  0x31   : > { %5137 = dma.done.wait (%p5277_p6), %s389_s15, 2048  }
  0x32   : > { %5139 = vsyncadd (%p5277_p6), %s389_s15, 4294965248  ;;  %v445_v0 = vld [vmem:[%s5324_s27 + $0x40] sm:$0xff]  ;;  %v446_v2 = vld [vmem:[%s5324_s27 + $0x48] sm:$0xff]  ;;  %vm655_vm0 = vcmask 261120   ;;  %s5164_s26 = smov 32   ;;  %s5165_s19 = smov 64  }
  0x33   : > { %v449_v1 = vld [vmem:[%s5324_s27 + $0x60] sm:$0xff]  ;;  %v461_v3 = vmax.f32 %v445_v0, 0.0  ;;  %v450_v5 = vld [vmem:[%s5324_s27 + $0x68] sm:$0xff]  ;;  %v462_v6 = vmax.f32 %v446_v2, 0.0  ;;  %v447_v7 = vld [vmem:[%s5324_s27 + $0x50] sm:$0xff]  ;;  %s5166_s13 = smov 96  }
  0x34   : > { %v465_v4 = vmax.f32 %v449_v1, 0.0  ;;  %v451_v8 = vld [vmem:[%s5324_s27 + $0x70] sm:$0xff]  ;;  %v466_v9 = vmax.f32 %v450_v5, 0.0  ;;  %v463_v10 = vmax.f32 %v447_v7, 0.0  ;;  %v448_v12 = vld [vmem:[%s5324_s27 + $0x58] sm:$0xff]  ;;  %v437_v38 = vld [vmem:[%s5324_s27] sm:$0xff] }
  0x35   : > { %v467_v11 = vmax.f32 %v451_v8, 0.0  ;;  %v452_v13 = vld [vmem:[%s5324_s27 + $0x78] sm:$0xff]  ;;  %v477_v14 = vmin.f32 %v461_v3, 4.0  ;;  %v478_v16 = vmin.f32 %v462_v6, 4.0  ;;  %v464_v17 = vmax.f32 %v448_v12, 0.0  ;;  %v441_v39 = vld [vmem:[%s5324_s27 + $0x20] sm:$0xff] }
  0x36   : > { %v481_v15 = vmin.f32 %v465_v4, 4.0  ;;  %v482_v18 = vmin.f32 %v466_v9, 4.0  ;;  %v479_v19 = vmin.f32 %v463_v10, 4.0  ;;  %v468_v21 = vmax.f32 %v452_v13, 0.0  ;;  %v438_v44 = vld [vmem:[%s5324_s27 + $0x8] sm:$0xff]  ;;  %v439_v50 = vld [vmem:[%s5324_s27 + $0x10] sm:$0xff] }
  0x37   : > { %v483_v20 = vmin.f32 %v467_v11, 4.0  ;;  %v493_v22 = vadd.f32 0.5, %v477_v14  ;;  %v494_v24 = vadd.f32 0.5, %v478_v16  ;;  %v480_v25 = vmin.f32 %v464_v17, 4.0  ;;  %v442_v49 = vld [vmem:[%s5324_s27 + $0x28] sm:$0xff]  ;;  %v443_v55 = vld [vmem:[%s5324_s27 + $0x30] sm:$0xff] }
  0x38   : > { %v497_v23 = vadd.f32 0.5, %v481_v15  ;;  %v498_v26 = vadd.f32 0.5, %v482_v18  ;;  %v495_v27 = vadd.f32 0.5, %v479_v19  ;;  %v484_v29 = vmin.f32 %v468_v21, 4.0  ;;  %v440_v56 = vld [vmem:[%s5324_s27 + $0x18] sm:$0xff]  ;;  %s8525_s17 = sshll.u32 %s5318_s18, 7 }
  0x39   : > { %v499_v28 = vadd.f32 0.5, %v483_v20  ;;  %v509_v30 = vfloor.f32 %v493_v22  ;;  %v510_v32 = vfloor.f32 %v494_v24  ;;  %v496_v33 = vadd.f32 0.5, %v480_v25  ;;  %v444_v1 = vld [vmem:[%s5324_s27 + $0x38] sm:$0xff]  ;;  %s4986_s28 = sshll.u32 %s5255_s25, 5  ;;  %s4729_s25 = scalar_lea.sflag [#allocation4], %s5318_s18 }
  0x3a   : > { %v513_v31 = vfloor.f32 %v497_v23  ;;  %v514_v34 = vfloor.f32 %v498_v26  ;;  %v511_v35 = vfloor.f32 %v495_v27  ;;  %v500_v37 = vadd.f32 0.5, %v484_v29  ;;  %s4740_s21 = scalar_lea.hbm %s8119_s12, %s4986_s28 }
  0x3b   : > { %v515_v36 = vfloor.f32 %v499_v28  ;;  %v525_v40 = vmul.f32 0.25, %v509_v30  ;;  %v526_v42 = vmul.f32 0.25, %v510_v32  ;;  %v512_v43 = vfloor.f32 %v496_v33  ;;  %s4743_s30 = sshll.u32 %s4740_s21, 4  ;;  %s4744_s30 = int_to_ptr.hbm [resolvable:$true] %s4743_s30 }
  0x3c   : > { %v529_v41 = vmul.f32 0.25, %v513_v31  ;;  %v530_v45 = vmul.f32 0.25, %v514_v34  ;;  %v527_v46 = vmul.f32 0.25, %v511_v35  ;;  %v516_v48 = vfloor.f32 %v500_v37  ;;  %s5106_s14 = sshra.s32 %s4744_s30, 4  ;;  %s5107_s14 = int_to_ptr.hbm [resolvable:$true] %s5106_s14 }
  0x3d   : > { %v531_v47 = vmul.f32 0.25, %v515_v36  ;;  %v528_v52 = vmul.f32 0.25, %v512_v43  ;;  %v453_v53 = vmax.f32 %v437_v38, 0.0  ;;  %v457_v54 = vmax.f32 %v441_v39, 0.0  ;;  %v4968_v36 = vld [vmem:[%s8111_s4] sm:$0xff]  ;;  %v4969_v43 = vld [vmem:[%s8111_s4 + $0x8] sm:$0xff]  ;;  %p5113_p3 = scmp.lt.s32.totalorder %s5107_s14, %s8119_s12 }
  0x3e   : > { %v537_v51 = vpack.c.bf16 %v529_v41, %v525_v40  ;;  %v538_v57 = vpack.c.bf16 %v530_v45, %v526_v42  ;;  %v532_v59 = vmul.f32 0.25, %v516_v48  ;;  %v454_v60 = vmax.f32 %v438_v44, 0.0  ;;  %v557_v41 = vld [vmem:[%s8112_s5 + $0x20] sm:$0xff]  ;;  %v558_v44 = vld [vmem:[%s8112_s5 + $0x28] sm:$0xff]  ;;  %v559_v45 = vld [vmem:[%s8112_s5 + $0x30] sm:$0xff]  ;;  %s5108_s16 = scalar_lea.hbm %s5107_s14, 128 }
  0x3f   : > { %v539_v58 = vpack.c.bf16 %v531_v47, %v527_v46  ;;  %v469_v61 = vmin.f32 %v453_v53, 4.0  ;;  %v473_v62 = vmin.f32 %v457_v54, 4.0  ;;  %v458_v63 = vmax.f32 %v442_v49, 0.0  ;;  %v560_v46 = vld [vmem:[%s8112_s5 + $0x38] sm:$0xff]  ;;  %v4970_v47 = vld [vmem:[%s8111_s4 + $0x10] sm:$0xff]  ;;  %p5109_p6 = scmp.ne.s32.totalorder %s5107_s14, %s5108_s16 }
  0x40   : > { %680 = vmatpush.bf16.msra.mxu0 %v537_v51  ;;  %v455_v0 = vmax.f32 %v439_v50, 0.0  ;;  %719 = vmatpush.bf16.msra.mxu1 %v538_v57  ;;  %v540_v2 = vpack.c.bf16 %v532_v59, %v528_v52  ;;  %v470_v3 = vmin.f32 %v454_v60, 4.0  ;;  %v459_v4 = vmax.f32 %v443_v55, 0.0  ;;  %v4971_v48 = vld [vmem:[%s8111_s4 + $0x18] sm:$0xff] }
  0x41   : > { %758 = vmatpush.bf16.msra.mxu2 %v539_v58  ;;  %v456_v5 = vmax.f32 %v440_v56, 0.0  ;;  %v485_v6 = vadd.f32 0.5, %v469_v61  ;;  %v489_v7 = vadd.f32 0.5, %v473_v62  ;;  %v474_v8 = vmin.f32 %v458_v63, 4.0  ;;  %p5110_p13 = pnand %p5109_p6, %p5284_p11 }
  0x42   : > { %v471_v9 = vmin.f32 %v455_v0, 4.0  ;;  %797 = vmatpush.bf16.msra.mxu3 %v540_v2  ;;  %v486_v10 = vadd.f32 0.5, %v470_v3  ;;  %v475_v11 = vmin.f32 %v459_v4, 4.0  ;;  %v460_v12 = vmax.f32 %v444_v1, 0.0 }
  0x43   : > { %v472_v13 = vmin.f32 %v456_v5, 4.0  ;;  %v501_v14 = vfloor.f32 %v485_v6  ;;  %v505_v15 = vfloor.f32 %v489_v7  ;;  %v490_v16 = vadd.f32 0.5, %v474_v8  ;;  %p5111_p0 = pneg %p5110_p13 }
  0x44   : > { %v487_v17 = vadd.f32 0.5, %v471_v9  ;;  %v502_v18 = vfloor.f32 %v486_v10  ;;  %v491_v19 = vadd.f32 0.5, %v475_v11  ;;  %v476_v20 = vmin.f32 %v460_v12, 4.0 }
  0x45   : > { %v488_v21 = vadd.f32 0.5, %v472_v13  ;;  %v517_v22 = vmul.f32 0.25, %v501_v14  ;;  %v521_v23 = vmul.f32 0.25, %v505_v15  ;;  %v506_v24 = vfloor.f32 %v490_v16 }
  0x46   : > { %v503_v25 = vfloor.f32 %v487_v17  ;;  %v518_v26 = vmul.f32 0.25, %v502_v18  ;;  %v507_v27 = vfloor.f32 %v491_v19  ;;  %v492_v28 = vadd.f32 0.5, %v476_v20 }
  0x47   : > { %v504_v29 = vfloor.f32 %v488_v21  ;;  %v533_v30 = vpack.c.bf16 %v521_v23, %v517_v22  ;;  %v522_v31 = vmul.f32 0.25, %v506_v24  ;;  %v8127_v42 = vmov 0  }
  0x48   : > { %v519_v32 = vmul.f32 0.25, %v503_v25  ;;  %v523_v33 = vmul.f32 0.25, %v507_v27  ;;  %v508_v34 = vfloor.f32 %v492_v28  ;;  %5043 = vset.pattern.permute.xlu0 %v8127_v42  ;;  %5044 = vset.pattern.permute.xlu1 %v8127_v42  ;;  %vm1966_vm1 = vcmask 523264  }
  0x49   : > { %v520_v35 = vmul.f32 0.25, %v504_v29  ;;  %681 = vmatpush.bf16.msra.mxu0 %v533_v30  ;;  %v534_v37 = vpack.c.bf16 %v522_v31, %v518_v26  ;;  %587 = vperm.xlu0 %5043, %v557_v41   ;;  %vm2031_vm2 = vcmask 785408  }
  0x4a   : > { %v535_v38 = vpack.c.bf16 %v523_v33, %v519_v32  ;;  %v524_v39 = vmul.f32 0.25, %v508_v34  ;;  %597 = vperm.xlu1 %5044, %v559_v45  }
  0x4b   : > { %720 = vmatpush.bf16.msra.mxu1 %v534_v37 }
  0x4c   : > { %759 = vmatpush.bf16.msra.mxu2 %v535_v38  ;;  %v536_v40 = vpack.c.bf16 %v524_v39, %v520_v35  ;;  %4850 = vmatmul.msk.bf16.vlgmr.msra.gmra.mxu0 %vm655_vm0, %v4968_v36 }
  0x4e   : > { %798 = vmatpush.bf16.msra.mxu3 %v536_v40  ;;  %4856 = vmatmul.msk.bf16.vlgmr.msra.gmra.mxu1 %vm655_vm0, %v4968_v36 }
  0x4f   : > { %4862 = vmatmul.msk.bf16.vlgmr.msra.gmra.mxu2 %vm655_vm0, %v4968_v36 }
  0x51   : > { %4868 = vmatmul.msk.bf16.vlgmr.msra.gmra.mxu3 %vm655_vm0, %v4968_v36  ;;  %592 = vperm.xlu0 %5043, %v558_v44  }
  0x52   : > { %602 = vperm.xlu1 %5044, %v560_v46  }
  0x5c   : > { %4851 = vmatmul.msk.bf16.gmra.mxu0 %vm655_vm0, %v4969_v43 }
  0x5e   : > { %4857 = vmatmul.msk.bf16.gmra.mxu1 %vm655_vm0, %v4969_v43 }
  0x5f   : > { %4863 = vmatmul.msk.bf16.gmra.mxu2 %vm655_vm0, %v4969_v43 }
  0x61   : > { %4869 = vmatmul.msk.bf16.gmra.mxu3 %vm655_vm0, %v4969_v43 }
  0x6c   : > { %4852 = vmatmul.msk.bf16.gmra.mxu0 %vm655_vm0, %v4970_v47 }
  0x6e   : > { %4858 = vmatmul.msk.bf16.gmra.mxu1 %vm655_vm0, %v4970_v47 }
  0x6f   : > { %4864 = vmatmul.msk.bf16.gmra.mxu2 %vm655_vm0, %v4970_v47 }
  0x71   : > { %4870 = vmatmul.msk.bf16.gmra.mxu3 %vm655_vm0, %v4970_v47 }
  0x7c   : > { %4853 = vmatmul.msk.bf16.gmra.mxu0 %vm655_vm0, %v4971_v48 }
  0x7e   : > { %4859 = vmatmul.msk.bf16.gmra.mxu1 %vm655_vm0, %v4971_v48 }
  0x7f   : > { %4865 = vmatmul.msk.bf16.gmra.mxu2 %vm655_vm0, %v4971_v48 }
  0x81   : > { %4871 = vmatmul.msk.bf16.gmra.mxu3 %vm655_vm0, %v4971_v48 }
  0xbb   : > { %v588_v60 = vpop.permute.xlu0 %587 }
  0xbc   : > { %v598_v9 = vpop.permute.xlu1 %597 }
  0xc3   : > { %v593_v2 = vpop.permute.xlu0 %592 }
  0xc4   : > { %v603_v16 = vpop.permute.xlu1 %602 }
  0xc9   : > { %v5388_v49 = vpop.f32.mrf.mxu0 }
  0xca   : > { %8245 = vst [vmem:[#allocation14_spill] sm:$0xff] %v5388_v49 }
  0xcb   : > { %v5390_v50 = vpop.f32.mrf.mxu1 }
  0xcc   : > { %8246 = vst [vmem:[#allocation15_spill] sm:$0xff] %v5390_v50 }
  0xd1   : > { %v5392_v51 = vpop.f32.mrf.mxu0 }
  0xd2   : > { %8247 = vst [vmem:[#allocation16_spill] sm:$0xff] %v5392_v51  ;;  %v5412_v25 = vpop.f32.mrf.mxu2 }
  0xd3   : > { %v5394_v52 = vpop.f32.mrf.mxu1  ;;  %8257 = vst [vmem:[#allocation26_spill] sm:$0xff] %v5412_v25 }
  0xd4   : > { %8248 = vst [vmem:[#allocation17_spill] sm:$0xff] %v5394_v52  ;;  %v5396_v53 = vpop.f32.mrf.mxu3 }
  0xd5   : > { %8249 = vst [vmem:[#allocation18_spill] sm:$0xff] %v5396_v53 }
  0xd9   : > { %v5398_v54 = vpop.f32.mrf.mxu0 }
  0xda   : > { %8250 = vst [vmem:[#allocation19_spill] sm:$0xff] %v5398_v54  ;;  %v5414_v26 = vpop.f32.mrf.mxu2 }
  0xdb   : > { %v5400_v55 = vpop.f32.mrf.mxu1  ;;  %8258 = vst [vmem:[#allocation27_spill] sm:$0xff] %v5414_v26 }
  0xdc   : > { %8251 = vst [vmem:[#allocation20_spill] sm:$0xff] %v5400_v55  ;;  %v5402_v56 = vpop.f32.mrf.mxu3 }
  0xdd   : > { %8252 = vst [vmem:[#allocation21_spill] sm:$0xff] %v5402_v56 }
  0xe1   : > { %v5404_v57 = vpop.f32.mrf.mxu0 }
  0xe2   : > { %8253 = vst [vmem:[#allocation22_spill] sm:$0xff] %v5404_v57  ;;  %v5416_v27 = vpop.f32.mrf.mxu2 }
  0xe3   : > { %v5406_v58 = vpop.f32.mrf.mxu1  ;;  %8259 = vst [vmem:[#allocation28_spill] sm:$0xff] %v5416_v27 }
  0xe4   : > { %8254 = vst [vmem:[#allocation23_spill] sm:$0xff] %v5406_v58  ;;  %v5408_v59 = vpop.f32.mrf.mxu3 }
  0xe5   : > { %8255 = vst [vmem:[#allocation24_spill] sm:$0xff] %v5408_v59 }
  0xe9   : > { %v693_v61 = vpop.f32.mrf.mxu0 }
  0xea   : > { %v694_v62 = vadd.f32 %v693_v61, %v588_v60  ;;  %v5418_v28 = vpop.f32.mrf.mxu2 }
  0xeb   : > { %v732_v63 = vpop.f32.mrf.mxu1  ;;  %8260 = vst [vmem:[#allocation29_spill] sm:$0xff] %v5418_v28 }
  0xec   : > { %v5410_v0 = vpop.f32.mrf.mxu3  ;;  %v733_v1 = vadd.f32 %v732_v63, %v588_v60  ;;  %1006 = vxpose.xlu1.b32.start [1/4] (short) %v694_v62, 128 }
  0xed   : > { %8256 = vst [vmem:[#allocation25_spill] sm:$0xff] %v5410_v0 }
  0xee   : > { %1038 = vxpose.xlu2.b32.start [1/4] (short) %v733_v1, 128 }
  0xf1   : > { %v695_v3 = vpop.f32.mrf.mxu0 }
  0xf2   : > { %v696_v4 = vadd.f32 %v695_v3, %v593_v2  ;;  %v771_v29 = vpop.f32.mrf.mxu2 }
  0xf3   : > { %v734_v5 = vpop.f32.mrf.mxu1  ;;  %v772_v30 = vadd.f32 %v771_v29, %v588_v60 }
  0xf4   : > { %v810_v6 = vpop.f32.mrf.mxu3  ;;  %v735_v7 = vadd.f32 %v734_v5, %v593_v2  ;;  %1007 = vxpose.xlu1.b32.cont [2/4] (short) %v696_v4, 128 }
  0xf5   : > { %v811_v8 = vadd.f32 %v810_v6, %v588_v60 }
  0xf6   : > { %1039 = vxpose.xlu2.b32.cont [2/4] (short) %v735_v7, 128 }
  0xf7   : > { %1102 = vxpose.xlu0.b32.start [1/4] (short) %v811_v8, 128 }
  0xf9   : > { %v698_v10 = vpop.f32.mrf.mxu0 }
  0xfa   : > { %v699_v11 = vadd.f32 %v698_v10, %v598_v9  ;;  %v773_v31 = vpop.f32.mrf.mxu2 }
  0xfb   : > { %v737_v12 = vpop.f32.mrf.mxu1  ;;  %v774_v32 = vadd.f32 %v773_v31, %v593_v2 }
  0xfc   : > { %v812_v13 = vpop.f32.mrf.mxu3  ;;  %v738_v14 = vadd.f32 %v737_v12, %v598_v9  ;;  %1008 = vxpose.xlu1.b32.cont [3/4] (short) %v699_v11, 128 }
  0xfd   : > { %v813_v15 = vadd.f32 %v812_v13, %v593_v2 }
  0xfe   : > { %1040 = vxpose.xlu2.b32.cont [3/4] (short) %v738_v14, 128 }
  0xff   : > { %1103 = vxpose.xlu0.b32.cont [2/4] (short) %v813_v15, 128 }
 0x101   : > { %v700_v17 = vpop.f32.mrf.mxu0 }
 0x102   : > { %v701_v18 = vadd.f32 %v700_v17, %v603_v16  ;;  %v776_v33 = vpop.f32.mrf.mxu2 }
 0x103   : > { %v739_v19 = vpop.f32.mrf.mxu1  ;;  %v777_v34 = vadd.f32 %v776_v33, %v598_v9 }
 0x104   : > { %v815_v20 = vpop.f32.mrf.mxu3  ;;  %v740_v21 = vadd.f32 %v739_v19, %v603_v16  ;;  %1009 = vxpose.xlu1.b32.end [4/4] (short) %v701_v18, 128 }
 0x105   : > { %v816_v22 = vadd.f32 %v815_v20, %v598_v9 }
 0x106   : > { %1041 = vxpose.xlu2.b32.end [4/4] (short) %v740_v21, 128 }
 0x107   : > { %1104 = vxpose.xlu0.b32.cont [3/4] (short) %v816_v22, 128 }
 0x10a   : > { %v778_v35 = vpop.f32.mrf.mxu2 }
 0x10b   : > { %v779_v36 = vadd.f32 %v778_v35, %v603_v16 }
 0x10c   : > { %v817_v23 = vpop.f32.mrf.mxu3 }
 0x10d   : > { %v818_v24 = vadd.f32 %v817_v23, %v603_v16 }
 0x10f   : > { %1105 = vxpose.xlu0.b32.end [4/4] (short) %v818_v24, 128 }
 0x16e   : > { %1070 = vxpose.xlu2.b32.start [1/4] (short) %v772_v30, 128 }
 0x176   : > { %1071 = vxpose.xlu2.b32.cont [2/4] (short) %v774_v32, 128 }
 0x17e   : > { %1072 = vxpose.xlu2.b32.cont [3/4] (short) %v777_v34, 128 }
 0x186   : > { %1073 = vxpose.xlu2.b32.end [4/4] (short) %v779_v36, 128 }
 0x187   : > { %v5420_v37 = vpop.trf.xlu2 }
 0x188   : > { %8261 = vst [vmem:[#allocation30_spill] sm:$0xff] %v5420_v37 }
 0x18f   : > { %v5422_v38 = vpop.trf.xlu2 }
 0x190   : > { %8262 = vst [vmem:[#allocation31_spill] sm:$0xff] %v5422_v38  ;;  %v5424_v39 = vpop.trf.xlu1 }
 0x197   : > { %v5426_v40 = vpop.trf.xlu2 }
 0x198   : > { %v5428_v41 = vpop.trf.xlu1 }
 0x19b   : > { %v5430_v43 = vpop.trf.xlu0 }
 0x19c   : > { %8263 = vst [vmem:[#allocation32_spill] sm:$0xff] %v5430_v43 }
 0x19f   : > { %v5432_v44 = vpop.trf.xlu2 }
 0x1a0   : > { %v5434_v45 = vpop.trf.xlu1 }
 0x1a3   : > { %v5436_v46 = vpop.trf.xlu0 }
 0x1a4   : > { %8264 = vst [vmem:[#allocation33_spill] sm:$0xff] %v5436_v46 }
 0x1a7   : > { %v5438_v47 = vpop.trf.xlu2 }
 0x1a8   : > { %v5440_v48 = vpop.trf.xlu1 }
 0x1ab   : > { %v5442_v60 = vpop.trf.xlu0 }
 0x1af   : > { %v5444_v61 = vpop.trf.xlu2 }
 0x1b0   : > { %v5446_v62 = vpop.trf.xlu1 }
 0x1b1   : > { %8265 = vst [vmem:[#allocation34_spill] sm:$0xff] %v5446_v62 }
 0x1b3   : > { %v5448_v63 = vpop.trf.xlu0 }
 0x1b7   : > { %v5450_v1 = vpop.trf.xlu2 }
 0x1b8   : > { %v5452_v2 = vpop.trf.xlu1 }
 0x1b9   : > { %8266 = vst [vmem:[#allocation35_spill] sm:$0xff] %v5452_v2 }
 0x1bb   : > { %v5454_v3 = vpop.trf.xlu0 }
 0x1bf   : > { %v5456_v4 = vpop.trf.xlu2 }
 0x1c0   : > { %v5458_v5 = vpop.trf.xlu1 }
 0x1c3   : > { %v5460_v6 = vpop.trf.xlu0 }
 0x1c7   : > { %v5462_v7 = vpop.trf.xlu2 }
 0x1c8   : > { %v5464_v8 = vpop.trf.xlu1 }
 0x1cb   : > { %v5466_v9 = vpop.trf.xlu0 }
 0x1cf   : > { %v5468_v10 = vpop.trf.xlu2 }
 0x1d0   : > { %v5470_v11 = vpop.trf.xlu1 }
 0x1d3   : > { %v5472_v12 = vpop.trf.xlu0 }
 0x1d7   : > { %v1064_v13 = vpop.trf.xlu2 }
 0x1d8   : > { %v5474_v14 = vpop.trf.xlu1  ;;  %v1160_v18 = vmax.f32 %v1064_v13, 0.0  ;;  %v8267_v13 = vmov 0  }
 0x1da   : > { %v1224_v29 = vmin.f32 %v1160_v18, 4.0 }
 0x1db   : > { %v1126_v15 = vpop.trf.xlu0 }
 0x1dc   : > { %v1190_v16 = vmax.f32 %v1126_v15, 0.0  ;;  %v1288_v36 = vadd.f32 0.5, %v1224_v29 }
 0x1de   : > { %v1254_v17 = vmin.f32 %v1190_v16, 4.0 }
 0x1df   : > { %v1065_v19 = vpop.trf.xlu2 }
 0x1e0   : > { %v1318_v20 = vadd.f32 0.5, %v1254_v17  ;;  %v1161_v21 = vmax.f32 %v1065_v19, 0.0  ;;  %v1032_v22 = vpop.trf.xlu1 }
 0x1e1   : > { %v1144_v32 = vmax.f32 %v1032_v22, 0.0 }
 0x1e2   : > { %v1382_v23 = vfloor.f32 %v1318_v20  ;;  %v1225_v24 = vmin.f32 %v1161_v21, 4.0  ;;  %v1352_v21 = vfloor.f32 %v1288_v36 }
 0x1e3   : > { %v1127_v30 = vpop.trf.xlu0  ;;  %v1208_v15 = vmin.f32 %v1144_v32, 4.0 }
 0x1e4   : > { %v1191_v31 = vmax.f32 %v1127_v30, 0.0  ;;  %v1446_v33 = vmul.f32 0.25, %v1382_v23  ;;  %v1289_v34 = vadd.f32 0.5, %v1225_v24  ;;  %v1416_v53 = vmul.f32 0.25, %v1352_v21 }
 0x1e5   : > { %v1272_v22 = vadd.f32 0.5, %v1208_v15 }
 0x1e6   : > { %v1255_v35 = vmin.f32 %v1191_v31, 4.0  ;;  %v1510_v19 = vpack.c.bf16 %v1446_v33, %v1446_v33  ;;  %v1353_v28 = vfloor.f32 %v1289_v34 }
 0x1e7   : > { %v5476_v42 = vpop.trf.xlu2  ;;  %v1336_v25 = vfloor.f32 %v1272_v22 }
 0x1e8   : > { %v1319_v0 = vadd.f32 0.5, %v1255_v35  ;;  %v1033_v16 = vpop.trf.xlu1  ;;  %5045 = vset.pattern.permute.xlu2 %v8267_v13  ;;  %v1638_v31 = vunpack.c.l.b16 %v1510_v19  ;;  %v1417_v29 = vmul.f32 0.25, %v1353_v28 }
 0x1e9   : > { %v1145_v17 = vmax.f32 %v1033_v16, 0.0 }
 0x1ea   : > { %v1383_v20 = vfloor.f32 %v1319_v0  ;;  %v1481_v33 = vpack.c.bf16 %v1417_v29, %v1417_v29  ;;  %v1480_v0 = vpack.c.bf16 %v1416_v53, %v1416_v53 }
 0x1eb   : > { %v1128_v18 = vpop.trf.xlu0  ;;  %v1209_v58 = vmin.f32 %v1145_v17, 4.0  ;;  %v1400_v17 = vmul.f32 0.25, %v1336_v25 }
 0x1ec   : > { %v1447_v30 = vmul.f32 0.25, %v1383_v20  ;;  %v1192_v23 = vmax.f32 %v1128_v18, 0.0  ;;  %v1609_v28 = vunpack.c.l.b16 %v1481_v33  ;;  %v1608_v21 = vunpack.c.l.b16 %v1480_v0 }
 0x1ed   : > { %v1273_v24 = vadd.f32 0.5, %v1209_v58  ;;  %v1464_v18 = vpack.c.bf16 %v1400_v17, %v1400_v17 }
 0x1ee   : > { %v1511_v57 = vpack.c.bf16 %v1447_v30, %v1447_v30  ;;  %v1256_v13 = vmin.f32 %v1192_v23, 4.0 }
 0x1ef   : > { %v5479_v35 = vpop.trf.xlu2  ;;  %v1337_v16 = vfloor.f32 %v1273_v24  ;;  %v5487_v24 = vpack.c.b16 %v1609_v28, %v1608_v21  ;;  %v1592_v25 = vunpack.c.l.b16 %v1464_v18 }
 0x1f0   : > { %v1639_v32 = vunpack.c.l.b16 %v1511_v57  ;;  %v1320_v20 = vadd.f32 0.5, %v1256_v13 }
 0x1f1   : > { %v1401_v15 = vmul.f32 0.25, %v1337_v16 }
 0x1f2   : > { %v5481_v34 = vpack.c.b16 %v1639_v32, %v1638_v31  ;;  %v1384_v30 = vfloor.f32 %v1320_v20 }
 0x1f3   : > { %v1129_v36 = vpop.trf.xlu0  ;;  %v1465_v22 = vpack.c.bf16 %v1401_v15, %v1401_v15 }
 0x1f4   : > { %8268 = vst [vmem:[#allocation36_spill] sm:$0xff] %v5481_v34  ;;  %1734 = vrot.lane.b32.xlu0 %v5481_v34, %s5164_s26  ;;  %v1193_v58 = vmax.f32 %v1129_v36, 0.0  ;;  %v1448_v31 = vmul.f32 0.25, %v1384_v30 }
 0x1f5   : > { %v1593_v29 = vunpack.c.l.b16 %v1465_v22 }
 0x1f6   : > { %v1257_v19 = vmin.f32 %v1193_v58, 4.0  ;;  %v1512_v16 = vpack.c.bf16 %v1448_v31, %v1448_v31 }
 0x1f7   : > { %v5485_v57 = vpop.trf.xlu2  ;;  %v5493_v33 = vpack.c.b16 %v1593_v29, %v1592_v25 }
 0x1f8   : > { %v1321_v23 = vadd.f32 0.5, %v1257_v19  ;;  %v1640_v36 = vunpack.c.l.b16 %v1512_v16 }
 0x1fa   : > { %v1385_v53 = vfloor.f32 %v1321_v23 }
 0x1fc   : > { %v1449_v32 = vmul.f32 0.25, %v1385_v53  ;;  %1704 = vrot.lane.b32.xlu0 %v5487_v24, %s5164_s26 }
 0x1fe   : > { %v1513_v0 = vpack.c.bf16 %v1449_v32, %v1449_v32 }
 0x1ff   : > { %v5491_v13 = vpop.trf.xlu2 }
 0x200   : > { %v1641_v17 = vunpack.c.l.b16 %v1513_v0 }
 0x202   : > { %v5499_v15 = vpack.c.b16 %v1641_v17, %v1640_v36 }
 0x204   : > { %1752 = vrot.lane.b32.xlu0 %v5493_v33, %s5165_s19 }
 0x207   : > { %v5497_v20 = vpop.trf.xlu2 }
 0x20c   : > { %1736 = vrot.lane.b32.xlu0 %v5499_v15, %s5164_s26 }
 0x20f   : > { %v5503_v58 = vpop.trf.xlu2 }
 0x217   : > { %v5505_v28 = vpop.trf.xlu2 }
 0x21f   : > { %v5507_v19 = vpop.trf.xlu2 }
 0x227   : > { %v1090_v21 = vpop.trf.xlu2 }
 0x228   : > { %v1170_v18 = vmax.f32 %v1090_v21, 0.0 }
 0x22a   : > { %v1234_v30 = vmin.f32 %v1170_v18, 4.0 }
 0x22c   : > { %v1298_v22 = vadd.f32 0.5, %v1234_v30 }
 0x22e   : > { %v1362_v53 = vfloor.f32 %v1298_v22 }
 0x22f   : > { %v1091_v23 = vpop.trf.xlu2 }
 0x230   : > { %v1171_v25 = vmax.f32 %v1091_v23, 0.0  ;;  %v1426_v29 = vmul.f32 0.25, %v1362_v53 }
 0x232   : > { %v1235_v31 = vmin.f32 %v1171_v25, 4.0  ;;  %v1490_v36 = vpack.c.bf16 %v1426_v29, %v1426_v29  ;;  %v5511_v29 = vpop.trf.xlu0 }
 0x234   : > { %v1299_v32 = vadd.f32 0.5, %v1235_v31  ;;  %v1618_v26 = vunpack.c.l.b16 %v1490_v36 }
 0x236   : > { %v1363_v16 = vfloor.f32 %v1299_v32 }
 0x237   : > { %v1092_v0 = vpop.trf.xlu2 }
 0x238   : > { %v1427_v17 = vmul.f32 0.25, %v1363_v16  ;;  %v1172_v50 = vmax.f32 %v1092_v0, 0.0 }
 0x23a   : > { %v1491_v49 = vpack.c.bf16 %v1427_v17, %v1427_v17  ;;  %v1236_v56 = vmin.f32 %v1172_v50, 4.0 }
 0x23c   : > { %v1619_v52 = vunpack.c.l.b16 %v1491_v49  ;;  %v1300_v51 = vadd.f32 0.5, %v1236_v56 }
 0x23e   : > { %v5509_v59 = vpack.c.b16 %v1619_v52, %v1618_v26  ;;  %v1364_v18 = vfloor.f32 %v1300_v51 }
 0x23f   : > { %v1093_v21 = vpop.trf.xlu2 }
 0x240   : > { %8269 = vst [vmem:[#allocation37_spill] sm:$0xff] %v5509_v59  ;;  %v1173_v30 = vmax.f32 %v1093_v21, 0.0  ;;  %v1428_v23 = vmul.f32 0.25, %v1364_v18  ;;  %v1131_v21 = vpop.trf.xlu0 }
 0x242   : > { %v1237_v22 = vmin.f32 %v1173_v30, 4.0  ;;  %v1492_v32 = vpack.c.bf16 %v1428_v23, %v1428_v23  ;;  %v1034_v30 = vpop.trf.xlu1 }
 0x244   : > { %v1301_v25 = vadd.f32 0.5, %v1237_v22  ;;  %v1620_v36 = vunpack.c.l.b16 %v1492_v32  ;;  %v1163_v32 = vmax.f32 %v5479_v35, 0.0 }
 0x246   : > { %v1365_v53 = vfloor.f32 %v1301_v25  ;;  %v1227_v46 = vmin.f32 %v1163_v32, 4.0 }
 0x247   : > { %v1094_v31 = vpop.trf.xlu2 }
 0x248   : > { %v1429_v27 = vmul.f32 0.25, %v1365_v53  ;;  %v1174_v16 = vmax.f32 %v1094_v31, 0.0  ;;  %v1291_v35 = vadd.f32 0.5, %v1227_v46 }
 0x24a   : > { %v1493_v0 = vpack.c.bf16 %v1429_v27, %v1429_v27  ;;  %v1238_v50 = vmin.f32 %v1174_v16, 4.0  ;;  %v1162_v27 = vmax.f32 %v5476_v42, 0.0  ;;  %v1146_v42 = vmax.f32 %v1034_v30, 0.0 }
 0x24c   : > { %v1621_v49 = vunpack.c.l.b16 %v1493_v0  ;;  %v1302_v56 = vadd.f32 0.5, %v1238_v50 }
 0x24e   : > { %v5513_v52 = vpack.c.b16 %v1621_v49, %v1620_v36  ;;  %v1366_v51 = vfloor.f32 %v1302_v56  ;;  %v1132_v49 = vpop.trf.xlu0 }
 0x24f   : > { %v1095_v26 = vpop.trf.xlu2  ;;  %v1196_v43 = vmax.f32 %v1132_v49, 0.0 }
 0x250   : > { %8270 = vst [vmem:[#allocation38_spill] sm:$0xff] %v5513_v52  ;;  %v1175_v17 = vmax.f32 %v1095_v26, 0.0  ;;  %v1430_v22 = vmul.f32 0.25, %v1366_v51  ;;  %v1035_v26 = vpop.trf.xlu1 }
 0x252   : > { %v1239_v18 = vmin.f32 %v1175_v17, 4.0  ;;  %v1494_v55 = vpack.c.bf16 %v1430_v22, %v1430_v22  ;;  %v1226_v17 = vmin.f32 %v1162_v27, 4.0  ;;  %v1210_v27 = vmin.f32 %v1146_v42, 4.0 }
 0x254   : > { %v1303_v25 = vadd.f32 0.5, %v1239_v18  ;;  %v1622_v50 = vunpack.c.l.b16 %v1494_v55  ;;  %v1290_v55 = vadd.f32 0.5, %v1226_v17  ;;  %v1274_v30 = vadd.f32 0.5, %v1210_v27 }
 0x256   : > { %v1367_v23 = vfloor.f32 %v1303_v25 }
 0x257   : > { %v1096_v53 = vpop.trf.xlu2 }
 0x258   : > { %v1431_v54 = vmul.f32 0.25, %v1367_v23  ;;  %v1176_v31 = vmax.f32 %v1096_v53, 0.0 }
 0x25a   : > { %v1495_v16 = vpack.c.bf16 %v1431_v54, %v1431_v54  ;;  %v1240_v0 = vmin.f32 %v1176_v31, 4.0  ;;  %v1147_v54 = vmax.f32 %v1035_v26, 0.0 }
 0x25c   : > { %v1623_v36 = vunpack.c.l.b16 %v1495_v16  ;;  %v1304_v56 = vadd.f32 0.5, %v1240_v0  ;;  %v1211_v32 = vmin.f32 %v1147_v54, 4.0  ;;  %v1354_v16 = vfloor.f32 %v1290_v55 }
 0x25d   : > { %v1355_v0 = vfloor.f32 %v1291_v35  ;;  %v1260_v54 = vmin.f32 %v1196_v43, 4.0  ;;  %v1338_v55 = vfloor.f32 %v1274_v30 }
 0x25e   : > { %v5517_v51 = vpack.c.b16 %v1623_v36, %v1622_v50  ;;  %v1368_v25 = vfloor.f32 %v1304_v56  ;;  %v1133_v50 = vpop.trf.xlu0  ;;  %v1194_v56 = vmax.f32 %v5511_v29, 0.0  ;;  %v1275_v46 = vadd.f32 0.5, %v1211_v32 }
 0x25f   : > { %v1097_v18 = vpop.trf.xlu2  ;;  %v1197_v38 = vmax.f32 %v1133_v50, 0.0  ;;  %v1418_v26 = vmul.f32 0.25, %v1354_v16  ;;  %v1419_v17 = vmul.f32 0.25, %v1355_v0  ;;  %v1402_v32 = vmul.f32 0.25, %v1338_v55 }
 0x260   : > { %v1177_v22 = vmax.f32 %v1097_v18, 0.0  ;;  %1718 = vrot.lane.b32.xlu2 %v5517_v51, %s5164_s26  ;;  %1782 = vrot.lane.b32.xlu1 %v5517_v51, %s5165_s19  ;;  %v1432_v53 = vmul.f32 0.25, %v1368_v25  ;;  %v1195_v18 = vmax.f32 %v1131_v21, 0.0  ;;  %v1339_v35 = vfloor.f32 %v1275_v46 }
 0x261   : > { %v1261_v29 = vmin.f32 %v1197_v38, 4.0 }
 0x262   : > { %v1241_v23 = vmin.f32 %v1177_v22, 4.0  ;;  %v1496_v37 = vpack.c.bf16 %v1432_v53, %v1432_v53  ;;  %v1258_v22 = vmin.f32 %v1194_v56, 4.0  ;;  %v1259_v42 = vmin.f32 %v1195_v18, 4.0 }
 0x263   : > { %v1325_v62 = vadd.f32 0.5, %v1261_v29  ;;  %v1403_v16 = vmul.f32 0.25, %v1339_v35  ;;  %v1466_v18 = vpack.c.bf16 %v1402_v32, %v1402_v32  ;;  %v1159_v32 = vmax.f32 %v5468_v10, 0.0 }
 0x264   : > { %v1305_v31 = vadd.f32 0.5, %v1241_v23  ;;  %v1624_v21 = vunpack.c.l.b16 %v1496_v37  ;;  %v1483_v23 = vpack.c.bf16 %v1419_v17, %v1419_v17  ;;  %v1322_v27 = vadd.f32 0.5, %v1258_v22 }
 0x265   : > { %v1323_v50 = vadd.f32 0.5, %v1259_v42  ;;  %v1389_v56 = vfloor.f32 %v1325_v62  ;;  %v1467_v30 = vpack.c.bf16 %v1403_v16, %v1403_v16  ;;  %v1165_v16 = vmax.f32 %v5491_v13, 0.0 }
 0x266   : > { %v1369_v36 = vfloor.f32 %v1305_v31  ;;  %v1482_v31 = vpack.c.bf16 %v1418_v26, %v1418_v26  ;;  %v1611_v37 = vunpack.c.l.b16 %v1483_v23  ;;  %v1386_v43 = vfloor.f32 %v1322_v27 }
 0x267   : > { %v1098_v26 = vpop.trf.xlu2  ;;  %v1453_v42 = vmul.f32 0.25, %v1389_v56  ;;  %v1595_v29 = vunpack.c.l.b16 %v1467_v30  ;;  %v1229_v30 = vmin.f32 %v1165_v16, 4.0  ;;  %v1142_v10 = vmax.f32 %v5470_v11, 0.0 }
 0x268   : > { %v1433_v2 = vmul.f32 0.25, %v1369_v36  ;;  %1768 = vrot.lane.b32.xlu2 %v5487_v24, %s5165_s19  ;;  %1688 = vrot.lane.b32.xlu1 %v5493_v33, %s5164_s26  ;;  %v1324_v36 = vadd.f32 0.5, %v1260_v54  ;;  %v1610_v38 = vunpack.c.l.b16 %v1482_v31  ;;  %v1450_v17 = vmul.f32 0.25, %v1386_v43 }
 0x269   : > { %v1594_v54 = vunpack.c.l.b16 %v1466_v18  ;;  %v1517_v55 = vpack.c.bf16 %v1453_v42, %v1453_v42  ;;  %v1158_v43 = vmax.f32 %v5462_v7, 0.0  ;;  %v1223_v18 = vmin.f32 %v1159_v32, 4.0 }
 0x26a   : > { %v1497_v25 = vpack.c.bf16 %v1433_v2, %v1433_v2  ;;  %v1387_v2 = vfloor.f32 %v1323_v50  ;;  %v1388_v0 = vfloor.f32 %v1324_v36  ;;  %v5536_v46 = vpack.c.b16 %v1611_v37, %v1610_v38 }
 0x26b   : > { %v1514_v62 = vpack.c.bf16 %v1450_v17, %v1450_v17  ;;  %v5544_v35 = vpack.c.b16 %v1595_v29, %v1594_v54  ;;  %v1645_v50 = vunpack.c.l.b16 %v1517_v55  ;;  %v1178_v37 = vmax.f32 %v1098_v26, 0.0 }
 0x26c   : > { %v1625_v49 = vunpack.c.l.b16 %v1497_v25  ;;  %v1451_v25 = vmul.f32 0.25, %v1387_v2  ;;  %v1452_v22 = vmul.f32 0.25, %v1388_v0  ;;  %v1164_v2 = vmax.f32 %v5485_v57, 0.0 }
 0x26d   : > { %v1642_v23 = vunpack.c.l.b16 %v1514_v62  ;;  %v1242_v17 = vmin.f32 %v1178_v37, 4.0  ;;  %v1287_v7 = vadd.f32 0.5, %v1223_v18  ;;  %v1143_v57 = vmax.f32 %v5474_v14, 0.0 }
 0x26e   : > { %v5528_v53 = vpack.c.b16 %v1625_v49, %v1624_v21  ;;  %v1515_v21 = vpack.c.bf16 %v1451_v25, %v1451_v25  ;;  %v1516_v49 = vpack.c.bf16 %v1452_v22, %v1452_v22  ;;  %v1222_v22 = vmin.f32 %v1158_v43, 4.0 }
 0x26f   : > { %v1099_v36 = vpop.trf.xlu2  ;;  %v1228_v42 = vmin.f32 %v1164_v2, 4.0  ;;  %v1293_v13 = vadd.f32 0.5, %v1229_v30  ;;  %v1306_v26 = vadd.f32 0.5, %v1242_v17  ;;  %v1206_v55 = vmin.f32 %v1142_v10, 4.0 }
 0x270   : > { %1816 = vrot.lane.b32.xlu2 %v5493_v33, %s5166_s13  ;;  %1848 = vrot.lane.b32.xlu0 %v5528_v53, %s5166_s13  ;;  %v1643_v31 = vunpack.c.l.b16 %v1515_v21  ;;  %v1644_v27 = vunpack.c.l.b16 %v1516_v49  ;;  %v1179_v38 = vmax.f32 %v1099_v36, 0.0  ;;  %v1286_v62 = vadd.f32 0.5, %v1222_v22 }
 0x271   : > { %1720 = vrot.lane.b32.xlu1 %v5528_v53, %s5164_s26  ;;  %v1292_v21 = vadd.f32 0.5, %v1228_v42  ;;  %v1351_v49 = vfloor.f32 %v1287_v7  ;;  %v1188_v11 = vmax.f32 %v5466_v9, 0.0  ;;  %v1189_v14 = vmax.f32 %v5472_v12, 0.0 }
 0x272   : > { %v5556_v0 = vpack.c.b16 %v1643_v31, %v1642_v23  ;;  %v5558_v56 = vpack.c.b16 %v1645_v50, %v1644_v27  ;;  %v1243_v25 = vmin.f32 %v1179_v38, 4.0  ;;  %v1207_v23 = vmin.f32 %v1143_v57, 4.0  ;;  %v1036_v27 = vpop.trf.xlu1 }
 0x273   : > { %v1357_v31 = vfloor.f32 %v1293_v13  ;;  %v1370_v50 = vfloor.f32 %v1306_v26  ;;  %v1350_v32 = vfloor.f32 %v1286_v62  ;;  %v1356_v16 = vfloor.f32 %v1292_v21 }
 0x274   : > { %v1307_v54 = vadd.f32 0.5, %v1243_v25  ;;  %v1415_v37 = vmul.f32 0.25, %v1351_v49  ;;  %v1270_v38 = vadd.f32 0.5, %v1206_v55  ;;  %v1271_v43 = vadd.f32 0.5, %v1207_v23 }
 0x275   : > { %v1421_v2 = vmul.f32 0.25, %v1357_v31  ;;  %v1434_v18 = vmul.f32 0.25, %v1370_v50  ;;  %v1414_v17 = vmul.f32 0.25, %v1350_v32  ;;  %v1420_v25 = vmul.f32 0.25, %v1356_v16 }
 0x276   : > { %v1371_v36 = vfloor.f32 %v1307_v54  ;;  %v1252_v22 = vmin.f32 %v1188_v11, 4.0  ;;  %v1253_v42 = vmin.f32 %v1189_v14, 4.0  ;;  %v1479_v10 = vpack.c.bf16 %v1415_v37, %v1415_v37 }
 0x277   : > { %v1100_v29 = vpop.trf.xlu2  ;;  %v1334_v57 = vfloor.f32 %v1270_v38  ;;  %v1335_v13 = vfloor.f32 %v1271_v43  ;;  %v1485_v9 = vpack.c.bf16 %v1421_v2, %v1421_v2  ;;  %v1498_v26 = vpack.c.bf16 %v1434_v18, %v1434_v18 }
 0x278   : > { %1800 = vrot.lane.b32.xlu2 %v5499_v15, %s5165_s19  ;;  %1706 = vrot.lane.b32.xlu0 %v5536_v46, %s5164_s26  ;;  %v1435_v30 = vmul.f32 0.25, %v1371_v36  ;;  %v1478_v54 = vpack.c.bf16 %v1414_v17, %v1414_v17  ;;  %v1484_v62 = vpack.c.bf16 %v1420_v25, %v1420_v25  ;;  %v1180_v21 = vmax.f32 %v1100_v29, 0.0 }
 0x279   : > { %1784 = vrot.lane.b32.xlu1 %v5528_v53, %s5165_s19  ;;  %v1316_v23 = vadd.f32 0.5, %v1252_v22  ;;  %v1317_v31 = vadd.f32 0.5, %v1253_v42  ;;  %v1607_v50 = vunpack.c.l.b16 %v1479_v10  ;;  %v1398_v36 = vmul.f32 0.25, %v1334_v57 }
 0x27a   : > { %v1499_v12 = vpack.c.bf16 %v1435_v30, %v1435_v30  ;;  %v1037_v49 = vpop.trf.xlu1  ;;  %v1399_v32 = vmul.f32 0.25, %v1335_v13  ;;  %v1613_v16 = vunpack.c.l.b16 %v1485_v9  ;;  %v1626_v11 = vunpack.c.l.b16 %v1498_v26 }
 0x27b   : > { %v1148_v37 = vmax.f32 %v1036_v27, 0.0  ;;  %v1149_v38 = vmax.f32 %v1037_v49, 0.0  ;;  %v1606_v43 = vunpack.c.l.b16 %v1478_v54  ;;  %v1612_v2 = vunpack.c.l.b16 %v1484_v62 }
 0x27c   : > { %v1627_v14 = vunpack.c.l.b16 %v1499_v12  ;;  %v1244_v18 = vmin.f32 %v1180_v21, 4.0  ;;  %v1380_v29 = vfloor.f32 %v1316_v23  ;;  %v1381_v17 = vfloor.f32 %v1317_v31 }
 0x27d   : > { %v5582_v25 = vpack.c.b16 %v1607_v50, %v1606_v43  ;;  %v1462_v22 = vpack.c.bf16 %v1398_v36, %v1398_v36  ;;  %v1463_v42 = vpack.c.bf16 %v1399_v32, %v1399_v32  ;;  %v1212_v57 = vmin.f32 %v1148_v37, 4.0 }
 0x27e   : > { %v5586_v10 = vpack.c.b16 %v1627_v14, %v1626_v11  ;;  %v1213_v13 = vmin.f32 %v1149_v38, 4.0  ;;  %v1308_v9 = vadd.f32 0.5, %v1244_v18  ;;  %v1157_v26 = vmax.f32 %v5456_v4, 0.0 }
 0x27f   : > { %v1101_v7 = vpop.trf.xlu2  ;;  %8271 = vst [vmem:[#allocation39_spill] sm:$0xff] %v5582_v25  ;;  %v1444_v12 = vmul.f32 0.25, %v1380_v29  ;;  %v1445_v54 = vmul.f32 0.25, %v1381_v17  ;;  %v1590_v62 = vunpack.c.l.b16 %v1462_v22  ;;  %v1591_v21 = vunpack.c.l.b16 %v1463_v42 }
 0x280   : > { %1770 = vrot.lane.b32.xlu0 %v5536_v46, %s5165_s19  ;;  %1818 = vrot.lane.b32.xlu2 %v5544_v35, %s5166_s13  ;;  %v1181_v55 = vmax.f32 %v1101_v7, 0.0  ;;  %v5584_v7 = vpack.c.b16 %v1613_v16, %v1612_v2  ;;  %v1276_v49 = vadd.f32 0.5, %v1212_v57  ;;  %v1156_v23 = vmax.f32 %v5450_v1, 0.0 }
 0x281   : > { %1864 = vrot.lane.b32.xlu1 %v5499_v15, %s5166_s13  ;;  %v1372_v31 = vfloor.f32 %v1308_v9  ;;  %v1221_v36 = vmin.f32 %v1157_v26, 4.0  ;;  %v1508_v32 = vpack.c.bf16 %v1444_v12, %v1444_v12  ;;  %v1509_v16 = vpack.c.bf16 %v1445_v54, %v1445_v54 }
 0x282   : > { %v1245_v30 = vmin.f32 %v1181_v55, 4.0  ;;  %v1277_v55 = vadd.f32 0.5, %v1213_v13  ;;  %v5596_v11 = vpack.c.b16 %v1591_v21, %v1590_v62  ;;  %v1340_v14 = vfloor.f32 %v1276_v49 }
 0x283   : > { %v1220_v37 = vmin.f32 %v1156_v23, 4.0  ;;  %v1436_v38 = vmul.f32 0.25, %v1372_v31  ;;  %v1140_v1 = vmax.f32 %v5458_v5, 0.0  ;;  %v1285_v2 = vadd.f32 0.5, %v1221_v36 }
 0x284   : > { %v1309_v27 = vadd.f32 0.5, %v1245_v30  ;;  %v1341_v4 = vfloor.f32 %v1277_v55  ;;  %v1636_v18 = vunpack.c.l.b16 %v1508_v32  ;;  %v1637_v30 = vunpack.c.l.b16 %v1509_v16 }
 0x285   : > { %v1141_v29 = vmax.f32 %v5464_v8, 0.0  ;;  %v1404_v17 = vmul.f32 0.25, %v1340_v14  ;;  %v1284_v42 = vadd.f32 0.5, %v1220_v37  ;;  %v1500_v57 = vpack.c.bf16 %v1436_v38, %v1436_v38 }
 0x286   : > { %v1373_v50 = vfloor.f32 %v1309_v27  ;;  %v1405_v22 = vmul.f32 0.25, %v1341_v4  ;;  %v1349_v9 = vfloor.f32 %v1285_v2  ;;  %v1204_v27 = vmin.f32 %v1140_v1, 4.0 }
 0x287   : > { %v5606_v26 = vpack.c.b16 %v1637_v30, %v1636_v18  ;;  %v1205_v12 = vmin.f32 %v1141_v29, 4.0  ;;  %v1468_v54 = vpack.c.bf16 %v1404_v17, %v1404_v17  ;;  %v1348_v62 = vfloor.f32 %v1284_v42 }
 0x288   : > { %1738 = vrot.lane.b32.xlu0 %v5556_v0, %s5164_s26  ;;  %1740 = vrot.lane.b32.xlu2 %v5558_v56, %s5164_s26  ;;  %v1437_v43 = vmul.f32 0.25, %v1373_v50  ;;  %v1469_v5 = vpack.c.bf16 %v1405_v22, %v1405_v22  ;;  %v1628_v21 = vunpack.c.l.b16 %v1500_v57  ;;  %v1186_v8 = vmax.f32 %v5454_v3, 0.0 }
 0x289   : > { %1690 = vrot.lane.b32.xlu1 %v5544_v35, %s5164_s26  ;;  %v1187_v55 = vmax.f32 %v5460_v6, 0.0  ;;  %v1413_v23 = vmul.f32 0.25, %v1349_v9  ;;  %v1268_v31 = vadd.f32 0.5, %v1204_v27  ;;  %v1269_v50 = vadd.f32 0.5, %v1205_v12  ;;  %v5628_v9 = vpop.permute.xlu0 %1734 }
 0x28a   : > { %v1501_v13 = vpack.c.bf16 %v1437_v43, %v1437_v43  ;;  %v1596_v36 = vunpack.c.l.b16 %v1468_v54  ;;  %v1597_v32 = vunpack.c.l.b16 %v1469_v5  ;;  %v1412_v16 = vmul.f32 0.25, %v1348_v62  ;;  %8272 = vst [vmem:[#allocation40_spill] sm:$0xff] %v5628_v9 }
 0x28b   : > { %v1250_v4 = vmin.f32 %v1186_v8, 4.0  ;;  %v1251_v37 = vmin.f32 %v1187_v55, 4.0  ;;  %v1477_v38 = vpack.c.bf16 %v1413_v23, %v1413_v23  ;;  %v1332_v43 = vfloor.f32 %v1268_v31 }
 0x28c   : > { %v1629_v49 = vunpack.c.l.b16 %v1501_v13  ;;  %v1333_v1 = vfloor.f32 %v1269_v50  ;;  %v5618_v2 = vpack.c.b16 %v1597_v32, %v1596_v36  ;;  %v1476_v3 = vpack.c.bf16 %v1412_v16, %v1412_v16 }
 0x28d   : > { %v1314_v6 = vadd.f32 0.5, %v1250_v4  ;;  %v1315_v18 = vadd.f32 0.5, %v1251_v37  ;;  %v1605_v30 = vunpack.c.l.b16 %v1477_v38  ;;  %v1396_v29 = vmul.f32 0.25, %v1332_v43 }
 0x28e   : > { %v5616_v14 = vpack.c.b16 %v1629_v49, %v1628_v21  ;;  %v1397_v17 = vmul.f32 0.25, %v1333_v1  ;;  %v1169_v22 = vmax.f32 %v5507_v19, 0.0  ;;  %v1604_v57 = vunpack.c.l.b16 %v1476_v3 }
 0x28f   : > { %v1168_v13 = vmax.f32 %v5505_v28, 0.0  ;;  %v1378_v27 = vfloor.f32 %v1314_v6  ;;  %v1379_v12 = vfloor.f32 %v1315_v18  ;;  %v1460_v5 = vpack.c.bf16 %v1396_v29, %v1396_v29 }
 0x290   : > { %1802 = vrot.lane.b32.xlu0 %v5556_v0, %s5165_s19  ;;  %1798 = vrot.lane.b32.xlu2 %v5481_v34, %s5165_s19  ;;  %v5630_v54 = vpack.c.b16 %v1605_v30, %v1604_v57  ;;  %v1461_v62 = vpack.c.bf16 %v1397_v17, %v1397_v17  ;;  %v1233_v21 = vmin.f32 %v1169_v22, 4.0  ;;  %v1155_v19 = vmax.f32 %v5444_v61, 0.0 }
 0x291   : > { %1754 = vrot.lane.b32.xlu1 %v5544_v35, %s5165_s19  ;;  %v1232_v49 = vmin.f32 %v1168_v13, 4.0  ;;  %v1442_v8 = vmul.f32 0.25, %v1378_v27  ;;  %v1443_v28 = vmul.f32 0.25, %v1379_v12  ;;  %v1588_v55 = vunpack.c.l.b16 %v1460_v5  ;;  %v5644_v61 = vpop.permute.xlu0 %1704 }
 0x292   : > { %8273 = vst [vmem:[#allocation41_spill] sm:$0xff] %v5630_v54  ;;  %v1589_v23 = vunpack.c.l.b16 %v1461_v62  ;;  %v1297_v31 = vadd.f32 0.5, %v1233_v21  ;;  %v1154_v36 = vmax.f32 %v5438_v47, 0.0  ;;  %v1219_v16 = vmin.f32 %v1155_v19, 4.0 }
 0x293   : > { %v1296_v32 = vadd.f32 0.5, %v1232_v49  ;;  %v1506_v4 = vpack.c.bf16 %v1442_v8, %v1442_v8  ;;  %v1507_v37 = vpack.c.bf16 %v1443_v28, %v1443_v28 }
 0x294   : > { %v5642_v38 = vpack.c.b16 %v1589_v23, %v1588_v55  ;;  %v1361_v43 = vfloor.f32 %v1297_v31  ;;  %v1218_v1 = vmin.f32 %v1154_v36, 4.0  ;;  %v1283_v47 = vadd.f32 0.5, %v1219_v16 }
 0x295   : > { %v1360_v3 = vfloor.f32 %v1296_v32  ;;  %v1634_v6 = vunpack.c.l.b16 %v1506_v4  ;;  %v1635_v18 = vunpack.c.l.b16 %v1507_v37  ;;  %v1136_v4 = vmax.f32 %v5434_v45, 0.0 }
 0x296   : > { %8274 = vst [vmem:[#allocation42_spill] sm:$0xff] %v5642_v38  ;;  %v1425_v30 = vmul.f32 0.25, %v1361_v43  ;;  %v1282_v17 = vadd.f32 0.5, %v1218_v1  ;;  %v1347_v57 = vfloor.f32 %v1283_v47  ;;  %v5687_v1 = vld [vmem:[%s8109_s2 + $0x58] sm:$0xff] }
 0x297   : > { %v1424_v22 = vmul.f32 0.25, %v1360_v3  ;;  %v5652_v13 = vpack.c.b16 %v1635_v18, %v1634_v6  ;;  %v1200_v47 = vmin.f32 %v1136_v4, 4.0  ;;  %v562_v4 = vld [vmem:[%s8112_s5 + $0x48] sm:$0xff] }
 0x298   : > { %1866 = vrot.lane.b32.xlu0 %v5556_v0, %s5166_s13  ;;  %1716 = vrot.lane.b32.xlu2 %v5513_v52, %s5164_s26  ;;  %v1489_v27 = vpack.c.bf16 %v1425_v30, %v1425_v30  ;;  %v1346_v12 = vfloor.f32 %v1282_v17  ;;  %v1411_v21 = vmul.f32 0.25, %v1347_v57 }
 0x299   : > { %1834 = vrot.lane.b32.xlu1 %v5536_v46, %s5166_s13  ;;  %8275 = vst [vmem:[#allocation43_spill] sm:$0xff] %v5652_v13  ;;  %v1488_v5 = vpack.c.bf16 %v1424_v22, %v1424_v22  ;;  %v1753_v62 = vpop.permute.xlu0 %1752  ;;  %v2279_v22 = vunpack.c.h.bf16 %v5687_v1 }
 0x29a   : > { %v1617_v49 = vunpack.c.l.b16 %v1489_v27  ;;  %v1410_v55 = vmul.f32 0.25, %v1346_v12  ;;  %v1475_v36 = vpack.c.bf16 %v1411_v21, %v1411_v21  ;;  %v1264_v21 = vadd.f32 0.5, %v1200_v47 }
 0x29b   : > { %v1616_v23 = vunpack.c.l.b16 %v1488_v5  ;;  %v1167_v47 = vmax.f32 %v5503_v58, 0.0 }
 0x29c   : > { %v1474_v16 = vpack.c.bf16 %v1410_v55, %v1410_v55  ;;  %v1603_v37 = vunpack.c.l.b16 %v1475_v36  ;;  %v1328_v36 = vfloor.f32 %v1264_v21 }
 0x29d   : > { %v5667_v32 = vpack.c.b16 %v1617_v49, %v1616_v23 }
 0x29e   : > { %v1602_v3 = vunpack.c.l.b16 %v1474_v16 }
 0x2a0   : > { %1708 = vrot.lane.b32.xlu0 %v5584_v7, %s5164_s26  ;;  %1766 = vrot.lane.b32.xlu2 %v5582_v25, %s5165_s19  ;;  %v5697_v57 = vpack.c.b16 %v1603_v37, %v1602_v3 }
 0x2a1   : > { %1722 = vrot.lane.b32.xlu1 %v5586_v10, %s5164_s26  ;;  %v5682_v43 = vpop.permute.xlu0 %1736 }
 0x2a2   : > { %8276 = vst [vmem:[#allocation44_spill] sm:$0xff] %v5697_v57 }
 0x2a8   : > { %1772 = vrot.lane.b32.xlu0 %v5584_v7, %s5165_s19  ;;  %1814 = vrot.lane.b32.xlu2 %v5596_v11, %s5166_s13 }
 0x2a9   : > { %1786 = vrot.lane.b32.xlu1 %v5586_v10, %s5165_s19 }
 0x2b0   : > { %1836 = vrot.lane.b32.xlu0 %v5584_v7, %s5166_s13  ;;  %1796 = vrot.lane.b32.xlu2 %v5606_v26, %s5165_s19 }
 0x2b1   : > { %1850 = vrot.lane.b32.xlu1 %v5586_v10, %s5166_s13 }
 0x2b8   : > { %1724 = vrot.lane.b32.xlu0 %v5616_v14, %s5164_s26  ;;  %1714 = vrot.lane.b32.xlu2 %v5509_v59, %s5164_s26 }
 0x2b9   : > { %1692 = vrot.lane.b32.xlu1 %v5618_v2, %s5164_s26 }
 0x2ba   : > { %v1719_v42 = vpop.permute.xlu2 %1718 }
 0x2bb   : > { %v1932_v19 = vsel %vm655_vm0, %v5517_v51, %v1719_v42  ;;  %v5680_v42 = vld [vmem:[%s8109_s2 + $0x50] sm:$0xff] }
 0x2bc   : > { %v2277_v18 = vunpack.c.h.bf16 %v5680_v42 }
 0x2c0   : > { %1804 = vrot.lane.b32.xlu0 %v5558_v56, %s5165_s19  ;;  %1764 = vrot.lane.b32.xlu2 %v5630_v54, %s5165_s19 }
 0x2c1   : > { %1756 = vrot.lane.b32.xlu1 %v5618_v2, %s5165_s19 }
 0x2c2   : > { %v5639_v50 = vpop.permute.xlu2 %1768 }
 0x2c8   : > { %1868 = vrot.lane.b32.xlu0 %v5558_v56, %s5166_s13  ;;  %1812 = vrot.lane.b32.xlu2 %v5642_v38, %s5166_s13 }
 0x2c9   : > { %1820 = vrot.lane.b32.xlu1 %v5618_v2, %s5166_s13 }
 0x2ca   : > { %v1817_v29 = vpop.permute.xlu2 %1816 }
 0x2d0   : > { %1846 = vrot.lane.b32.xlu0 %v5517_v51, %s5166_s13  ;;  %1794 = vrot.lane.b32.xlu2 %v5652_v13, %s5165_s19  ;;  %v1137_v51 = vmax.f32 %v5440_v48, 0.0 }
 0x2d1   : > { %1788 = vrot.lane.b32.xlu1 %v5616_v14, %s5165_s19 }
 0x2d2   : > { %v1783_v8 = vpop.permute.xlu1 %1782  ;;  %v5665_v31 = vpop.permute.xlu2 %1800  ;;  %v1201_v30 = vmin.f32 %v1137_v51, 4.0 }
 0x2d3   : > { %v5663_v28 = vsel %vm1966_vm1, %v1932_v19, %v1783_v8 }
 0x2d8   : > { %1702 = vrot.lane.b32.xlu0 %v5582_v25, %s5164_s26  ;;  %1712 = vrot.lane.b32.xlu2 %v5667_v32, %s5164_s26 }
 0x2d9   : > { %1852 = vrot.lane.b32.xlu1 %v5616_v14, %s5166_s13 }
 0x2da   : > { %v1689_v45 = vpop.permute.xlu1 %1688  ;;  %v5701_v5 = vpop.permute.xlu2 %1818 }
 0x2db   : > { %v1887_v48 = vsel %vm655_vm0, %v5493_v33, %v1689_v45  ;;  %v1184_v33 = vmax.f32 %v5442_v60, 0.0  ;;  %v1185_v60 = vmax.f32 %v5448_v63, 0.0  ;;  %v1392_v45 = vmul.f32 0.25, %v1328_v36 }
 0x2dc   : > { %v1978_v6 = vsel %vm1966_vm1, %v1887_v48, %v1753_v62  ;;  %v1265_v62 = vadd.f32 0.5, %v1201_v30  ;;  %v5741_v30 = vld [vmem:[%s8109_s2 + $0x158] sm:$0xff] }
 0x2dd   : > { %v5694_v17 = vsel %vm2031_vm2, %v1978_v6, %v1817_v29  ;;  %v1248_v23 = vmin.f32 %v1184_v33, 4.0  ;;  %v1249_v51 = vmin.f32 %v1185_v60, 4.0  ;;  %v1153_v33 = vmax.f32 %v5432_v44, 0.0 }
 0x2de   : > { %v8131_v27 = vunpack.c.l.bf16 %v5694_v17  ;;  %v8128_v12 = vunpack.c.h.bf16 %v5694_v17  ;;  %v1329_v16 = vfloor.f32 %v1265_v62  ;;  %v1456_v60 = vpack.c.bf16 %v1392_v45, %v1392_v45 }
 0x2df   : > { %v1312_v37 = vadd.f32 0.5, %v1248_v23  ;;  %v1313_v3 = vadd.f32 0.5, %v1249_v51  ;;  %v1166_v23 = vmax.f32 %v5497_v20, 0.0  ;;  %v1231_v44 = vmin.f32 %v1167_v47, 4.0  ;;  %v4972_v20 = vld [vmem:[%s8111_s4 + $0x20] sm:$0xff] }
 0x2e0   : > { %1750 = vrot.lane.b32.xlu0 %v5596_v11, %s5165_s19  ;;  %1762 = vrot.lane.b32.xlu2 %v5697_v57, %s5165_s19  ;;  %v5710_v29 = vmul.f32 %v2277_v18, %v8131_v27  ;;  %v5716_v49 = vmul.f32 %v2279_v22, %v8128_v12  ;;  %v1393_v63 = vmul.f32 0.25, %v1329_v16  ;;  %v5736_v18 = vld [vmem:[%s8109_s2 + $0x150] sm:$0xff]  ;;  %v1152_v22 = vmax.f32 %v5426_v40, 0.0 }
 0x2e1   : > { %1832 = vrot.lane.b32.xlu1 %v5487_v24, %s5166_s13  ;;  %v1376_v62 = vfloor.f32 %v1312_v37  ;;  %v2341_v51 = vunpack.c.h.bf16 %v5736_v18  ;;  %v2343_v40 = vunpack.c.h.bf16 %v5741_v30  ;;  %v1377_v55 = vfloor.f32 %v1313_v3  ;;  %4866 = vmatmul.msk.bf16.gmra.mxu2 %vm655_vm0, %v4972_v20 }
 0x2e2   : > { %8277 = vst [vmem:[#allocation45_spill] sm:$0xff] %v5710_v29  ;;  %v1849_v19 = vpop.permute.xlu0 %1848  ;;  %v5726_v48 = vpop.permute.xlu2 %1740  ;;  %v1457_v16 = vpack.c.bf16 %v1393_v63, %v1393_v63  ;;  %v1217_v37 = vmin.f32 %v1153_v33, 4.0  ;;  %v1230_v45 = vmin.f32 %v1166_v23, 4.0  ;;  %v5771_v63 = vld [vmem:[%s8109_s2 + $0x1d8] sm:$0xff]  ;;  %v1584_v47 = vunpack.c.l.b16 %v1456_v60  ;;  %4872 = vmatmul.msk.bf16.gmra.mxu3 %vm655_vm0, %v4972_v20  ;;  %4854 = vmatmul.msk.bf16.gmra.mxu0 %vm655_vm0, %v4972_v20 }
 0x2e3   : > { %8278 = vst [vmem:[#allocation46_spill] sm:$0xff] %v5716_v49  ;;  %v1721_v8 = vpop.permute.xlu1 %1720  ;;  %v1440_v3 = vmul.f32 0.25, %v1376_v62  ;;  %v1295_v23 = vadd.f32 0.5, %v1231_v44  ;;  %v1959_v62 = vsel %vm655_vm0, %v5499_v15, %v5682_v43  ;;  %4860 = vmatmul.msk.bf16.gmra.mxu1 %vm655_vm0, %v4972_v20 }
 0x2e4   : > { %v1935_v21 = vsel %vm655_vm0, %v5528_v53, %v1721_v8  ;;  %v1216_v8 = vmin.f32 %v1152_v22, 4.0  ;;  %v1294_v43 = vadd.f32 0.5, %v1230_v45 }
 0x2e5   : > { %v1504_v27 = vpack.c.bf16 %v1440_v3, %v1440_v3  ;;  %v1359_v20 = vfloor.f32 %v1295_v23 }
 0x2e7   : > { %v1632_v3 = vunpack.c.l.b16 %v1504_v27  ;;  %v8286_v27 = vld [vmem:[#allocation35_spill] sm:$0xff] }
 0x2e8   : > { %1732 = vrot.lane.b32.xlu0 %v5606_v26, %s5164_s26  ;;  %612 = vperm.xlu2 %5045, %v562_v4  }
 0x2e9   : > { %1686 = vrot.lane.b32.xlu1 %v5596_v11, %s5164_s26 }
 0x2ea   : > { %v5731_v6 = vpop.permute.xlu0 %1706 }
 0x2eb   : > { %v1785_v58 = vpop.permute.xlu1 %1784 }
 0x2ec   : > { %v2010_v36 = vsel %vm1966_vm1, %v1935_v21, %v1785_v58  ;;  %v1441_v21 = vmul.f32 0.25, %v1377_v55  ;;  %v1585_v58 = vunpack.c.l.b16 %v1457_v16  ;;  %v2375_v55 = vunpack.c.h.bf16 %v5771_v63 }
 0x2ed   : > { %v5750_v4 = vsel %vm2031_vm2, %v2010_v36, %v1849_v19  ;;  %v5766_v19 = vld [vmem:[%s8109_s2 + $0x1d0] sm:$0xff]  ;;  %v2026_v36 = vsel %vm1966_vm1, %v1959_v62, %v5665_v31  ;;  %v1135_v31 = vmax.f32 %v5428_v41, 0.0  ;;  %v1358_v41 = vfloor.f32 %v1294_v43 }
 0x2ee   : > { %v8130_v12 = vunpack.c.l.bf16 %v5750_v4  ;;  %v8129_v53 = vunpack.c.h.bf16 %v5750_v4  ;;  %v1505_v29 = vpack.c.bf16 %v1441_v21, %v1441_v21  ;;  %v5807_v49 = vpack.c.b16 %v1585_v58, %v1584_v47 }
 0x2ef   : > { %v1423_v21 = vmul.f32 0.25, %v1359_v20 }
 0x2f0   : > { %1844 = vrot.lane.b32.xlu0 %v5513_v52, %s5166_s13  ;;  %1826 = vrot.lane.b32.xlu2 %v5697_v57, %s5166_s13  ;;  %v5778_v22 = vmul.f32 %v2341_v51, %v8130_v12  ;;  %v5782_v33 = vmul.f32 %v2343_v40, %v8129_v53  ;;  %v5793_v51 = vpop.permute.xlu2 %1798  ;;  %v2373_v40 = vunpack.c.h.bf16 %v5766_v19  ;;  %v1134_v53 = vmax.f32 %v5424_v39, 0.0 }
 0x2f1   : > { %1862 = vrot.lane.b32.xlu1 %v5481_v34, %s5166_s13  ;;  %8281 = vst [vmem:[#allocation49_spill] sm:$0xff] %v5793_v51  ;;  %v1280_v51 = vadd.f32 0.5, %v1216_v8  ;;  %v1281_v34 = vadd.f32 0.5, %v1217_v37  ;;  %v1633_v47 = vunpack.c.l.b16 %v1505_v29  ;;  %v8285_v8 = vld [vmem:[#allocation34_spill] sm:$0xff]  ;;  %v1139_v29 = vmax.f32 %v8286_v27, 0.0 }
 0x2f2   : > { %8279 = vst [vmem:[#allocation47_spill] sm:$0xff] %v5778_v22  ;;  %v5787_v60 = vpop.permute.xlu0 %1770  ;;  %v1198_v37 = vmin.f32 %v1134_v53, 4.0  ;;  %v1138_v53 = vmax.f32 %v8285_v8, 0.0  ;;  %v5842_v8 = vld [vmem:[%s8109_s2 + $0x60] sm:$0xff] }
 0x2f3   : > { %8280 = vst [vmem:[#allocation48_spill] sm:$0xff] %v5782_v33  ;;  %v1865_v16 = vpop.permute.xlu1 %1864  ;;  %v1344_v23 = vfloor.f32 %v1280_v51 }
 0x2f4   : > { %v5801_v44 = vsel %vm2031_vm2, %v2026_v36, %v1865_v16  ;;  %v1345_v36 = vfloor.f32 %v1281_v34  ;;  %v1422_v16 = vmul.f32 0.25, %v1358_v41  ;;  %v1262_v15 = vadd.f32 0.5, %v1198_v37  ;;  %v8287_v34 = vld [vmem:[#allocation30_spill] sm:$0xff] }
 0x2f5   : > { %v8136_v62 = vunpack.c.l.bf16 %v5801_v44  ;;  %v8135_v12 = vunpack.c.h.bf16 %v5801_v44  ;;  %v1408_v22 = vmul.f32 0.25, %v1344_v23  ;;  %v1150_v51 = vmax.f32 %v8287_v34, 0.0 }
 0x2f6   : > { %v1409_v33 = vmul.f32 0.25, %v1345_v36  ;;  %v1486_v20 = vpack.c.bf16 %v1422_v16, %v1422_v16  ;;  %v1326_v37 = vfloor.f32 %v1262_v15  ;;  %v1202_v15 = vmin.f32 %v1138_v53, 4.0 }
 0x2f7   : > { %v5811_v45 = vmul.f32 %v2373_v40, %v8136_v62  ;;  %v5815_v39 = vmul.f32 %v2375_v55, %v8135_v12  ;;  %v1199_v40 = vmin.f32 %v1135_v31, 4.0  ;;  %v5827_v12 = vpack.c.b16 %v1633_v47, %v1632_v3  ;;  %v8288_v31 = vld [vmem:[#allocation31_spill] sm:$0xff] }
 0x2f8   : > { %1700 = vrot.lane.b32.xlu0 %v5630_v54, %s5164_s26  ;;  %1680 = vrot.lane.b32.xlu2 %v5807_v49, %s5164_s26  ;;  %v5825_v43 = vpop.permute.xlu2 %1716  ;;  %v1487_v62 = vpack.c.bf16 %v1423_v21, %v1423_v21  ;;  %v1151_v41 = vmax.f32 %v8288_v31, 0.0  ;;  %v5847_v21 = vld [vmem:[%s8109_s2 + $0x68] sm:$0xff]  ;;  %v1472_v23 = vpack.c.bf16 %v1408_v22, %v1408_v22  ;;  %v1473_v36 = vpack.c.bf16 %v1409_v33, %v1409_v33  ;;  %v5865_v33 = vld [vmem:[%s8109_s2 + $0x1e0] sm:$0xff] }
 0x2f9   : > { %8282 = vst [vmem:[#allocation50_spill] sm:$0xff] %v5811_v45  ;;  %1780 = vrot.lane.b32.xlu1 %v5513_v52, %s5165_s19  ;;  %v1263_v52 = vadd.f32 0.5, %v1199_v40  ;;  %v1614_v34 = vunpack.c.l.b16 %v1486_v20 }
 0x2fa   : > { %8283 = vst [vmem:[#allocation51_spill] sm:$0xff] %v5815_v39  ;;  %v1739_v58 = vpop.permute.xlu0 %1738  ;;  %v1615_v3 = vunpack.c.l.b16 %v1487_v62  ;;  %v1203_v62 = vmin.f32 %v1139_v29, 4.0  ;;  %v2281_v39 = vunpack.c.h.bf16 %v5842_v8  ;;  %v1215_v53 = vmin.f32 %v1151_v41, 4.0 }
 0x2fb   : > { %v1691_v55 = vpop.permute.xlu1 %1690  ;;  %8284 = vst [vmem:[#allocation52_spill] sm:$0xff] %v5825_v43  ;;  %v1327_v40 = vfloor.f32 %v1263_v52  ;;  %v1390_v29 = vmul.f32 0.25, %v1326_v37  ;;  %v1962_v41 = vsel %vm655_vm0, %v5556_v0, %v1739_v58  ;;  %v2377_v37 = vunpack.c.h.bf16 %v5865_v33 }
 0x2fc   : > { %v1890_v16 = vsel %vm655_vm0, %v5544_v35, %v1691_v55  ;;  %v5858_v22 = vpack.c.b16 %v1615_v3, %v1614_v34  ;;  %v1214_v55 = vmin.f32 %v1150_v51, 4.0  ;;  %v5872_v3 = vld [vmem:[%s8109_s2 + $0x1e8] sm:$0xff]  ;;  %v1601_v34 = vunpack.c.l.b16 %v1473_v36 }
 0x2fd   : > { %v1267_v35 = vadd.f32 0.5, %v1203_v62  ;;  %v5886_v51 = vld [vmem:[%s8109_s2 + $0xe8] sm:$0xff]  ;;  %v2379_v0 = vunpack.c.h.bf16 %v5872_v3 }
 0x2ff   : > { %v1331_v9 = vfloor.f32 %v1267_v35 }
 0x300   : > { %1748 = vrot.lane.b32.xlu0 %v5642_v38, %s5165_s19  ;;  %1856 = vrot.lane.b32.xlu2 %v5827_v12, %s5166_s13  ;;  %v5867_v20 = vpop.permute.xlu2 %1766 }
 0x301   : > { %1830 = vrot.lane.b32.xlu1 %v5582_v25, %s5166_s13  ;;  %v2283_v25 = vunpack.c.h.bf16 %v5847_v21  ;;  %8289 = vst [vmem:[#allocation34_spill] sm:$0xff] %v5867_v20 }
 0x302   : > { %v1803_v47 = vpop.permute.xlu0 %1802 }
 0x303   : > { %v1755_v27 = vpop.permute.xlu1 %1754  ;;  %v2028_v62 = vsel %vm1966_vm1, %v1962_v41, %v1803_v47 }
 0x304   : > { %v1980_v31 = vsel %vm1966_vm1, %v1890_v16, %v1755_v27  ;;  %v5877_v16 = vld [vmem:[%s8109_s2 + $0xe0] sm:$0xff]  ;;  %v1600_v27 = vunpack.c.l.b16 %v1472_v23 }
 0x305   : > { %v5854_v45 = vsel %vm2031_vm2, %v1980_v31, %v5701_v5  ;;  %v1391_v5 = vmul.f32 0.25, %v1327_v40  ;;  %v1266_v31 = vadd.f32 0.5, %v1202_v15  ;;  %v1914_v15 = vsel %vm655_vm0, %v5536_v46, %v5731_v6 }
 0x306   : > { %v8144_v52 = vunpack.c.l.bf16 %v5854_v45  ;;  %v8291_v36 = vunpack.c.h.bf16 %v5854_v45  ;;  %v1996_v20 = vsel %vm1966_vm1, %v1914_v15, %v5787_v60  ;;  %v1454_v46 = vpack.c.bf16 %v1390_v29, %v1390_v29 }
 0x307   : > { %v5920_v43 = vpack.c.b16 %v1601_v34, %v1600_v27  ;;  %v1455_v60 = vpack.c.bf16 %v1391_v5, %v1391_v5  ;;  %v1278_v27 = vadd.f32 0.5, %v1214_v55  ;;  %v1279_v34 = vadd.f32 0.5, %v1215_v53 }
 0x308   : > { %1730 = vrot.lane.b32.xlu0 %v5652_v13, %s5164_s26  ;;  %1774 = vrot.lane.b32.xlu2 %v5858_v22, %s5165_s19  ;;  %v5895_v23 = vmul.f32 %v2281_v39, %v8144_v52  ;;  %v5899_v40 = vmul.f32 %v2283_v25, %v8291_v36  ;;  %v2315_v25 = vunpack.c.h.bf16 %v5886_v51 }
 0x309   : > { %1684 = vrot.lane.b32.xlu1 %v5642_v38, %s5164_s26  ;;  %v2313_v38 = vunpack.c.h.bf16 %v5877_v16 }
 0x30a   : > { %8290 = vst [vmem:[#allocation35_spill] sm:$0xff] %v5895_v23  ;;  %v1867_v58 = vpop.permute.xlu0 %1866 }
 0x30b   : > { %8292 = vst [vmem:[#allocation30_spill] sm:$0xff] %v5899_v40  ;;  %v5910_v39 = vsel %vm2031_vm2, %v2028_v62, %v1867_v58  ;;  %v1835_v36 = vpop.permute.xlu1 %1834  ;;  %v1330_v58 = vfloor.f32 %v1266_v31  ;;  %v1582_v31 = vunpack.c.l.b16 %v1454_v46 }
 0x30c   : > { %v8146_v6 = vunpack.c.l.bf16 %v5910_v39  ;;  %v8145_v47 = vunpack.c.h.bf16 %v5910_v39  ;;  %v5918_v41 = vsel %vm2031_vm2, %v1996_v20, %v1835_v36 }
 0x30d   : > { %v8148_v15 = vunpack.c.l.bf16 %v5918_v41  ;;  %v8147_v62 = vunpack.c.h.bf16 %v5918_v41 }
 0x30e   : > { %v5926_v52 = vmul.f32 %v2377_v37, %v8146_v6  ;;  %v5930_v29 = vmul.f32 %v2379_v0, %v8145_v47  ;;  %v5946_v37 = vpop.permute.xlu2 %1814  ;;  %v1394_v0 = vmul.f32 0.25, %v1330_v58  ;;  %v1342_v47 = vfloor.f32 %v1278_v27 }
 0x30f   : > { %v5934_v20 = vmul.f32 %v2313_v38, %v8148_v15  ;;  %v5938_v5 = vmul.f32 %v2315_v25, %v8147_v62  ;;  %v1583_v38 = vunpack.c.l.b16 %v1455_v60  ;;  %v1395_v25 = vmul.f32 0.25, %v1331_v9 }
 0x310   : > { %8293 = vst [vmem:[#allocation31_spill] sm:$0xff] %v5926_v52  ;;  %1842 = vrot.lane.b32.xlu0 %v5509_v59, %s5166_s13  ;;  %1824 = vrot.lane.b32.xlu2 %v5920_v43, %s5166_s13  ;;  %v1343_v6 = vfloor.f32 %v1279_v34  ;;  %v1458_v15 = vpack.c.bf16 %v1394_v0, %v1394_v0  ;;  %v1406_v46 = vmul.f32 0.25, %v1342_v47  ;;  %v2159_v47 = vld [vmem:[%s8109_s2 + $0xf8] sm:$0xff] }
 0x311   : > { %8294 = vst [vmem:[#allocation53_spill] sm:$0xff] %v5930_v29  ;;  %1860 = vrot.lane.b32.xlu1 %v5606_v26, %s5166_s13  ;;  %v5952_v62 = vpack.c.b16 %v1583_v38, %v1582_v31  ;;  %v1459_v35 = vpack.c.bf16 %v1395_v25, %v1395_v25  ;;  %v2318_v40 = vunpack.c.l.bf16 %v2159_v47 }
 0x312   : > { %8295 = vst [vmem:[#allocation54_spill] sm:$0xff] %v5934_v20  ;;  %v1709_v55 = vpop.permute.xlu0 %1708  ;;  %v1407_v23 = vmul.f32 0.25, %v1343_v6  ;;  %v1586_v9 = vunpack.c.l.b16 %v1458_v15  ;;  %v1470_v31 = vpack.c.bf16 %v1406_v46, %v1406_v46  ;;  %v2158_v6 = vld [vmem:[%s8109_s2 + $0xf0] sm:$0xff]  ;;  %v5982_v15 = vld [vmem:[%s8109_s2 + $0x168] sm:$0xff] }
 0x313   : > { %8296 = vst [vmem:[#allocation55_spill] sm:$0xff] %v5938_v5  ;;  %v1723_v36 = vpop.permute.xlu1 %1722  ;;  %v1587_v60 = vunpack.c.l.b16 %v1459_v35  ;;  %v1917_v35 = vsel %vm655_vm0, %v5584_v7, %v1709_v55  ;;  %v2317_v46 = vunpack.c.h.bf16 %v2158_v6  ;;  %v2316_v5 = vunpack.c.l.bf16 %v2158_v6  ;;  %v561_v6 = vld [vmem:[%s8112_s5 + $0x40] sm:$0xff] }
 0x314   : > { %v1471_v38 = vpack.c.bf16 %v1407_v23, %v1407_v23  ;;  %v1598_v25 = vunpack.c.l.b16 %v1470_v31  ;;  %v5977_v23 = vld [vmem:[%s8109_s2 + $0x160] sm:$0xff]  ;;  %v1938_v31 = vsel %vm655_vm0, %v5586_v10, %v1723_v36  ;;  %v2347_v55 = vunpack.c.h.bf16 %v5982_v15 }
 0x315   : > { %v5962_v0 = vpack.c.b16 %v1587_v60, %v1586_v9  ;;  %v2319_v9 = vunpack.c.h.bf16 %v2159_v47  ;;  %v2312_v60 = vunpack.c.l.bf16 %v5877_v16  ;;  %v2345_v7 = vunpack.c.h.bf16 %v5977_v23 }
 0x316   : > { %v5960_v27 = vpop.permute.xlu2 %1796  ;;  %v1599_v53 = vunpack.c.l.b16 %v1471_v38  ;;  %v2314_v10 = vunpack.c.l.bf16 %v5886_v51 }
 0x317   : > { %8297 = vst [vmem:[#allocation56_spill] sm:$0xff] %v5962_v0 }
 0x318   : > { %1698 = vrot.lane.b32.xlu0 %v5697_v57, %s5164_s26  ;;  %1678 = vrot.lane.b32.xlu2 %v5952_v62, %s5164_s26  ;;  %v6000_v36 = vpack.c.b16 %v1599_v53, %v1598_v25  ;;  %v8302_v25 = vunpack.c.l.bf16 %v5918_v41 }
 0x319   : > { %1778 = vrot.lane.b32.xlu1 %v5509_v59, %s5165_s19 }
 0x31a   : > { %v1773_v58 = vpop.permute.xlu0 %1772 }
 0x31b   : > { %v1787_v34 = vpop.permute.xlu1 %1786  ;;  %v1998_v38 = vsel %vm1966_vm1, %v1917_v35, %v1773_v58  ;;  %v2440_v35 = vmul.f32 %v2312_v60, %v8302_v25  ;;  %v554_v25 = vld [vmem:[%s8112_s5 + $0x8] sm:$0xff] }
 0x31c   : > { %v2012_v52 = vsel %vm1966_vm1, %v1938_v31, %v1787_v34  ;;  %v4973_v31 = vld [vmem:[%s8111_s4 + $0x28] sm:$0xff] }
 0x31d   : > { %4867 = vmatmul.msk.bf16.gmra.mxu2 %vm655_vm0, %v4973_v31  ;;  %4873 = vmatmul.msk.bf16.gmra.mxu3 %vm655_vm0, %v4973_v31 }
 0x31e   : > { %v6002_v58 = vpop.permute.xlu2 %1714  ;;  %4855 = vmatmul.msk.bf16.gmra.mxu0 %vm655_vm0, %v4973_v31  ;;  %4861 = vmatmul.msk.bf16.gmra.mxu1 %vm655_vm0, %v4973_v31 }
 0x320   : > { %1746 = vrot.lane.b32.xlu0 %v5962_v0, %s5165_s19  ;;  %1742 = vrot.lane.b32.xlu2 %v5952_v62, %s5165_s19 }
 0x321   : > { %1828 = vrot.lane.b32.xlu1 %v5630_v54, %s5166_s13 }
 0x322   : > { %v1837_v20 = vpop.permute.xlu0 %1836 }
 0x323   : > { %v2078_v29 = vsel %vm2031_vm2, %v1998_v38, %v1837_v20  ;;  %v1851_v57 = vpop.permute.xlu1 %1850  ;;  %v555_v38 = vld [vmem:[%s8112_s5 + $0x10] sm:$0xff] }
 0x324   : > { %v2222_v54 = vunpack.c.l.bf16 %v2078_v29  ;;  %v2223_v59 = vunpack.c.h.bf16 %v2078_v29  ;;  %v5997_v16 = vsel %vm2031_vm2, %v2012_v52, %v1851_v57 }
 0x325   : > { %v8160_v34 = vunpack.c.l.bf16 %v5997_v16  ;;  %v8159_v20 = vunpack.c.h.bf16 %v5997_v16 }
 0x326   : > { %v6009_v47 = vmul.f32 %v2317_v46, %v2222_v54  ;;  %v6011_v29 = vmul.f32 %v2319_v9, %v2223_v59  ;;  %v2444_v57 = vmul.f32 %v2316_v5, %v2222_v54  ;;  %v2446_v52 = vmul.f32 %v2318_v40, %v2223_v59 }
 0x327   : > { %v6015_v51 = vmul.f32 %v2345_v7, %v8160_v34  ;;  %v6019_v53 = vmul.f32 %v2347_v55, %v8159_v20  ;;  %v8303_v59 = vunpack.c.h.bf16 %v5918_v41  ;;  %v6038_v7 = vpop.permute.xlu2 %1764  ;;  %v8305_v55 = vld [vmem:[#allocation32_spill] sm:$0xff]  ;;  %v1965_v5 = vsel %vm655_vm0, %v5558_v56, %v5726_v48 }
 0x328   : > { %8298 = vst [vmem:[#allocation57_spill] sm:$0xff] %v6009_v47  ;;  %607 = vperm.xlu0 %5043, %v561_v6   ;;  %1822 = vrot.lane.b32.xlu2 %v6000_v36, %s5166_s13  ;;  %v2542_v54 = vpack.c.bf16 %v2446_v52, %v2444_v57  ;;  %v8306_v6 = vld [vmem:[#allocation33_spill] sm:$0xff]  ;;  %v2280_v20 = vunpack.c.l.bf16 %v5842_v8 }
 0x329   : > { %8299 = vst [vmem:[#allocation58_spill] sm:$0xff] %v6011_v29  ;;  %v2442_v40 = vmul.f32 %v2314_v10, %v8303_v59  ;;  %1682 = vrot.lane.b32.xlu1 %v5962_v0, %s5164_s26  ;;  %v1182_v10 = vmax.f32 %v8305_v55, 0.0  ;;  %v1183_v57 = vmax.f32 %v8306_v6, 0.0  ;;  %v2142_v59 = vld [vmem:[%s8109_s2 + $0x70] sm:$0xff] }
 0x32a   : > { %8300 = vst [vmem:[#allocation59_spill] sm:$0xff] %v6015_v51  ;;  %3035 = vmatpush.bf16.msrb.mxu1 %v2542_v54  ;;  %v6033_v46 = vpop.permute.xlu0 %1724  ;;  %v2191_v54 = vld [vmem:[%s8109_s2 + $0x1f8] sm:$0xff]  ;;  %v2285_v47 = vunpack.c.h.bf16 %v2142_v59 }
 0x32b   : > { %8301 = vst [vmem:[#allocation60_spill] sm:$0xff] %v6019_v53  ;;  %v1693_v9 = vpop.permute.xlu1 %1692  ;;  %v2540_v60 = vpack.c.bf16 %v2442_v40, %v2440_v35  ;;  %v2190_v35 = vld [vmem:[%s8109_s2 + $0x1f0] sm:$0xff]  ;;  %v2143_v40 = vld [vmem:[%s8109_s2 + $0x78] sm:$0xff]  ;;  %v2383_v55 = vunpack.c.h.bf16 %v2191_v54 }
 0x32c   : > { %8304 = vst [vmem:[#allocation61_spill] sm:$0xff] %v6038_v7  ;;  %v2381_v6 = vunpack.c.h.bf16 %v2190_v35  ;;  %v2287_v29 = vunpack.c.h.bf16 %v2143_v40  ;;  %v1893_v56 = vsel %vm655_vm0, %v5618_v2, %v1693_v9  ;;  %v2378_v9 = vunpack.c.l.bf16 %v5872_v3 }
 0x32e   : > { %3036 = vmatpush.bf16.msrb.mxu1 %v2540_v60  ;;  %v1246_v60 = vmin.f32 %v1182_v10, 4.0  ;;  %v2376_v10 = vunpack.c.l.bf16 %v5865_v33  ;;  %v2380_v33 = vunpack.c.l.bf16 %v2190_v35 }
 0x32f   : > { %v6074_v34 = vpop.permute.xlu2 %1812 }
 0x330   : > { %1810 = vrot.lane.b32.xlu0 %v5962_v0, %s5166_s13  ;;  %577 = vperm.xlu2 %5045, %v555_v38   ;;  %v1247_v38 = vmin.f32 %v1183_v57, 4.0  ;;  %v2372_v57 = vunpack.c.l.bf16 %v5766_v19  ;;  %v2284_v0 = vunpack.c.l.bf16 %v2142_v59 }
 0x331   : > { %1858 = vrot.lane.b32.xlu1 %v5652_v13, %s5166_s13  ;;  %v2286_v13 = vunpack.c.l.bf16 %v2143_v40 }
 0x332   : > { %v1805_v41 = vpop.permute.xlu0 %1804 }
 0x333   : > { %v1757_v52 = vpop.permute.xlu1 %1756  ;;  %v2030_v48 = vsel %vm1966_vm1, %v1965_v5, %v1805_v41 }
 0x334   : > { %v1982_v19 = vsel %vm1966_vm1, %v1893_v56, %v1757_v52  ;;  %v2282_v52 = vunpack.c.l.bf16 %v5847_v21  ;;  %v8307_v56 = vunpack.c.l.bf16 %v5910_v39  ;;  %v6111_v21 = vld [vmem:[%s8109_s2 + $0x148] sm:$0xff] }
 0x336   : > { %v2504_v59 = vmul.f32 %v2376_v10, %v8307_v56 }
 0x338   : > { %1792 = vrot.lane.b32.xlu0 %v5827_v12, %s5165_s19  ;;  %572 = vperm.xlu2 %5045, %v554_v25   ;;  %v2382_v25 = vunpack.c.l.bf16 %v2191_v54  ;;  %v3636_v54 = vld [vmem:[%s8114_s7] sm:$0xff] }
 0x339   : > { %1776 = vrot.lane.b32.xlu1 %v5667_v32, %s5165_s19 }
 0x33a   : > { %v1869_v8 = vpop.permute.xlu0 %1868 }
 0x33b   : > { %v2126_v51 = vsel %vm2031_vm2, %v2030_v48, %v1869_v8  ;;  %v1821_v53 = vpop.permute.xlu1 %1820  ;;  %v6106_v8 = vld [vmem:[%s8109_s2 + $0x140] sm:$0xff] }
 0x33c   : > { %v2254_v7 = vunpack.c.l.bf16 %v2126_v51  ;;  %v2255_v2 = vunpack.c.h.bf16 %v2126_v51  ;;  %v2054_v5 = vsel %vm2031_vm2, %v1982_v19, %v1821_v53 }
 0x33d   : > { %v2206_v41 = vunpack.c.l.bf16 %v2054_v5  ;;  %v2207_v35 = vunpack.c.h.bf16 %v2054_v5 }
 0x33e   : > { %v6095_v40 = vmul.f32 %v2381_v6, %v2254_v7  ;;  %v6097_v31 = vmul.f32 %v2383_v55, %v2255_v2  ;;  %v2508_v51 = vmul.f32 %v2380_v33, %v2254_v7  ;;  %v2510_v48 = vmul.f32 %v2382_v25, %v2255_v2 }
 0x33f   : > { %v6099_v53 = vmul.f32 %v2285_v47, %v2206_v41  ;;  %v6101_v3 = vmul.f32 %v2287_v29, %v2207_v35  ;;  %v2412_v6 = vmul.f32 %v2284_v0, %v2206_v41  ;;  %v2414_v10 = vmul.f32 %v2286_v13, %v2207_v35 }
 0x340   : > { %1710 = vrot.lane.b32.xlu0 %v5858_v22, %s5164_s26  ;;  %3642 = vperm.xlu2 %5045, %v3636_v54   ;;  %v2574_v47 = vpack.c.bf16 %v2510_v48, %v2508_v51  ;;  %v8308_v29 = vunpack.c.h.bf16 %v5910_v39  ;;  %v2374_v33 = vunpack.c.l.bf16 %v5771_v63  ;;  %v8309_v0 = vunpack.c.l.bf16 %v5854_v45  ;;  %v6130_v54 = vpop.permute.xlu2 %1794 }
 0x341   : > { %1728 = vrot.lane.b32.xlu1 %v5827_v12, %s5164_s26  ;;  %v2526_v13 = vpack.c.bf16 %v2414_v10, %v2412_v6  ;;  %v8310_v2 = vunpack.c.h.bf16 %v5854_v45  ;;  %v1310_v41 = vadd.f32 0.5, %v1246_v60  ;;  %v1311_v35 = vadd.f32 0.5, %v1247_v38 }
 0x342   : > { %v2506_v55 = vmul.f32 %v2378_v9, %v8308_v29  ;;  %v2408_v19 = vmul.f32 %v2280_v20, %v8309_v0  ;;  %v2337_v39 = vunpack.c.h.bf16 %v6106_v8  ;;  %v2339_v9 = vunpack.c.h.bf16 %v6111_v21  ;;  %v1847_v63 = vpop.permute.xlu0 %1846  ;;  %3073 = vmatpush.bf16.msrb.mxu3 %v2574_v47  ;;  %v3887_v47 = vld [vmem:[%s8116_s9 + $0x78] sm:$0xff] }
 0x343   : > { %v2410_v5 = vmul.f32 %v2282_v52, %v8310_v2  ;;  %v6134_v56 = vsel %vm2031_vm2, %v5663_v28, %v1847_v63  ;;  %3016 = vmatpush.bf16.msrb.mxu0 %v2526_v13  ;;  %v1789_v51 = vpop.permute.xlu1 %1788  ;;  %v8311_v20 = vunpack.c.l.bf16 %v5801_v44  ;;  %v8312_v48 = vunpack.c.h.bf16 %v5801_v44 }
 0x344   : > { %v2232_v60 = vunpack.c.l.bf16 %v6134_v56  ;;  %v2233_v38 = vunpack.c.h.bf16 %v6134_v56  ;;  %v2572_v52 = vpack.c.bf16 %v2506_v55, %v2504_v59  ;;  %v8313_v28 = vunpack.c.l.bf16 %v5694_v17 }
 0x345   : > { %v2500_v45 = vmul.f32 %v2372_v57, %v8311_v20  ;;  %v2502_v6 = vmul.f32 %v2374_v33, %v8312_v48  ;;  %v2524_v10 = vpack.c.bf16 %v2410_v5, %v2408_v19  ;;  %v8314_v29 = vunpack.c.l.bf16 %v5680_v42  ;;  %v2174_v42 = vld [vmem:[%s8109_s2 + $0x170] sm:$0xff] }
 0x346   : > { %v8315_v57 = vunpack.c.h.bf16 %v5694_v17  ;;  %v8316_v0 = vunpack.c.l.bf16 %v5687_v1  ;;  %v1374_v63 = vfloor.f32 %v1310_v41  ;;  %v1375_v59 = vfloor.f32 %v1311_v35  ;;  %3074 = vmatpush.bf16.msrb.mxu3 %v2572_v52  ;;  %v2175_v17 = vld [vmem:[%s8109_s2 + $0x178] sm:$0xff] }
 0x347   : > { %v2404_v13 = vmul.f32 %v8314_v29, %v8313_v28  ;;  %v6155_v44 = vmul.f32 %v2337_v39, %v2232_v60  ;;  %v6159_v55 = vmul.f32 %v2339_v9, %v2233_v38  ;;  %3017 = vmatpush.bf16.msrb.mxu0 %v2524_v10  ;;  %v2570_v1 = vpack.c.bf16 %v2502_v6, %v2500_v45 }
 0x348   : > { %v2406_v2 = vmul.f32 %v8316_v0, %v8315_v57  ;;  %1760 = vrot.lane.b32.xlu0 %v5920_v43, %s5165_s19  ;;  %3965 = vperm.xlu2 %5045, %v3887_v47   ;;  %v1438_v5 = vmul.f32 0.25, %v1374_v63  ;;  %v1439_v41 = vmul.f32 0.25, %v1375_v59  ;;  %v1941_v35 = vsel %vm655_vm0, %v5616_v14, %v6033_v46  ;;  %v6180_v47 = vpop.permute.xlu2 %1712  ;;  %v3882_v14 = vld [vmem:[%s8116_s9 + $0x50] sm:$0xff] }
 0x349   : > { %8317 = vst [vmem:[#allocation32_spill] sm:$0xff] %v6155_v44  ;;  %1840 = vrot.lane.b32.xlu1 %v5667_v32, %s5166_s13  ;;  %v2349_v9 = vunpack.c.h.bf16 %v2174_v42  ;;  %v2014_v20 = vsel %vm1966_vm1, %v1941_v35, %v1789_v51  ;;  %v2351_v45 = vunpack.c.h.bf16 %v2175_v17  ;;  %v2348_v48 = vunpack.c.l.bf16 %v2174_v42 }
 0x34a   : > { %8318 = vst [vmem:[#allocation33_spill] sm:$0xff] %v6159_v55  ;;  %v2522_v19 = vpack.c.bf16 %v2406_v2, %v2404_v13  ;;  %v6176_v39 = vpop.permute.xlu0 %1702  ;;  %3075 = vmatpush.bf16.msrb.mxu3 %v2570_v1  ;;  %v2350_v6 = vunpack.c.l.bf16 %v2175_v17  ;;  %v2344_v46 = vunpack.c.l.bf16 %v5977_v23  ;;  %v2346_v13 = vunpack.c.l.bf16 %v5982_v15  ;;  %v2154_v23 = vld [vmem:[%s8109_s2 + $0xd0] sm:$0xff]  ;;  %v2155_v15 = vld [vmem:[%s8109_s2 + $0xd8] sm:$0xff] }
 0x34b   : > { %v1853_v52 = vpop.permute.xlu1 %1852  ;;  %v1502_v51 = vpack.c.bf16 %v1438_v5, %v1438_v5  ;;  %v1503_v57 = vpack.c.bf16 %v1439_v41, %v1439_v41  ;;  %v1911_v42 = vsel %vm655_vm0, %v5487_v24, %v5644_v61  ;;  %v2340_v1 = vunpack.c.l.bf16 %v5736_v18 }
 0x34c   : > { %3018 = vmatpush.bf16.msrb.mxu0 %v2522_v19  ;;  %v2102_v10 = vsel %vm2031_vm2, %v2014_v20, %v1853_v52  ;;  %v2342_v17 = vunpack.c.l.bf16 %v5741_v30  ;;  %v8319_v61 = vunpack.c.l.bf16 %v5997_v16  ;;  %v8320_v41 = vunpack.c.h.bf16 %v5997_v16 }
 0x34d   : > { %v2238_v28 = vunpack.c.l.bf16 %v2102_v10  ;;  %v2239_v29 = vunpack.c.h.bf16 %v2102_v10  ;;  %v1631_v20 = vunpack.c.l.b16 %v1503_v57  ;;  %v1994_v18 = vsel %vm1966_vm1, %v1911_v42, %v5639_v50 }
 0x34e   : > { %v2472_v5 = vmul.f32 %v2344_v46, %v8319_v61  ;;  %v2474_v35 = vmul.f32 %v2346_v13, %v8320_v41  ;;  %v2309_v30 = vunpack.c.h.bf16 %v2154_v23  ;;  %v2311_v52 = vunpack.c.h.bf16 %v2155_v15  ;;  %v2136_v41 = vld [vmem:[%s8109_s2 + $0x40] sm:$0xff] }
 0x34f   : > { %v6187_v0 = vmul.f32 %v2349_v9, %v2238_v28  ;;  %v6189_v2 = vmul.f32 %v2351_v45, %v2239_v29  ;;  %v2476_v63 = vmul.f32 %v2348_v48, %v2238_v28  ;;  %v2478_v59 = vmul.f32 %v2350_v6, %v2239_v29 }
 0x350   : > { %1808 = vrot.lane.b32.xlu0 %v5807_v49, %s5166_s13  ;;  %3940 = vperm.xlu2 %5045, %v3882_v14   ;;  %v1630_v9 = vunpack.c.l.b16 %v1502_v51  ;;  %v2308_v6 = vunpack.c.l.bf16 %v2154_v23  ;;  %v2310_v10 = vunpack.c.l.bf16 %v2155_v15  ;;  %v8321_v29 = vunpack.c.l.bf16 %v5750_v4  ;;  %v6226_v23 = vpop.permute.xlu2 %1762 }
 0x351   : > { %1696 = vrot.lane.b32.xlu1 %v5920_v43, %s5164_s26  ;;  %v2558_v24 = vpack.c.bf16 %v2478_v59, %v2476_v63  ;;  %v8322_v16 = vunpack.c.h.bf16 %v5750_v4  ;;  %v2336_v13 = vunpack.c.l.bf16 %v6106_v8  ;;  %v2556_v50 = vpack.c.bf16 %v2474_v35, %v2472_v5  ;;  %v3881_v63 = vld [vmem:[%s8116_s9 + $0x48] sm:$0xff] }
 0x352   : > { %v1751_v45 = vpop.permute.xlu0 %1750  ;;  %v2468_v14 = vmul.f32 %v2340_v1, %v8321_v29  ;;  %v2338_v59 = vunpack.c.l.bf16 %v6111_v21  ;;  %v6224_v42 = vpack.c.b16 %v1631_v20, %v1630_v9  ;;  %v2137_v35 = vld [vmem:[%s8109_s2 + $0x48] sm:$0xff] }
 0x353   : > { %3054 = vmatpush.bf16.msrb.mxu2 %v2558_v24  ;;  %v1833_v48 = vpop.permute.xlu1 %1832  ;;  %v2470_v46 = vmul.f32 %v2342_v17, %v8322_v16  ;;  %v2464_v24 = vmul.f32 %v2336_v13, %v2232_v60  ;;  %v8326_v16 = vld [vmem:[#allocation36_spill] sm:$0xff] }
 0x354   : > { %v2072_v28 = vsel %vm2031_vm2, %v1994_v18, %v1833_v48  ;;  %v2466_v61 = vmul.f32 %v2338_v59, %v2233_v38  ;;  %v3876_v18 = vld [vmem:[%s8116_s9 + $0x20] sm:$0xff] }
 0x355   : > { %v2218_v51 = vunpack.c.l.bf16 %v2072_v28  ;;  %v2219_v57 = vunpack.c.h.bf16 %v2072_v28  ;;  %v2554_v21 = vpack.c.bf16 %v2470_v46, %v2468_v14  ;;  %v2184_v28 = vld [vmem:[%s8109_s2 + $0x1c0] sm:$0xff]  ;;  %v8325_v14 = vld [vmem:[#allocation40_spill] sm:$0xff] }
 0x356   : > { %v2552_v38 = vpack.c.bf16 %v2466_v61, %v2464_v24  ;;  %v2369_v59 = vunpack.c.h.bf16 %v2184_v28  ;;  %v2368_v61 = vunpack.c.l.bf16 %v2184_v28  ;;  %v2167_v28 = vld [vmem:[%s8109_s2 + $0x138] sm:$0xff] }
 0x357   : > { %v6228_v15 = vmul.f32 %v2309_v30, %v2218_v51  ;;  %v6230_v1 = vmul.f32 %v2311_v52, %v2219_v57  ;;  %3055 = vmatpush.bf16.msrb.mxu2 %v2556_v50  ;;  %v2436_v4 = vmul.f32 %v2308_v6, %v2218_v51  ;;  %v2438_v8 = vmul.f32 %v2310_v10, %v2219_v57  ;;  %v8327_v57 = vld [vmem:[#allocation49_spill] sm:$0xff] }
 0x358   : > { %1790 = vrot.lane.b32.xlu0 %v6224_v42, %s5165_s19  ;;  %3935 = vperm.xlu2 %5045, %v3881_v63   ;;  %v2272_v30 = vunpack.c.l.bf16 %v2136_v41  ;;  %v2274_v52 = vunpack.c.l.bf16 %v2137_v35  ;;  %v2273_v6 = vunpack.c.h.bf16 %v2136_v41  ;;  %v2275_v10 = vunpack.c.h.bf16 %v2137_v35  ;;  %v6269_v46 = vpop.permute.xlu2 %612 }
 0x359   : > { %8323 = vst [vmem:[#allocation62_spill] sm:$0xff] %v6228_v15  ;;  %1744 = vrot.lane.b32.xlu1 %v5807_v49, %s5165_s19  ;;  %v2538_v17 = vpack.c.bf16 %v2438_v8, %v2436_v4 }
 0x35a   : > { %8324 = vst [vmem:[#allocation63_spill] sm:$0xff] %v6230_v1  ;;  %v6240_v5 = vpop.permute.xlu0 %1732 }
 0x35b   : > { %3037 = vmatpush.bf16.msrb.mxu1 %v2538_v17  ;;  %3056 = vmatpush.bf16.msrb.mxu2 %v2554_v21  ;;  %v1687_v20 = vpop.permute.xlu1 %1686 }
 0x35c   : > { %v1884_v56 = vsel %vm655_vm0, %v5596_v11, %v1687_v20 }
 0x35d   : > { %v1976_v60 = vsel %vm1966_vm1, %v1884_v56, %v1751_v45  ;;  %v2185_v45 = vld [vmem:[%s8109_s2 + $0x1c8] sm:$0xff] }
 0x35e   : > { %v2045_v48 = vsel %vm2031_vm2, %v1976_v60, %v5946_v37  ;;  %v1956_v37 = vsel %vm655_vm0, %v8326_v16, %v8325_v14  ;;  %v2371_v17 = vunpack.c.h.bf16 %v2185_v45  ;;  %v2370_v41 = vunpack.c.l.bf16 %v2185_v45  ;;  %v8330_v45 = vld [vmem:[#allocation52_spill] sm:$0xff]  ;;  %v8331_v14 = vld [vmem:[#allocation38_spill] sm:$0xff] }
 0x35f   : > { %3057 = vmatpush.bf16.msrb.mxu2 %v2552_v38  ;;  %v2200_v11 = vunpack.c.l.bf16 %v2045_v48  ;;  %v2201_v29 = vunpack.c.h.bf16 %v2045_v48  ;;  %v2024_v50 = vsel %vm1966_vm1, %v1956_v37, %v8327_v57  ;;  %v3875_v38 = vld [vmem:[%s8116_s9 + $0x18] sm:$0xff]  ;;  %v1929_v16 = vsel %vm655_vm0, %v8331_v14, %v8330_v45 }
 0x360   : > { %1854 = vrot.lane.b32.xlu0 %v6224_v42, %s5166_s13  ;;  %3910 = vperm.xlu2 %5045, %v3876_v18   ;;  %v6306_v37 = vpop.permute.xlu2 %1826 }
 0x361   : > { %1726 = vrot.lane.b32.xlu1 %v6224_v42, %s5164_s26  ;;  %v2400_v13 = vmul.f32 %v2272_v30, %v2200_v11  ;;  %v2402_v51 = vmul.f32 %v2274_v52, %v2201_v29  ;;  %v6275_v4 = vmul.f32 %v2273_v6, %v2200_v11  ;;  %v6277_v8 = vmul.f32 %v2275_v10, %v2201_v29  ;;  %v2166_v10 = vld [vmem:[%s8109_s2 + $0x130] sm:$0xff] }
 0x362   : > { %v1845_v63 = vpop.permute.xlu0 %1844  ;;  %v2332_v57 = vunpack.c.l.bf16 %v2166_v10 }
 0x363   : > { %8328 = vst [vmem:[#allocation40_spill] sm:$0xff] %v6275_v4  ;;  %v1863_v21 = vpop.permute.xlu1 %1862  ;;  %v2520_v24 = vpack.c.bf16 %v2402_v51, %v2400_v13 }
 0x364   : > { %8329 = vst [vmem:[#allocation36_spill] sm:$0xff] %v6277_v8  ;;  %v2117_v35 = vsel %vm2031_vm2, %v2024_v50, %v1863_v21  ;;  %v2333_v50 = vunpack.c.h.bf16 %v2166_v10  ;;  %v564_v21 = vld [vmem:[%s8112_s5 + $0x58] sm:$0xff]  ;;  %v6535_v8 = vpop.f32.mrf.mxu0 }
 0x365   : > { %v2248_v56 = vunpack.c.l.bf16 %v2117_v35  ;;  %v2249_v60 = vunpack.c.h.bf16 %v2117_v35  ;;  %3019 = vmatpush.bf16.msrb.mxu0 %v2520_v24  ;;  %v4584_v24 = vld [vmem:[%s8118_s11] sm:$0xff] }
 0x367   : > { %v6285_v18 = vmul.f32 %v2369_v59, %v2248_v56  ;;  %v6287_v30 = vmul.f32 %v2371_v17, %v2249_v60  ;;  %v2496_v52 = vmul.f32 %v2368_v61, %v2248_v56  ;;  %v2498_v48 = vmul.f32 %v2370_v41, %v2249_v60  ;;  %v8332_v56 = vld [vmem:[#allocation39_spill] sm:$0xff] }
 0x368   : > { %1806 = vrot.lane.b32.xlu0 %v5952_v62, %s5166_s13  ;;  %3905 = vperm.xlu2 %5045, %v3875_v38   ;;  %v2334_v59 = vunpack.c.l.bf16 %v2167_v28  ;;  %v2335_v61 = vunpack.c.h.bf16 %v2167_v28  ;;  %v1908_v60 = vsel %vm655_vm0, %v8332_v56, %v6176_v39  ;;  %v2152_v38 = vld [vmem:[%s8109_s2 + $0xc0] sm:$0xff] }
 0x369   : > { %1838 = vrot.lane.b32.xlu1 %v5858_v22, %s5166_s13  ;;  %v2568_v6 = vpack.c.bf16 %v2498_v48, %v2496_v52  ;;  %v8335_v28 = vld [vmem:[#allocation34_spill] sm:$0xff]  ;;  %v2305_v14 = vunpack.c.h.bf16 %v2152_v38  ;;  %s8039_s13 = scalar_lea.vmem [#allocation5], %s8525_s17  ;;  %s5112_s17 = scalar_lea.hbm %s8119_s12, 256 }
 0x36a   : > { %v6301_v29 = vpop.permute.xlu0 %1700  ;;  %v1992_v45 = vsel %vm1966_vm1, %v1908_v60, %v8335_v28  ;;  %s4741_s23 = sshll.u32 %s8039_s13, 4  ;;  %p5114_p4 = scmp.lt.s32.totalorder %s5112_s17, %s5108_s16  ;;  %s4742_s23 = int_to_ptr.vmem [resolvable:$true] %s4741_s23 }
 0x36b   : > { %3076 = vmatpush.bf16.msrb.mxu3 %v2568_v6  ;;  %v1781_v13 = vpop.permute.xlu1 %1780 }
 0x36c   : > { %v2006_v51 = vsel %vm1966_vm1, %v1929_v16, %v1781_v13  ;;  %p5115_p5 = por %p5114_p4, %p5113_p3 }
 0x36d   : > { %v2090_v17 = vsel %vm2031_vm2, %v2006_v51, %v1845_v63  ;;  %v2153_v63 = vld [vmem:[%s8109_s2 + $0xc8] sm:$0xff] }
 0x36e   : > { %v2230_v41 = vunpack.c.l.bf16 %v2090_v17  ;;  %v2231_v35 = vunpack.c.h.bf16 %v2090_v17  ;;  %v2307_v13 = vunpack.c.h.bf16 %v2153_v63  ;;  %v2304_v17 = vunpack.c.l.bf16 %v2152_v38  ;;  %p5116_p7 = pnand %p5115_p5, %p5111_p0 }
 0x370   : > { %622 = vperm.xlu0 %5043, %v564_v21   ;;  %4590 = vperm.xlu2 %5045, %v4584_v24   ;;  %v2460_v52 = vmul.f32 %v2332_v57, %v2230_v41  ;;  %v2462_v48 = vmul.f32 %v2334_v59, %v2231_v35  ;;  %v6325_v6 = vmul.f32 %v2333_v50, %v2230_v41  ;;  %v2306_v21 = vunpack.c.l.bf16 %v2153_v63  ;;  %v6336_v59 = vpop.permute.xlu2 %1680  ;;  %v553_v41 = vld [vmem:[%s8112_s5] sm:$0xff] }
 0x371   : > { %1694 = vrot.lane.b32.xlu1 %v6000_v36, %s5164_s26  ;;  %v6329_v10 = vmul.f32 %v2335_v61, %v2231_v35  ;;  %v4587_v35 = vld [vmem:[%s8118_s11 + $0x18] sm:$0xff] }
 0x372   : > { %8333 = vst [vmem:[#allocation49_spill] sm:$0xff] %v6325_v6  ;;  %v1749_v39 = vpop.permute.xlu0 %1748  ;;  %v2550_v16 = vpack.c.bf16 %v2462_v48, %v2460_v52  ;;  %v2134_v48 = vld [vmem:[%s8109_s2 + $0x30] sm:$0xff] }
 0x373   : > { %8334 = vst [vmem:[#allocation52_spill] sm:$0xff] %v6329_v10  ;;  %v1831_v51 = vpop.permute.xlu1 %1830 }
 0x374   : > { %v2069_v50 = vsel %vm2031_vm2, %v1992_v45, %v1831_v51  ;;  %3058 = vmatpush.bf16.msrb.mxu2 %v2550_v16  ;;  %v2135_v45 = vld [vmem:[%s8109_s2 + $0x38] sm:$0xff] }
 0x375   : > { %v2216_v24 = vunpack.c.l.bf16 %v2069_v50  ;;  %v2217_v61 = vunpack.c.h.bf16 %v2069_v50  ;;  %v3639_v50 = vld [vmem:[%s8114_s7 + $0x18] sm:$0xff] }
 0x377   : > { %v6344_v56 = vmul.f32 %v2305_v14, %v2216_v24  ;;  %v6346_v60 = vmul.f32 %v2307_v13, %v2217_v61  ;;  %v2432_v38 = vmul.f32 %v2304_v17, %v2216_v24  ;;  %v2434_v63 = vmul.f32 %v2306_v21, %v2217_v61  ;;  %v8338_v13 = vld [vmem:[#allocation42_spill] sm:$0xff] }
 0x378   : > { %567 = vperm.xlu0 %5043, %v553_v41   ;;  %4605 = vperm.xlu2 %5045, %v4587_v35   ;;  %v2268_v17 = vunpack.c.l.bf16 %v2134_v48  ;;  %v2269_v24 = vunpack.c.h.bf16 %v2134_v48  ;;  %v2270_v61 = vunpack.c.l.bf16 %v2135_v45  ;;  %v2271_v41 = vunpack.c.h.bf16 %v2135_v45 }
 0x379   : > { %8336 = vst [vmem:[#allocation38_spill] sm:$0xff] %v6344_v56  ;;  %1758 = vrot.lane.b32.xlu1 %v6000_v36, %s5165_s19  ;;  %v2536_v52 = vpack.c.bf16 %v2434_v63, %v2432_v38  ;;  %v563_v38 = vld [vmem:[%s8112_s5 + $0x50] sm:$0xff]  ;;  %v1953_v63 = vsel %vm655_vm0, %v5606_v26, %v6240_v5 }
 0x37a   : > { %8337 = vst [vmem:[#allocation39_spill] sm:$0xff] %v6346_v60  ;;  %v6353_v28 = vpop.permute.xlu0 %1730  ;;  %v2022_v5 = vsel %vm1966_vm1, %v1953_v63, %v5960_v27  ;;  %v8343_v27 = vld [vmem:[#allocation61_spill] sm:$0xff] }
 0x37b   : > { %3038 = vmatpush.bf16.msrb.mxu1 %v2536_v52  ;;  %v1685_v16 = vpop.permute.xlu1 %1684  ;;  %v6374_v52 = vpop.permute.xlu2 %1856 }
 0x37c   : > { %v1881_v51 = vsel %vm655_vm0, %v8338_v13, %v1685_v16 }
 0x37d   : > { %v1974_v21 = vsel %vm1966_vm1, %v1881_v51, %v1749_v39  ;;  %v2182_v39 = vld [vmem:[%s8109_s2 + $0x1b0] sm:$0xff] }
 0x37e   : > { %v2042_v35 = vsel %vm2031_vm2, %v1974_v21, %v6074_v34  ;;  %v2183_v34 = vld [vmem:[%s8109_s2 + $0x1b8] sm:$0xff]  ;;  %v2365_v14 = vunpack.c.h.bf16 %v2182_v39 }
 0x37f   : > { %v2198_v48 = vunpack.c.l.bf16 %v2042_v35  ;;  %v2199_v16 = vunpack.c.h.bf16 %v2042_v35  ;;  %v2367_v9 = vunpack.c.h.bf16 %v2183_v34  ;;  %v2366_v33 = vunpack.c.l.bf16 %v2183_v34  ;;  %v742_v34 = vpop.f32.mrf.mxu1 }
 0x380   : > { %3657 = vperm.xlu0 %5043, %v3639_v50   ;;  %v2364_v50 = vunpack.c.l.bf16 %v2182_v39 }
 0x381   : > { %617 = vperm.xlu1 %5044, %v563_v38   ;;  %v2396_v45 = vmul.f32 %v2268_v17, %v2198_v48  ;;  %v2398_v13 = vmul.f32 %v2270_v61, %v2199_v16  ;;  %v6382_v51 = vmul.f32 %v2269_v24, %v2198_v48  ;;  %v6384_v21 = vmul.f32 %v2271_v41, %v2199_v16  ;;  %v3886_v17 = vld [vmem:[%s8116_s9 + $0x70] sm:$0xff]  ;;  %v556_v24 = vld [vmem:[%s8112_s5 + $0x18] sm:$0xff] }
 0x382   : > { %v1843_v26 = vpop.permute.xlu0 %1842 }
 0x383   : > { %8339 = vst [vmem:[#allocation34_spill] sm:$0xff] %v6382_v51  ;;  %v1861_v57 = vpop.permute.xlu1 %1860  ;;  %v2518_v35 = vpack.c.bf16 %v2398_v13, %v2396_v45  ;;  %v8341_v45 = vld [vmem:[#allocation37_spill] sm:$0xff] }
 0x384   : > { %8340 = vst [vmem:[#allocation42_spill] sm:$0xff] %v6384_v21  ;;  %v2114_v20 = vsel %vm2031_vm2, %v2022_v5, %v1861_v57  ;;  %v1926_v13 = vsel %vm655_vm0, %v8341_v45, %v6002_v58  ;;  %v3885_v5 = vld [vmem:[%s8116_s9 + $0x68] sm:$0xff] }
 0x385   : > { %v2246_v11 = vunpack.c.l.bf16 %v2114_v20  ;;  %v2247_v38 = vunpack.c.h.bf16 %v2114_v20  ;;  %3020 = vmatpush.bf16.msrb.mxu0 %v2518_v35  ;;  %v6401_v20 = vpop.permute.xlu2 %1774  ;;  %v3638_v35 = vld [vmem:[%s8114_s7 + $0x10] sm:$0xff] }
 0x387   : > { %v6397_v61 = vmul.f32 %v2365_v14, %v2246_v11  ;;  %v6399_v41 = vmul.f32 %v2367_v9, %v2247_v38  ;;  %v2492_v63 = vmul.f32 %v2364_v50, %v2246_v11  ;;  %v2494_v57 = vmul.f32 %v2366_v33, %v2247_v38  ;;  %v6412_v33 = vld [vmem:[%s8109_s2 + $0x120] sm:$0xff]  ;;  %v6417_v11 = vld [vmem:[%s8109_s2 + $0x128] sm:$0xff] }
 0x388   : > { %3960 = vperm.xlu0 %5043, %v3886_v17   ;;  %v2328_v38 = vunpack.c.l.bf16 %v6412_v33  ;;  %v2330_v17 = vunpack.c.l.bf16 %v6417_v11 }
 0x389   : > { %582 = vperm.xlu1 %5044, %v556_v24   ;;  %v2566_v39 = vpack.c.bf16 %v2494_v57, %v2492_v63  ;;  %v8342_v57 = vld [vmem:[#allocation41_spill] sm:$0xff] }
 0x38a   : > { %v1699_v16 = vpop.permute.xlu0 %1698 }
 0x38b   : > { %3077 = vmatpush.bf16.msrb.mxu3 %v2566_v39  ;;  %v1779_v14 = vpop.permute.xlu1 %1778  ;;  %v2150_v39 = vld [vmem:[%s8109_s2 + $0xb0] sm:$0xff] }
 0x38c   : > { %v2004_v9 = vsel %vm1966_vm1, %v1926_v13, %v1779_v14  ;;  %v2301_v48 = vunpack.c.h.bf16 %v2150_v39 }
 0x38d   : > { %v6423_v58 = vsel %vm2031_vm2, %v2004_v9, %v1843_v26  ;;  %v1905_v26 = vsel %vm655_vm0, %v8342_v57, %v6301_v29  ;;  %v6444_v9 = vpop.permute.xlu2 %1824  ;;  %v2151_v57 = vld [vmem:[%s8109_s2 + $0xb8] sm:$0xff] }
 0x38e   : > { %v8168_v50 = vunpack.c.l.bf16 %v6423_v58  ;;  %v8167_v24 = vunpack.c.h.bf16 %v6423_v58  ;;  %v1990_v29 = vsel %vm1966_vm1, %v1905_v26, %v8343_v27 }
 0x390   : > { %3955 = vperm.xlu0 %5043, %v3885_v5   ;;  %v2456_v13 = vmul.f32 %v2328_v38, %v8168_v50  ;;  %v2458_v14 = vmul.f32 %v2330_v17, %v8167_v24  ;;  %v744_v5 = vpop.f32.mrf.mxu1  ;;  %v3637_v38 = vld [vmem:[%s8114_s7 + $0x8] sm:$0xff]  ;;  %v8344_v17 = vld [vmem:[#allocation44_spill] sm:$0xff]  ;;  %v2303_v50 = vunpack.c.h.bf16 %v2151_v57 }
 0x391   : > { %3652 = vperm.xlu1 %5044, %v3638_v35   ;;  %v3880_v35 = vld [vmem:[%s8116_s9 + $0x40] sm:$0xff]  ;;  %v1902_v19 = vsel %vm655_vm0, %v8344_v17, %v1699_v16  ;;  %v745_v24 = vadd.f32 %v744_v5, %v6269_v46  ;;  %v2300_v16 = vunpack.c.l.bf16 %v2150_v39 }
 0x392   : > { %v6432_v63 = vpop.permute.xlu0 %1746  ;;  %v2548_v7 = vpack.c.bf16 %v2458_v14, %v2456_v13  ;;  %v1988_v26 = vsel %vm1966_vm1, %v1902_v19, %v6226_v23  ;;  %v6486_v23 = vld [vmem:[%s8109_s2 + $0xa8] sm:$0xff] }
 0x393   : > { %v1829_v45 = vpop.permute.xlu1 %1828  ;;  %v923_v1 = vmax.f32 %v745_v24, 0.0  ;;  %v6469_v13 = vsel %vm2031_vm2, %v1988_v26, %v6306_v37  ;;  %v3884_v37 = vld [vmem:[%s8116_s9 + $0x60] sm:$0xff]  ;;  %v2298_v6 = vunpack.c.l.bf16 %v6486_v23 }
 0x394   : > { %v2066_v25 = vsel %vm2031_vm2, %v1990_v29, %v1829_v45  ;;  %3059 = vmatpush.bf16.msrb.mxu2 %v2548_v7  ;;  %v2302_v45 = vunpack.c.l.bf16 %v2151_v57  ;;  %v6476_v7 = vld [vmem:[%s8109_s2 + $0xa0] sm:$0xff]  ;;  %v8178_v29 = vunpack.c.l.bf16 %v6469_v13 }
 0x395   : > { %v2214_v27 = vunpack.c.l.bf16 %v2066_v25  ;;  %v2215_v60 = vunpack.c.h.bf16 %v2066_v25  ;;  %v3879_v25 = vld [vmem:[%s8116_s9 + $0x38] sm:$0xff]  ;;  %v6481_v19 = vpop.permute.xlu2 %1678  ;;  %v939_v24 = vmin.f32 %v923_v1, 4.0  ;;  %v2296_v57 = vunpack.c.l.bf16 %v6476_v7  ;;  %v2133_v1 = vld [vmem:[%s8109_s2 + $0x28] sm:$0xff] }
 0x396   : > { %v2267_v51 = vunpack.c.h.bf16 %v2133_v1 }
 0x397   : > { %v6465_v15 = vmul.f32 %v2301_v48, %v2214_v27  ;;  %v6471_v14 = vmul.f32 %v2303_v50, %v2215_v60  ;;  %v8347_v48 = vld [vmem:[#allocation43_spill] sm:$0xff]  ;;  %v2428_v5 = vmul.f32 %v2300_v16, %v2214_v27  ;;  %v2180_v27 = vld [vmem:[%s8109_s2 + $0x1a0] sm:$0xff] }
 0x398   : > { %3930 = vperm.xlu0 %5043, %v3880_v35   ;;  %v1950_v50 = vsel %vm655_vm0, %v8347_v48, %v6353_v28  ;;  %v2430_v35 = vmul.f32 %v2302_v45, %v2215_v60  ;;  %v2132_v28 = vld [vmem:[%s8109_s2 + $0x20] sm:$0xff]  ;;  %v2181_v16 = vld [vmem:[%s8109_s2 + $0x1a8] sm:$0xff] }
 0x399   : > { %3647 = vperm.xlu1 %5044, %v3637_v38   ;;  %8345 = vst [vmem:[#allocation37_spill] sm:$0xff] %v6465_v15  ;;  %v8348_v38 = vld [vmem:[#allocation56_spill] sm:$0xff]  ;;  %v2265_v10 = vunpack.c.h.bf16 %v2132_v28 }
 0x39a   : > { %v6463_v56 = vpop.permute.xlu0 %607  ;;  %8346 = vst [vmem:[#allocation41_spill] sm:$0xff] %v6471_v14  ;;  %v8363_v15 = vld [vmem:[#allocation24_spill] sm:$0xff] }
 0x39b   : > { %v1683_v17 = vpop.permute.xlu1 %1682  ;;  %v743_v39 = vadd.f32 %v742_v34, %v6463_v56  ;;  %v2020_v34 = vsel %vm1966_vm1, %v1950_v50, %v6130_v54 }
 0x39c   : > { %v1878_v26 = vsel %vm655_vm0, %v8348_v38, %v1683_v17  ;;  %v955_v17 = vadd.f32 0.5, %v939_v24  ;;  %v2424_v38 = vmul.f32 %v2296_v57, %v8178_v29  ;;  %v2361_v24 = vunpack.c.h.bf16 %v2180_v27 }
 0x39d   : > { %v919_v45 = vmax.f32 %v743_v39, 0.0  ;;  %v1972_v54 = vsel %vm1966_vm1, %v1878_v26, %v6432_v63  ;;  %v2363_v39 = vunpack.c.h.bf16 %v2181_v16  ;;  %v3883_v63 = vld [vmem:[%s8116_s9 + $0x58] sm:$0xff]  ;;  %v2264_v26 = vunpack.c.l.bf16 %v2132_v28 }
 0x3a0   : > { %3925 = vperm.xlu0 %5043, %v3879_v25   ;;  %v2534_v25 = vpack.c.bf16 %v2430_v35, %v2428_v5  ;;  %v3874_v5 = vld [vmem:[%s8116_s9 + $0x10] sm:$0xff] }
 0x3a1   : > { %3950 = vperm.xlu1 %5044, %v3884_v37   ;;  %v8179_v37 = vunpack.c.h.bf16 %v6469_v13 }
 0x3a2   : > { %v1811_v60 = vpop.permute.xlu0 %1810  ;;  %3039 = vmatpush.bf16.msrb.mxu1 %v2534_v25 }
 0x3a3   : > { %v1859_v48 = vpop.permute.xlu1 %1858  ;;  %v2426_v50 = vmul.f32 %v2298_v6, %v8179_v37  ;;  %v2039_v21 = vsel %vm2031_vm2, %v1972_v54, %v1811_v60  ;;  %v2266_v37 = vunpack.c.l.bf16 %v2133_v1  ;;  %v6529_v60 = vpop.permute.xlu2 %1742  ;;  %v2329_v1 = vunpack.c.h.bf16 %v6412_v33  ;;  %v3873_v33 = vld [vmem:[%s8116_s9 + $0x8] sm:$0xff] }
 0x3a4   : > { %v2196_v35 = vunpack.c.l.bf16 %v2039_v21  ;;  %v2197_v44 = vunpack.c.h.bf16 %v2039_v21  ;;  %v2111_v57 = vsel %vm2031_vm2, %v2020_v34, %v1859_v48  ;;  %v2360_v21 = vunpack.c.l.bf16 %v2180_v27 }
 0x3a5   : > { %v2532_v25 = vpack.c.bf16 %v2426_v50, %v2424_v38  ;;  %v2244_v29 = vunpack.c.l.bf16 %v2111_v57  ;;  %v2245_v6 = vunpack.c.h.bf16 %v2111_v57  ;;  %v2362_v38 = vunpack.c.l.bf16 %v2181_v16 }
 0x3a6   : > { %v6531_v54 = vmul.f32 %v2265_v10, %v2196_v35  ;;  %v6533_v55 = vmul.f32 %v2267_v51, %v2197_v44  ;;  %v2392_v4 = vmul.f32 %v2264_v26, %v2196_v35  ;;  %v2394_v28 = vmul.f32 %v2266_v37, %v2197_v44  ;;  %v6542_v51 = vpop.f32.mrf.mxu2  ;;  %v6561_v37 = vpop.f32.mrf.mxu3 }
 0x3a7   : > { %3040 = vmatpush.bf16.msrb.mxu1 %v2532_v25  ;;  %v6537_v34 = vmul.f32 %v2361_v24, %v2244_v29  ;;  %v6539_v48 = vmul.f32 %v2363_v39, %v2245_v6  ;;  %v935_v50 = vmin.f32 %v919_v45, 4.0  ;;  %v2488_v57 = vmul.f32 %v2360_v21, %v2244_v29  ;;  %v3878_v29 = vld [vmem:[%s8116_s9 + $0x30] sm:$0xff] }
 0x3a8   : > { %8349 = vst [vmem:[#allocation61_spill] sm:$0xff] %v6531_v54  ;;  %3900 = vperm.xlu0 %5043, %v3874_v5   ;;  %v2516_v5 = vpack.c.bf16 %v2394_v28, %v2392_v4  ;;  %v2490_v35 = vmul.f32 %v2362_v38, %v2245_v6  ;;  %v971_v26 = vfloor.f32 %v955_v17  ;;  %v2331_v25 = vunpack.c.h.bf16 %v6417_v11 }
 0x3a9   : > { %8350 = vst [vmem:[#allocation44_spill] sm:$0xff] %v6533_v55  ;;  %3945 = vperm.xlu1 %5044, %v3883_v63   ;;  %v2297_v24 = vunpack.c.h.bf16 %v6476_v7  ;;  %v2299_v39 = vunpack.c.h.bf16 %v6486_v23  ;;  %v951_v16 = vadd.f32 0.5, %v935_v50  ;;  %v8351_v7 = vunpack.c.l.bf16 %v6423_v58 }
 0x3aa   : > { %v1793_v10 = vpop.permute.xlu0 %1792  ;;  %3021 = vmatpush.bf16.msrb.mxu0 %v2516_v5  ;;  %v2564_v44 = vpack.c.bf16 %v2490_v35, %v2488_v57  ;;  %v987_v17 = vmul.f32 0.25, %v971_v26  ;;  %v8353_v63 = vunpack.c.h.bf16 %v6423_v58  ;;  %v8355_v28 = vunpack.c.l.bf16 %v6469_v13  ;;  %v6584_v58 = vld [vmem:[%s8109_s2 + $0x190] sm:$0xff]  ;;  %v6589_v35 = vld [vmem:[%s8109_s2 + $0x198] sm:$0xff] }
 0x3ab   : > { %v1777_v27 = vpop.permute.xlu1 %1776  ;;  %v6559_v23 = vmul.f32 %v2329_v1, %v8351_v7  ;;  %v967_v45 = vfloor.f32 %v951_v16  ;;  %v8357_v1 = vunpack.c.h.bf16 %v6469_v13  ;;  %v6577_v57 = vpop.permute.xlu2 %1822  ;;  %v4586_v16 = vld [vmem:[%s8118_s11 + $0x10] sm:$0xff]  ;;  %v2356_v7 = vunpack.c.l.bf16 %v6584_v58 }
 0x3ac   : > { %3078 = vmatpush.bf16.msrb.mxu3 %v2564_v44  ;;  %v6565_v6 = vmul.f32 %v2331_v25, %v8353_v63  ;;  %v6571_v38 = vmul.f32 %v2297_v24, %v8355_v28  ;;  %v705_v25 = vpop.f32.mrf.mxu0 }
 0x3ad   : > { %8352 = vst [vmem:[#allocation43_spill] sm:$0xff] %v6559_v23  ;;  %v6575_v50 = vmul.f32 %v2299_v39, %v8357_v1  ;;  %v983_v26 = vmul.f32 0.25, %v967_v45  ;;  %v2358_v45 = vunpack.c.l.bf16 %v6589_v35  ;;  %v706_v28 = vadd.f32 %v705_v25, %v6269_v46 }
 0x3ae   : > { %8354 = vst [vmem:[#allocation56_spill] sm:$0xff] %v6565_v6  ;;  %v822_v39 = vpop.f32.mrf.mxu3 }
 0x3af   : > { %8356 = vst [vmem:[#allocation64_spill] sm:$0xff] %v6571_v38  ;;  %v6603_v63 = vpack.c.bf16 %v987_v17, %v983_v26  ;;  %v6619_v17 = vld [vmem:[%s8109_s2 + $0x110] sm:$0xff] }
 0x3b0   : > { %3895 = vperm.xlu0 %5043, %v3873_v33   ;;  %8358 = vst [vmem:[#allocation65_spill] sm:$0xff] %v6575_v50  ;;  %v783_v33 = vpop.f32.mrf.mxu2  ;;  %v2324_v4 = vunpack.c.l.bf16 %v6619_v17 }
 0x3b1   : > { %3920 = vperm.xlu1 %5044, %v3878_v29   ;;  %8359 = vst [vmem:[#allocation66_spill] sm:$0xff] %v6603_v63 }
 0x3b2   : > { %v6579_v5 = vpop.permute.xlu0 %1710 }
 0x3b3   : > { %v1729_v24 = vpop.permute.xlu1 %1728  ;;  %v578_v38 = vpop.permute.xlu2 %577 }
 0x3b4   : > { %v1947_v44 = vsel %vm655_vm0, %v5827_v12, %v1729_v24  ;;  %v3877_v12 = vld [vmem:[%s8116_s9 + $0x28] sm:$0xff] }
 0x3b5   : > { %v2018_v29 = vsel %vm1966_vm1, %v1947_v44, %v1793_v10  ;;  %v784_v44 = vadd.f32 %v783_v33, %v6269_v46  ;;  %v1923_v33 = vsel %vm655_vm0, %v5667_v32, %v6180_v47  ;;  %v823_v47 = vadd.f32 %v822_v39, %v6269_v46 }
 0x3b6   : > { %v6608_v1 = vsel %vm2031_vm2, %v2018_v29, %v6374_v52  ;;  %v6624_v52 = vld [vmem:[%s8109_s2 + $0x118] sm:$0xff]  ;;  %v922_v29 = vmax.f32 %v706_v28, 0.0  ;;  %v2002_v21 = vsel %vm1966_vm1, %v1923_v33, %v1777_v27  ;;  %v3872_v27 = vld [vmem:[%s8116_s9] sm:$0xff]  ;;  %v8360_v28 = vld [vmem:[#allocation19_spill] sm:$0xff]  ;;  %v806_v46 = vadd.f32 %v8363_v15, %v578_v38 }
 0x3b7   : > { %v8184_v10 = vunpack.c.l.bf16 %v6608_v1  ;;  %v8185_v24 = vunpack.c.h.bf16 %v6608_v1 }
 0x3b8   : > { %4600 = vperm.xlu0 %5043, %v4586_v16  }
 0x3b9   : > { %3915 = vperm.xlu1 %5044, %v3877_v12   ;;  %v2484_v26 = vmul.f32 %v2356_v7, %v8184_v10  ;;  %v2486_v25 = vmul.f32 %v2358_v45, %v8185_v24  ;;  %v2326_v12 = vunpack.c.l.bf16 %v6624_v52  ;;  %v924_v7 = vmax.f32 %v784_v44, 0.0  ;;  %v8362_v24 = vld [vmem:[#allocation28_spill] sm:$0xff] }
 0x3ba   : > { %v1761_v16 = vpop.permute.xlu0 %1760  ;;  %v767_v50 = vadd.f32 %v8362_v24, %v578_v38  ;;  %v1872_v24 = vsel %vm655_vm0, %v5952_v62, %v6481_v19  ;;  %v821_v62 = vadd.f32 %v6561_v37, %v6463_v56 }
 0x3bb   : > { %v1841_v13 = vpop.permute.xlu1 %1840  ;;  %v2562_v11 = vpack.c.bf16 %v2486_v25, %v2484_v26  ;;  %v689_v26 = vadd.f32 %v8360_v28, %v578_v38  ;;  %v938_v25 = vmin.f32 %v922_v29, 4.0  ;;  %v1875_v28 = vsel %vm655_vm0, %v5807_v49, %v6336_v59 }
 0x3bc   : > { %v6637_v10 = vsel %vm2031_vm2, %v2002_v21, %v1841_v13  ;;  %v8361_v13 = vld [vmem:[#allocation20_spill] sm:$0xff]  ;;  %v840_v59 = vmax.f32 %v767_v50, 0.0 }
 0x3bd   : > { %v8189_v45 = vunpack.c.l.bf16 %v6637_v10  ;;  %v8188_v32 = vunpack.c.h.bf16 %v6637_v10  ;;  %3079 = vmatpush.bf16.msrb.mxu3 %v2562_v11  ;;  %v728_v33 = vadd.f32 %v8361_v13, %v578_v38  ;;  %v940_v11 = vmin.f32 %v924_v7, 4.0 }
 0x3be   : > { %v838_v15 = vmax.f32 %v689_v26, 0.0  ;;  %v6665_v38 = vadd.f32 0.5, %v938_v25  ;;  %v925_v7 = vmax.f32 %v823_v47, 0.0  ;;  %v841_v13 = vmax.f32 %v806_v46, 0.0  ;;  %v4585_v47 = vld [vmem:[%s8118_s11 + $0x8] sm:$0xff] }
 0x3bf   : > { %v2452_v44 = vmul.f32 %v2324_v4, %v8189_v45  ;;  %v2454_v21 = vmul.f32 %v2326_v12, %v8188_v32  ;;  %v2146_v4 = vld [vmem:[%s8109_s2 + $0x90] sm:$0xff]  ;;  %v2147_v12 = vld [vmem:[%s8109_s2 + $0x98] sm:$0xff]  ;;  %v839_v49 = vmax.f32 %v728_v33, 0.0 }
 0x3c0   : > { %v2292_v45 = vunpack.c.l.bf16 %v2146_v4  ;;  %v2294_v14 = vunpack.c.l.bf16 %v2147_v12  ;;  %v2293_v50 = vunpack.c.h.bf16 %v2146_v4  ;;  %v2295_v26 = vunpack.c.h.bf16 %v2147_v12  ;;  %v6687_v12 = vld [vmem:[%s8109_s2 + $0x10] sm:$0xff] }
 0x3c1   : > { %3890 = vperm.xlu1 %5044, %v3872_v27   ;;  %v2546_v39 = vpack.c.bf16 %v2454_v21, %v2452_v44  ;;  %v956_v44 = vadd.f32 0.5, %v940_v11  ;;  %v854_v25 = vmin.f32 %v838_v15, 4.0  ;;  %v941_v33 = vmin.f32 %v925_v7, 4.0 }
 0x3c2   : > { %v1809_v29 = vpop.permute.xlu0 %1808  ;;  %v855_v46 = vmin.f32 %v839_v49, 4.0  ;;  %v970_v37 = vfloor.f32 %v6665_v38  ;;  %v921_v15 = vmax.f32 %v821_v62, 0.0  ;;  %v8368_v62 = vld [vmem:[#allocation27_spill] sm:$0xff] }
 0x3c3   : > { %3060 = vmatpush.bf16.msrb.mxu2 %v2546_v39  ;;  %v1697_v27 = vpop.permute.xlu1 %1696  ;;  %v972_v39 = vfloor.f32 %v956_v44 }
 0x3c4   : > { %v1899_v21 = vsel %vm655_vm0, %v5920_v43, %v1697_v27  ;;  %v856_v27 = vmin.f32 %v840_v59, 4.0 }
 0x3c5   : > { %v1986_v32 = vsel %vm1966_vm1, %v1899_v21, %v1761_v16  ;;  %v6679_v16 = vsel %vm1966_vm1, %v1872_v24, %v6529_v60  ;;  %v6692_v60 = vld [vmem:[%s8109_s2 + $0x18] sm:$0xff]  ;;  %v857_v24 = vmin.f32 %v841_v13, 4.0  ;;  %v573_v21 = vpop.permute.xlu2 %572 }
 0x3c6   : > { %v2060_v19 = vsel %vm2031_vm2, %v1986_v32, %v6444_v9  ;;  %v704_v9 = vadd.f32 %v6535_v8, %v6463_v56  ;;  %v870_v8 = vadd.f32 0.5, %v854_v25  ;;  %v2262_v13 = vunpack.c.l.bf16 %v6692_v60 }
 0x3c7   : > { %v2210_v43 = vunpack.c.l.bf16 %v2060_v19  ;;  %v2211_v11 = vunpack.c.h.bf16 %v2060_v19 }
 0x3c8   : > { %v918_v25 = vmax.f32 %v704_v9, 0.0 }
 0x3c9   : > { %4595 = vperm.xlu1 %5044, %v4585_v47   ;;  %v2420_v32 = vmul.f32 %v2292_v45, %v2210_v43  ;;  %v2422_v4 = vmul.f32 %v2294_v14, %v2211_v11  ;;  %v6694_v7 = vmul.f32 %v2293_v50, %v2210_v43  ;;  %v6696_v49 = vmul.f32 %v2295_v26, %v2211_v11 }
 0x3ca   : > { %v1791_v38 = vpop.permute.xlu0 %1790  ;;  %v6698_v45 = vadd.f32 0.5, %v941_v33  ;;  %v782_v14 = vadd.f32 %v6542_v51, %v6463_v56  ;;  %v2260_v47 = vunpack.c.l.bf16 %v6687_v12  ;;  %v871_v50 = vadd.f32 0.5, %v855_v46 }
 0x3cb   : > { %8364 = vst [vmem:[#allocation19_spill] sm:$0xff] %v6694_v7  ;;  %v1745_v59 = vpop.permute.xlu1 %1744  ;;  %v2530_v44 = vpack.c.bf16 %v2422_v4, %v2420_v32  ;;  %v872_v26 = vadd.f32 0.5, %v856_v27  ;;  %v6710_v56 = vadd.f32 0.5, %v857_v24  ;;  %v937_v51 = vmin.f32 %v921_v15, 4.0  ;;  %v8366_v32 = vld [vmem:[#allocation16_spill] sm:$0xff]  ;;  %v8369_v27 = vld [vmem:[#allocation21_spill] sm:$0xff] }
 0x3cc   : > { %8365 = vst [vmem:[#allocation20_spill] sm:$0xff] %v6696_v49  ;;  %v1970_v19 = vsel %vm1966_vm1, %v1875_v28, %v1745_v59  ;;  %v886_v11 = vfloor.f32 %v870_v8  ;;  %v686_v4 = vadd.f32 %v8366_v32, %v573_v21  ;;  %v8367_v59 = vld [vmem:[#allocation17_spill] sm:$0xff]  ;;  %v764_v46 = vadd.f32 %v8368_v62, %v573_v21 }
 0x3cd   : > { %v6708_v33 = vsel %vm2031_vm2, %v1970_v19, %v1809_v29  ;;  %3041 = vmatpush.bf16.msrb.mxu1 %v2530_v44  ;;  %v725_v63 = vadd.f32 %v8367_v59, %v573_v21  ;;  %v803_v9 = vadd.f32 %v8369_v27, %v573_v21  ;;  %v920_v7 = vmax.f32 %v782_v14, 0.0  ;;  %v6730_v14 = vld [vmem:[%s8109_s2 + $0x180] sm:$0xff]  ;;  %v6735_v21 = vld [vmem:[%s8109_s2 + $0x188] sm:$0xff] }
 0x3ce   : > { %v8195_v43 = vunpack.c.l.bf16 %v6708_v33  ;;  %v8194_v28 = vunpack.c.h.bf16 %v6708_v33  ;;  %v6722_v15 = vmul.f32 0.25, %v970_v37  ;;  %v6724_v44 = vmul.f32 0.25, %v972_v39 }
 0x3cf   : > { %v973_v8 = vfloor.f32 %v6698_v45  ;;  %v934_v19 = vmin.f32 %v918_v25, 4.0  ;;  %v887_v32 = vfloor.f32 %v871_v50  ;;  %v888_v59 = vfloor.f32 %v872_v26 }
 0x3d0   : > { %v2388_v29 = vmul.f32 %v2260_v47, %v8195_v43  ;;  %v2390_v24 = vmul.f32 %v2262_v13, %v8194_v28  ;;  %v953_v37 = vadd.f32 0.5, %v937_v51  ;;  %v6738_v47 = vmul.f32 0.25, %v886_v11 }
 0x3d1   : > { %v834_v45 = vmax.f32 %v686_v4, 0.0  ;;  %v835_v13 = vmax.f32 %v725_v63, 0.0  ;;  %v836_v26 = vmax.f32 %v764_v46, 0.0  ;;  %v837_v25 = vmax.f32 %v803_v9, 0.0  ;;  %v6763_v9 = vld [vmem:[%s8109_s2 + $0x8] sm:$0xff] }
 0x3d2   : > { %v1855_v49 = vpop.permute.xlu0 %1854  ;;  %v2514_v62 = vpack.c.bf16 %v2390_v24, %v2388_v29  ;;  %v936_v27 = vmin.f32 %v920_v7, 4.0  ;;  %v2352_v28 = vunpack.c.l.bf16 %v6730_v14  ;;  %v2354_v51 = vunpack.c.l.bf16 %v6735_v21  ;;  %v6753_v7 = vpop.f32.mrf.mxu0 }
 0x3d3   : > { %v1727_v50 = vpop.permute.xlu1 %1726  ;;  %v950_v43 = vadd.f32 0.5, %v934_v19  ;;  %v903_v39 = vmul.f32 0.25, %v887_v32  ;;  %v6745_v11 = vmul.f32 0.25, %v888_v59  ;;  %v969_v4 = vfloor.f32 %v953_v37  ;;  %v6777_v37 = vld [vmem:[%s8109_s2 + $0x108] sm:$0xff] }
 0x3d4   : > { %v1944_v29 = vsel %vm655_vm0, %v6224_v42, %v1727_v50  ;;  %3022 = vmatpush.bf16.msrb.mxu0 %v2514_v62  ;;  %v850_v46 = vmin.f32 %v834_v45, 4.0  ;;  %v1920_v42 = vsel %vm655_vm0, %v5858_v22, %v6579_v5  ;;  %v851_v32 = vmin.f32 %v835_v13, 4.0  ;;  %v6767_v22 = vpop.f32.mrf.mxu2  ;;  %v6772_v5 = vld [vmem:[%s8109_s2 + $0x100] sm:$0xff] }
 0x3d5   : > { %v2016_v24 = vsel %vm1966_vm1, %v1944_v29, %v1791_v38  ;;  %v6758_v38 = vld [vmem:[%s8109_s2] sm:$0xff]  ;;  %v852_v59 = vmin.f32 %v836_v26, 4.0  ;;  %v853_v62 = vmin.f32 %v837_v25, 4.0  ;;  %8370 = vst [vmem:[#allocation28_spill] sm:$0xff] %v6767_v22  ;;  %v952_v45 = vadd.f32 0.5, %v936_v27  ;;  %v6779_v29 = vpop.f32.mrf.mxu3 }
 0x3d6   : > { %v6748_v63 = vsel %vm2031_vm2, %v2016_v24, %v1855_v49  ;;  %v989_v50 = vmul.f32 0.25, %v973_v8  ;;  %8371 = vst [vmem:[#allocation24_spill] sm:$0xff] %v6779_v29  ;;  %v966_v25 = vfloor.f32 %v950_v43  ;;  %v2000_v23 = vsel %vm1966_vm1, %v1920_v42, %v6401_v20 }
 0x3d7   : > { %v8201_v49 = vunpack.c.l.bf16 %v6748_v63  ;;  %v8200_v19 = vunpack.c.h.bf16 %v6748_v63  ;;  %v985_v6 = vmul.f32 0.25, %v969_v4  ;;  %v2256_v54 = vunpack.c.l.bf16 %v6758_v38 }
 0x3d8   : > { %v2258_v55 = vunpack.c.l.bf16 %v6763_v9  ;;  %v968_v4 = vfloor.f32 %v952_v45  ;;  %v866_v42 = vadd.f32 0.5, %v850_v46  ;;  %v869_v46 = vadd.f32 0.5, %v853_v62 }
 0x3d9   : > { %v2480_v13 = vmul.f32 %v2352_v28, %v8201_v49  ;;  %v2482_v26 = vmul.f32 %v2354_v51, %v8200_v19  ;;  %v2320_v28 = vunpack.c.l.bf16 %v6772_v5  ;;  %v2322_v51 = vunpack.c.l.bf16 %v6777_v37 }
 0x3da   : > { %v1807_v24 = vpop.permute.xlu0 %1806  ;;  %v867_v49 = vadd.f32 0.5, %v851_v32  ;;  %v2327_v62 = vunpack.c.h.bf16 %v6624_v52 }
 0x3db   : > { %v6791_v8 = vsel %vm2031_vm2, %v6679_v16, %v1807_v24  ;;  %v1839_v27 = vpop.permute.xlu1 %1838  ;;  %v2560_v29 = vpack.c.bf16 %v2482_v26, %v2480_v13  ;;  %v868_v13 = vadd.f32 0.5, %v852_v59  ;;  %v8372_v26 = vpack.c.bf16 %v6097_v31, %v6095_v40 }
 0x3dc   : > { %v2192_v43 = vunpack.c.l.bf16 %v6791_v8  ;;  %v6798_v20 = vsel %vm2031_vm2, %v2000_v23, %v1839_v27  ;;  %v6805_v24 = vpack.c.bf16 %v989_v50, %v985_v6  ;;  %v8373_v23 = vunpack.c.h.bf16 %v6791_v8 }
 0x3dd   : > { %v2224_v22 = vunpack.c.l.bf16 %v6798_v20  ;;  %v8202_v16 = vunpack.c.h.bf16 %v6798_v20  ;;  %3080 = vmatpush.bf16.msrb.mxu3 %v2560_v29  ;;  %v982_v59 = vmul.f32 0.25, %v966_v25  ;;  %v2357_v27 = vunpack.c.h.bf16 %v6584_v58  ;;  %v827_v52 = vpop.f32.mrf.mxu3 }
 0x3de   : > { %v2384_v19 = vmul.f32 %v2256_v54, %v2192_v43  ;;  %v2386_v45 = vmul.f32 %v2258_v55, %v8373_v23  ;;  %v2359_v40 = vunpack.c.h.bf16 %v6589_v35  ;;  %v984_v6 = vmul.f32 0.25, %v968_v4  ;;  %v8375_v35 = vld [vmem:[#allocation53_spill] sm:$0xff]  ;;  %v8376_v23 = vld [vmem:[#allocation31_spill] sm:$0xff] }
 0x3df   : > { %v2448_v32 = vmul.f32 %v2320_v28, %v2224_v22  ;;  %v2450_v29 = vmul.f32 %v2322_v51, %v8202_v16  ;;  %v8374_v54 = vfloor.f32 %v6710_v56  ;;  %v2325_v55 = vunpack.c.h.bf16 %v6619_v17  ;;  %v6822_v28 = vpop.f32.mrf.mxu1 }
 0x3e0   : > { %3081 = vmatmul.bf16.vlgmr.msrb.gmra.mxu3 %v6805_v24  ;;  %v2512_v31 = vpack.c.bf16 %v2386_v45, %v2384_v19  ;;  %v6825_v25 = vpack.c.bf16 %v903_v39, %v6738_v47  ;;  %v882_v58 = vfloor.f32 %v866_v42  ;;  %v8377_v16 = vpack.c.bf16 %v8375_v35, %v8376_v23  ;;  %v788_v19 = vpop.f32.mrf.mxu2  ;;  %v8390_v23 = vld [vmem:[#allocation60_spill] sm:$0xff] }
 0x3e1   : > { %3149 = vmatpush.bf16.msra.mxu3 %v8372_v26  ;;  %v905_v50 = vmul.f32 0.25, %v8374_v54  ;;  %v710_v26 = vpop.f32.mrf.mxu0  ;;  %v2544_v51 = vpack.c.bf16 %v2450_v29, %v2448_v32  ;;  %v883_v56 = vfloor.f32 %v867_v49  ;;  %v884_v17 = vfloor.f32 %v868_v13 }
 0x3e2   : > { %v6830_v4 = vpop.permute.xlu0 %622  ;;  %3023 = vmatpush.bf16.msrb.mxu0 %v2512_v31  ;;  %v885_v45 = vfloor.f32 %v869_v46  ;;  %v6833_v32 = vpack.c.bf16 %v6722_v15, %v982_v59  ;;  %v8378_v39 = vpack.c.bf16 %v6101_v3, %v6099_v53  ;;  %v8379_v47 = vpack.c.bf16 %v6189_v2, %v6187_v0 }
 0x3e3   : > { %3061 = vmatpush.bf16.msrb.mxu2 %v2544_v51  ;;  %v1695_v54 = vpop.permute.xlu1 %1694  ;;  %v6842_v42 = vpack.c.bf16 %v6724_v44, %v984_v6  ;;  %v8380_v49 = vunpack.c.l.bf16 %v6608_v1  ;;  %v8381_v13 = vunpack.c.h.bf16 %v6608_v1  ;;  %v6853_v15 = vpack.c.bf16 %v905_v50, %v6745_v11  ;;  %v8387_v51 = vld [vmem:[#allocation30_spill] sm:$0xff] }
 0x3e4   : > { %v8382_v53 = vunpack.c.l.bf16 %v6637_v10  ;;  %v8383_v0 = vunpack.c.h.bf16 %v6637_v10  ;;  %v2261_v44 = vunpack.c.h.bf16 %v6687_v12  ;;  %v6865_v29 = vmul.f32 0.25, %v882_v58  ;;  %v8388_v58 = vld [vmem:[#allocation35_spill] sm:$0xff] }
 0x3e5   : > { %3150 = vmatpush.bf16.msra.mxu3 %v8377_v16  ;;  %v6846_v16 = vmul.f32 %v2357_v27, %v8380_v49  ;;  %v6850_v46 = vmul.f32 %v2359_v40, %v8381_v13  ;;  %3024 = vmatmul.bf16.vlgmr.msrb.gmra.mxu0 %v6833_v32  ;;  %v711_v1 = vadd.f32 %v710_v26, %v6830_v4  ;;  %v8384_v27 = vld [vmem:[#allocation51_spill] sm:$0xff]  ;;  %v8385_v40 = vld [vmem:[#allocation50_spill] sm:$0xff]  ;;  %v6874_v10 = vmul.f32 0.25, %v883_v56 }
 0x3e6   : > { %3092 = vmatpush.bf16.msra.mxu0 %v8378_v39  ;;  %v6857_v3 = vmul.f32 %v2325_v55, %v8382_v53  ;;  %v6861_v2 = vmul.f32 %v2327_v62, %v8383_v0  ;;  %v789_v59 = vadd.f32 %v788_v19, %v6830_v4  ;;  %v828_v11 = vadd.f32 %v827_v52, %v6830_v4  ;;  %v8391_v19 = vld [vmem:[#allocation59_spill] sm:$0xff]  ;;  %v8395_v53 = vld [vmem:[#allocation14_spill] sm:$0xff] }
 0x3e7   : > { %3130 = vmatpush.bf16.msra.mxu2 %v8379_v47  ;;  %v8386_v31 = vpack.c.bf16 %v8384_v27, %v8385_v40  ;;  %v6876_v6 = vmul.f32 0.25, %v884_v17  ;;  %v6878_v12 = vmul.f32 0.25, %v885_v45  ;;  %v2263_v50 = vunpack.c.h.bf16 %v6692_v60  ;;  %v8396_v0 = vld [vmem:[#allocation15_spill] sm:$0xff] }
 0x3e8   : > { %3062 = vmatmul.bf16.vlgmr.msrb.gmra.mxu2 %v6842_v42  ;;  %v2257_v55 = vunpack.c.h.bf16 %v6758_v38  ;;  %v2259_v62 = vunpack.c.h.bf16 %v6763_v9  ;;  %v2353_v26 = vunpack.c.h.bf16 %v6730_v14  ;;  %v8389_v35 = vpack.c.bf16 %v8387_v51, %v8388_v58 }
 0x3e9   : > { %3151 = vmatpush.bf16.msra.mxu3 %v8386_v31  ;;  %v8392_v56 = vpack.c.bf16 %v8390_v23, %v8391_v19  ;;  %v2563_v17 = vpack.c.bf16 %v6850_v46, %v6846_v16  ;;  %v2321_v45 = vunpack.c.h.bf16 %v6772_v5  ;;  %v2355_v60 = vunpack.c.h.bf16 %v6735_v21  ;;  %v8398_v31 = vld [vmem:[#allocation18_spill] sm:$0xff]  ;;  %v8402_v23 = vld [vmem:[#allocation48_spill] sm:$0xff]  ;;  %v8403_v19 = vld [vmem:[#allocation47_spill] sm:$0xff] }
 0x3ea   : > { %3093 = vmatpush.bf16.msra.mxu0 %v8389_v35  ;;  %v8393_v38 = vunpack.c.l.bf16 %v6708_v33  ;;  %v2547_v14 = vpack.c.bf16 %v6861_v2, %v6857_v3  ;;  %v1896_v52 = vsel %vm655_vm0, %v6000_v36, %v1695_v54  ;;  %v8394_v39 = vpack.c.bf16 %v6287_v30, %v6285_v18  ;;  %v568_v47 = vpop.permute.xlu0 %567  ;;  %v6912_v36 = vld [vmem:[%s8109_s2 + $0x80] sm:$0xff]  ;;  %v6917_v18 = vld [vmem:[%s8109_s2 + $0x88] sm:$0xff]  ;;  %v749_v54 = vpop.f32.mrf.mxu1 }
 0x3eb   : > { %3131 = vmatpush.bf16.msra.mxu2 %v8392_v56  ;;  %v930_v49 = vmax.f32 %v711_v1, 0.0  ;;  %v932_v13 = vmax.f32 %v789_v59, 0.0  ;;  %v933_v5 = vmax.f32 %v828_v11, 0.0  ;;  %v684_v21 = vadd.f32 %v8395_v53, %v568_v47  ;;  %v1759_v58 = vpop.permute.xlu1 %1758  ;;  %v8399_v59 = vld [vmem:[#allocation46_spill] sm:$0xff]  ;;  %v8400_v11 = vld [vmem:[#allocation45_spill] sm:$0xff] }
 0x3ec   : > { %v6896_v9 = vmul.f32 %v2261_v44, %v8393_v38  ;;  %v723_v27 = vadd.f32 %v8396_v0, %v568_v47  ;;  %v8397_v44 = vld [vmem:[#allocation26_spill] sm:$0xff]  ;;  %v801_v51 = vadd.f32 %v8398_v31, %v568_v47  ;;  %v2323_v30 = vunpack.c.h.bf16 %v6777_v37 }
 0x3ed   : > { %3152 = vmatpush.bf16.msra.mxu3 %v8394_v39  ;;  %v762_v40 = vadd.f32 %v8397_v44, %v568_v47  ;;  %v1984_v1 = vsel %vm1966_vm1, %v1896_v52, %v1759_v58  ;;  %v8401_v35 = vpack.c.bf16 %v8399_v59, %v8400_v11  ;;  %v8404_v56 = vpack.c.bf16 %v8402_v23, %v8403_v19 }
 0x3ee   : > { %v8405_v38 = vunpack.c.l.bf16 %v6748_v63  ;;  %v8406_v47 = vunpack.c.h.bf16 %v6708_v33  ;;  %v830_v37 = vmax.f32 %v684_v21, 0.0  ;;  %v831_v0 = vmax.f32 %v723_v27, 0.0 }
 0x3ef   : > { %3094 = vmatpush.bf16.msra.mxu0 %v8401_v35  ;;  %3132 = vmatpush.bf16.msra.mxu2 %v8404_v56  ;;  %v832_v44 = vmax.f32 %v762_v40, 0.0  ;;  %v833_v52 = vmax.f32 %v801_v51, 0.0  ;;  %v6937_v31 = vsel %vm2031_vm2, %v1984_v1, %v6577_v57  ;;  %v8407_v58 = vpack.c.bf16 %v6399_v41, %v6397_v61  ;;  %v8410_v35 = vld [vmem:[#allocation36_spill] sm:$0xff] }
 0x3f0   : > { %v6929_v39 = vmul.f32 %v2353_v26, %v8405_v38  ;;  %v6933_v53 = vmul.f32 %v2263_v50, %v8406_v47  ;;  %v2288_v59 = vunpack.c.l.bf16 %v6912_v36  ;;  %v2290_v26 = vunpack.c.l.bf16 %v6917_v18 }
 0x3f1   : > { %3153 = vmatpush.bf16.msra.mxu3 %v8407_v58  ;;  %v8408_v33 = vunpack.c.h.bf16 %v6748_v63  ;;  %v750_v21 = vadd.f32 %v749_v54, %v6830_v4  ;;  %v946_v27 = vmin.f32 %v930_v49, 4.0  ;;  %v948_v40 = vmin.f32 %v932_v13, 4.0  ;;  %v8411_v63 = vld [vmem:[#allocation40_spill] sm:$0xff]  ;;  %v8413_v4 = vld [vmem:[#allocation33_spill] sm:$0xff] }
 0x3f2   : > { %v949_v51 = vmin.f32 %v933_v5, 4.0  ;;  %v6949_v57 = vmul.f32 %v2257_v55, %v2192_v43  ;;  %v8409_v1 = vunpack.c.h.bf16 %v6791_v8  ;;  %v2208_v41 = vunpack.c.l.bf16 %v6937_v31  ;;  %v8414_v49 = vld [vmem:[#allocation32_spill] sm:$0xff] }
 0x3f3   : > { %v2483_v50 = vmul.f32 %v2355_v60, %v8408_v33  ;;  %v2209_v11 = vunpack.c.h.bf16 %v6937_v31  ;;  %v8412_v60 = vpack.c.bf16 %v8410_v35, %v8411_v63  ;;  %v8415_v13 = vpack.c.bf16 %v8413_v4, %v8414_v49  ;;  %v618_v47 = vpop.permute.xlu1 %617  ;;  %v8419_v58 = vld [vmem:[#allocation24_spill] sm:$0xff]  ;;  %v8421_v33 = vld [vmem:[#allocation34_spill] sm:$0xff]  ;;  %v8456_v31 = vld [vmem:[#allocation19_spill] sm:$0xff] }
 0x3f4   : > { %v6953_v61 = vmul.f32 %v2259_v62, %v8409_v1  ;;  %v846_v5 = vmin.f32 %v830_v37, 4.0  ;;  %v847_v54 = vmin.f32 %v831_v0, 4.0  ;;  %v848_v43 = vmin.f32 %v832_v44, 4.0 }
 0x3f5   : > { %3095 = vmatpush.bf16.msra.mxu0 %v8412_v60  ;;  %3133 = vmatpush.bf16.msra.mxu2 %v8415_v13  ;;  %v849_v55 = vmin.f32 %v833_v52, 4.0  ;;  %v6965_v8 = vmul.f32 %v2321_v45, %v2224_v22  ;;  %v8416_v62 = vunpack.c.h.bf16 %v6798_v20  ;;  %v8417_v19 = vpack.c.bf16 %v6539_v48, %v6537_v34  ;;  %v8420_v48 = vld [vmem:[#allocation42_spill] sm:$0xff] }
 0x3f6   : > { %v2416_v56 = vmul.f32 %v2288_v59, %v2208_v41  ;;  %v2418_v38 = vmul.f32 %v2290_v26, %v2209_v11  ;;  %v962_v37 = vadd.f32 0.5, %v946_v27  ;;  %v964_v0 = vadd.f32 0.5, %v948_v40  ;;  %v8423_v27 = vld [vmem:[#allocation52_spill] sm:$0xff]  ;;  %v8424_v40 = vld [vmem:[#allocation49_spill] sm:$0xff] }
 0x3f7   : > { %v6969_v23 = vmul.f32 %v2323_v30, %v8416_v62  ;;  %3154 = vmatpush.bf16.msra.mxu3 %v8417_v19  ;;  %v965_v44 = vadd.f32 0.5, %v949_v51  ;;  %v931_v22 = vmax.f32 %v750_v21, 0.0  ;;  %v709_v45 = vadd.f32 %v6753_v7, %v618_v47  ;;  %v8418_v30 = vld [vmem:[#allocation28_spill] sm:$0xff]  ;;  %v8429_v19 = vld [vmem:[#allocation58_spill] sm:$0xff] }
 0x3f8   : > { %v748_v20 = vadd.f32 %v6822_v28, %v618_v47  ;;  %v787_v52 = vadd.f32 %v8418_v30, %v618_v47  ;;  %v826_v34 = vadd.f32 %v8419_v58, %v618_v47  ;;  %v8422_v1 = vpack.c.bf16 %v8420_v48, %v8421_v33 }
 0x3f9   : > { %v862_v59 = vadd.f32 0.5, %v846_v5  ;;  %v863_v35 = vadd.f32 0.5, %v847_v54  ;;  %v864_v26 = vadd.f32 0.5, %v848_v43  ;;  %v865_v63 = vadd.f32 0.5, %v849_v55  ;;  %v8426_v54 = vld [vmem:[#allocation44_spill] sm:$0xff]  ;;  %v8427_v43 = vld [vmem:[#allocation61_spill] sm:$0xff] }
 0x3fa   : > { %3096 = vmatpush.bf16.msra.mxu0 %v8422_v1  ;;  %v8425_v51 = vpack.c.bf16 %v8423_v27, %v8424_v40  ;;  %v2528_v21 = vpack.c.bf16 %v2418_v38, %v2416_v56  ;;  %v926_v7 = vmax.f32 %v709_v45, 0.0  ;;  %v928_v28 = vmax.f32 %v787_v52, 0.0  ;;  %v8436_v1 = vld [vmem:[#allocation22_spill] sm:$0xff]  ;;  %v8437_v40 = vld [vmem:[#allocation23_spill] sm:$0xff] }
 0x3fb   : > { %3155 = vmatpush.bf16.msra.mxu3 %v2563_v17  ;;  %v929_v60 = vmax.f32 %v826_v34, 0.0  ;;  %v2561_v4 = vpack.c.bf16 %v2483_v50, %v6929_v39  ;;  %v2515_v49 = vpack.c.bf16 %v6933_v53, %v6896_v9  ;;  %v2513_v13 = vpack.c.bf16 %v6953_v61, %v6949_v57  ;;  %v8430_v39 = vld [vmem:[#allocation57_spill] sm:$0xff]  ;;  %v8432_v9 = vld [vmem:[#allocation56_spill] sm:$0xff]  ;;  %v8433_v53 = vld [vmem:[#allocation43_spill] sm:$0xff] }
 0x3fc   : > { %3134 = vmatpush.bf16.msra.mxu2 %v8425_v51  ;;  %v927_v5 = vmax.f32 %v748_v20, 0.0  ;;  %3042 = vmatpush.bf16.msrb.mxu1 %v2528_v21  ;;  %v8428_v55 = vpack.c.bf16 %v8426_v54, %v8427_v43  ;;  %v2545_v16 = vpack.c.bf16 %v6969_v23, %v6965_v8  ;;  %v942_v46 = vmin.f32 %v926_v7, 4.0  ;;  %v8435_v8 = vld [vmem:[#allocation66_spill] sm:$0xff]  ;;  %v583_v23 = vpop.permute.xlu1 %582 }
 0x3fd   : > { %v944_v17 = vmin.f32 %v928_v28, 4.0  ;;  %v945_v62 = vmin.f32 %v929_v60, 4.0  ;;  %v8431_v50 = vpack.c.bf16 %v8429_v19, %v8430_v39  ;;  %v8434_v56 = vpack.c.bf16 %v8432_v9, %v8433_v53  ;;  %v8443_v9 = vld [vmem:[#allocation63_spill] sm:$0xff]  ;;  %v8444_v53 = vld [vmem:[#allocation62_spill] sm:$0xff] }
 0x3fe   : > { %3097 = vmatpush.bf16.msra.mxu0 %v8428_v55  ;;  %v978_v57 = vfloor.f32 %v962_v37  ;;  %v980_v61 = vfloor.f32 %v964_v0  ;;  %v981_v38 = vfloor.f32 %v965_v44  ;;  %v947_v47 = vmin.f32 %v931_v22, 4.0  ;;  %v8438_v37 = vld [vmem:[#allocation29_spill] sm:$0xff] }
 0x3ff   : > { %v878_v45 = vfloor.f32 %v862_v59  ;;  %v879_v20 = vfloor.f32 %v863_v35  ;;  %v880_v30 = vfloor.f32 %v864_v26  ;;  %v881_v52 = vfloor.f32 %v865_v63  ;;  %3156 = vmatpush.bf16.msra.mxu3 %v2561_v4  ;;  %3043 = vmatmul.bf16.vlgmr.msrb.gmra.mxu1 %v8435_v8  ;;  %v8439_v44 = vld [vmem:[#allocation25_spill] sm:$0xff]  ;;  %v8440_v59 = vld [vmem:[#allocation55_spill] sm:$0xff]  ;;  %v8441_v35 = vld [vmem:[#allocation54_spill] sm:$0xff] }
 0x400   : > { %3111 = vmatpush.bf16.msra.mxu1 %v8431_v50  ;;  %3135 = vmatpush.bf16.msra.mxu2 %v8434_v56  ;;  %v958_v58 = vadd.f32 0.5, %v942_v46  ;;  %v960_v34 = vadd.f32 0.5, %v944_v17  ;;  %v961_v48 = vadd.f32 0.5, %v945_v62  ;;  %v943_v33 = vmin.f32 %v927_v5, 4.0 }
 0x401   : > { %v691_v27 = vadd.f32 %v8436_v1, %v583_v23  ;;  %v730_v51 = vadd.f32 %v8437_v40, %v583_v23  ;;  %v769_v0 = vadd.f32 %v8438_v37, %v583_v23  ;;  %v808_v22 = vadd.f32 %v8439_v44, %v583_v23 }
 0x402   : > { %3098 = vmatpush.bf16.msra.mxu0 %v2515_v49  ;;  %v8442_v26 = vpack.c.bf16 %v8440_v59, %v8441_v35  ;;  %v994_v63 = vmul.f32 0.25, %v978_v57  ;;  %v996_v21 = vmul.f32 0.25, %v980_v61  ;;  %v997_v7 = vmul.f32 0.25, %v981_v38 }
 0x403   : > { %v963_v28 = vadd.f32 0.5, %v947_v47  ;;  %v894_v60 = vmul.f32 0.25, %v878_v45  ;;  %v895_v4 = vmul.f32 0.25, %v879_v20  ;;  %v896_v5 = vmul.f32 0.25, %v880_v30 }
 0x404   : > { %3112 = vmatpush.bf16.msra.mxu1 %v8442_v26  ;;  %3136 = vmatpush.bf16.msra.mxu2 %v2547_v14  ;;  %v897_v54 = vmul.f32 0.25, %v881_v52  ;;  %v842_v43 = vmax.f32 %v691_v27, 0.0  ;;  %v843_v55 = vmax.f32 %v730_v51, 0.0  ;;  %v844_v46 = vmax.f32 %v769_v0, 0.0  ;;  %v8446_v27 = vld [vmem:[#allocation39_spill] sm:$0xff] }
 0x405   : > { %v845_v49 = vmax.f32 %v808_v22, 0.0  ;;  %v974_v17 = vfloor.f32 %v958_v58  ;;  %v976_v62 = vfloor.f32 %v960_v34  ;;  %v977_v19 = vfloor.f32 %v961_v48 }
 0x406   : > { %3099 = vmatpush.bf16.msra.mxu0 %v2513_v13  ;;  %v959_v39 = vadd.f32 0.5, %v943_v33  ;;  %v858_v50 = vmin.f32 %v842_v43, 4.0  ;;  %v859_v3 = vmin.f32 %v843_v55, 4.0  ;;  %v860_v2 = vmin.f32 %v844_v46, 4.0  ;;  %v8450_v43 = vld [vmem:[#allocation37_spill] sm:$0xff] }
 0x407   : > { %v861_v14 = vmin.f32 %v845_v49, 4.0  ;;  %v8445_v56 = vpack.c.bf16 %v8443_v9, %v8444_v53  ;;  %v990_v57 = vmul.f32 0.25, %v974_v17  ;;  %v992_v61 = vmul.f32 0.25, %v976_v62 }
 0x408   : > { %3137 = vmatpush.bf16.msra.mxu2 %v2545_v16  ;;  %v993_v38 = vmul.f32 0.25, %v977_v19  ;;  %v975_v47 = vfloor.f32 %v959_v39  ;;  %v910_v45 = vpack.c.bf16 %v895_v4, %v894_v60  ;;  %v874_v20 = vadd.f32 0.5, %v858_v50  ;;  %v8447_v16 = vld [vmem:[#allocation38_spill] sm:$0xff]  ;;  %v2646_v39 = vld [vmem:[%s8108_s1 + $0xf0] sm:$0xff] }
 0x409   : > { %3113 = vmatpush.bf16.msra.mxu1 %v8445_v56  ;;  %v875_v13 = vadd.f32 0.5, %v859_v3  ;;  %v979_v30 = vfloor.f32 %v963_v28  ;;  %v876_v52 = vadd.f32 0.5, %v860_v2  ;;  %v7021_v23 = vpack.c.bf16 %v994_v63, %v990_v57  ;;  %v2678_v50 = vld [vmem:[%s8108_s1 + $0x1f0] sm:$0xff]  ;;  %v8452_v57 = vld [vmem:[#allocation65_spill] sm:$0xff] }
 0x40a   : > { %v7023_v58 = vpack.c.bf16 %v996_v21, %v992_v61  ;;  %v7025_v34 = vpack.c.bf16 %v997_v7, %v993_v38  ;;  %v877_v48 = vadd.f32 0.5, %v861_v14  ;;  %v890_v33 = vfloor.f32 %v874_v20  ;;  %v8453_v61 = vld [vmem:[#allocation64_spill] sm:$0xff] }
 0x40b   : > { %v891_v1 = vfloor.f32 %v875_v13  ;;  %v8448_v40 = vpack.c.bf16 %v8446_v27, %v8447_v16  ;;  %v991_v51 = vmul.f32 0.25, %v975_v47  ;;  %v2592_v37 = vunpack.c.l.b16 %v6825_v25  ;;  %3029 = vmatmul.bf16.gmra.mxu0 %v7021_v23 }
 0x40c   : > { %v2593_v0 = vunpack.c.h.b16 %v6825_v25  ;;  %v2594_v44 = vunpack.c.l.b16 %v6853_v15  ;;  %v912_v22 = vpack.c.bf16 %v6874_v10, %v6865_v29  ;;  %3067 = vmatmul.bf16.gmra.mxu2 %v7023_v58  ;;  %v911_v59 = vpack.c.bf16 %v897_v54, %v896_v5  ;;  %3086 = vmatmul.bf16.gmra.mxu3 %v7025_v34  ;;  %v8449_v10 = vld [vmem:[#allocation41_spill] sm:$0xff] }
 0x40d   : > { %3114 = vmatpush.bf16.msra.mxu1 %v8448_v40  ;;  %v906_v35 = vmul.f32 0.25, %v890_v33  ;;  %v907_v26 = vmul.f32 0.25, %v891_v1  ;;  %v995_v63 = vmul.f32 0.25, %v979_v30  ;;  %v2595_v21 = vunpack.c.h.b16 %v6853_v15  ;;  %v2644_v30 = vld [vmem:[%s8108_s1 + $0xe0] sm:$0xff] }
 0x40e   : > { %v913_v25 = vpack.c.bf16 %v6878_v12, %v6876_v6  ;;  %v2584_v7 = vunpack.c.l.b16 %v910_v45  ;;  %v2585_v28 = vunpack.c.h.b16 %v910_v45  ;;  %v892_v60 = vfloor.f32 %v876_v52 }
 0x40f   : > { %v893_v4 = vfloor.f32 %v877_v48  ;;  %v916_v29 = vpack.c.bf16 %v907_v26, %v906_v35  ;;  %v8451_v55 = vpack.c.bf16 %v8449_v10, %v8450_v43  ;;  %v7044_v5 = vpack.c.bf16 %v995_v63, %v991_v51  ;;  %v2676_v51 = vld [vmem:[%s8108_s1 + $0x1e0] sm:$0xff]  ;;  %v2642_v26 = vld [vmem:[%s8108_s1 + $0xd0] sm:$0xff] }
 0x410   : > { %v2588_v54 = vunpack.c.l.b16 %v912_v22  ;;  %v2589_v46 = vunpack.c.h.b16 %v912_v22  ;;  %v2289_v49 = vunpack.c.h.bf16 %v6912_v36  ;;  %v2291_v17 = vunpack.c.h.bf16 %v6917_v18  ;;  %v8455_v22 = vld [vmem:[#allocation20_spill] sm:$0xff] }
 0x411   : > { %3115 = vmatpush.bf16.msra.mxu1 %v8451_v55  ;;  %v2586_v62 = vunpack.c.l.b16 %v911_v59  ;;  %v2587_v19 = vunpack.c.h.b16 %v911_v59  ;;  %v2596_v6 = vunpack.c.l.b16 %v916_v29  ;;  %v2597_v12 = vunpack.c.h.b16 %v916_v29  ;;  %v2640_v55 = vld [vmem:[%s8108_s1 + $0xc0] sm:$0xff] }
 0x412   : > { %3048 = vmatmul.bf16.gmra.mxu1 %v7044_v5  ;;  %v2590_v3 = vunpack.c.l.b16 %v913_v25  ;;  %v2591_v2 = vunpack.c.h.b16 %v913_v25  ;;  %v2600_v14 = vpack.c.b16 %v2588_v54, %v2584_v7  ;;  %v2601_v36 = vpack.c.b16 %v2589_v46, %v2585_v28 }
 0x413   : > { %v908_v9 = vmul.f32 0.25, %v892_v60  ;;  %v909_v18 = vmul.f32 0.25, %v893_v4  ;;  %v2604_v53 = vpack.c.b16 %v2596_v6, %v2592_v37  ;;  %v2605_v56 = vpack.c.b16 %v2597_v12, %v2593_v0  ;;  %v2674_v60 = vld [vmem:[%s8108_s1 + $0x1d0] sm:$0xff] }
 0x414   : > { %v8454_v38 = vpack.c.bf16 %v8452_v57, %v8453_v61  ;;  %v2417_v47 = vmul.f32 %v2289_v49, %v2208_v41  ;;  %v2756_v45 = vunpack.c.l.bf16 %v2646_v39  ;;  %v2757_v20 = vunpack.c.h.bf16 %v2646_v39 }
 0x415   : > { %v2821_v13 = vunpack.c.h.bf16 %v2678_v50  ;;  %v7063_v52 = vpack.c.b16 %v2590_v3, %v2586_v62  ;;  %v7065_v48 = vpack.c.b16 %v2591_v2, %v2587_v19  ;;  %v2419_v33 = vmul.f32 %v2291_v17, %v2209_v11  ;;  %v2672_v62 = vld [vmem:[%s8108_s1 + $0x1c0] sm:$0xff] }
 0x416   : > { %3116 = vmatpush.bf16.msra.mxu1 %v8454_v38  ;;  %v2820_v1 = vunpack.c.l.bf16 %v2678_v50  ;;  %v7069_v27 = vunpack.c.l.bf16 %v2600_v14  ;;  %v7071_v16 = vunpack.c.l.bf16 %v2601_v36  ;;  %v7073_v41 = vunpack.c.h.bf16 %v2604_v53  ;;  %v2638_v50 = vld [vmem:[%s8108_s1 + $0xb0] sm:$0xff] }
 0x417   : > { %v7075_v40 = vunpack.c.h.bf16 %v2605_v56  ;;  %v7080_v37 = vpack.c.bf16 %v909_v18, %v908_v9  ;;  %v7082_v0 = vunpack.c.l.bf16 %v2604_v53  ;;  %v8457_v11 = vpack.c.bf16 %v8455_v22, %v8456_v31  ;;  %v2670_v9 = vld [vmem:[%s8108_s1 + $0x1b0] sm:$0xff] }
 0x418   : > { %v2752_v59 = vunpack.c.l.bf16 %v2644_v30  ;;  %v2753_v35 = vunpack.c.h.bf16 %v2644_v30  ;;  %v7090_v63 = vunpack.c.l.bf16 %v2605_v56  ;;  %v2884_v25 = vmul.f32 %v2756_v45, %v7073_v41 }
 0x419   : > { %v2885_v7 = vmul.f32 %v2757_v20, %v7075_v40  ;;  %v2949_v28 = vmul.f32 %v2821_v13, %v7075_v40  ;;  %v2529_v4 = vpack.c.bf16 %v2419_v33, %v2417_v47  ;;  %v2948_v29 = vmul.f32 %v2820_v1, %v7073_v41  ;;  %v2634_v33 = vld [vmem:[%s8108_s1 + $0x90] sm:$0xff] }
 0x41a   : > { %3117 = vmatpush.bf16.msra.mxu1 %v8457_v11  ;;  %v2816_v10 = vunpack.c.l.bf16 %v2676_v51  ;;  %v2817_v43 = vunpack.c.h.bf16 %v2676_v51  ;;  %v7102_v54 = vunpack.c.h.bf16 %v2600_v14  ;;  %v7104_v46 = vunpack.c.h.bf16 %v2601_v36  ;;  %3312 = vmatpush.msrb.mxu0 %v2884_v25  ;;  %v2666_v11 = vld [vmem:[%s8108_s1 + $0x190] sm:$0xff] }
 0x41b   : > { %3370 = vmatpush.msrb.mxu2 %v2885_v7  ;;  %v2748_v49 = vunpack.c.l.bf16 %v2642_v26  ;;  %v2749_v17 = vunpack.c.h.bf16 %v2642_v26  ;;  %v7110_v19 = vunpack.c.l.bf16 %v7063_v52  ;;  %v7113_v6 = vunpack.c.l.bf16 %v7065_v48  ;;  %3399 = vmatpush.msrb.mxu3 %v2949_v28  ;;  %v2632_v7 = vld [vmem:[%s8108_s1 + $0x80] sm:$0xff] }
 0x41c   : > { %v2812_v12 = vunpack.c.l.bf16 %v2674_v60  ;;  %v2813_v39 = vunpack.c.h.bf16 %v2674_v60  ;;  %v2598_v3 = vunpack.c.l.b16 %v7080_v37  ;;  %3100 = vmatmul.bf16.vlgmr.msra.gmra.mxu0 %v6833_v32  ;;  %3138 = vmatmul.bf16.vlgmr.msra.gmra.mxu2 %v6842_v42  ;;  %v2880_v2 = vmul.f32 %v2752_v59, %v7082_v0  ;;  %v2636_v42 = vld [vmem:[%s8108_s1 + $0xa0] sm:$0xff] }
 0x41d   : > { %v2881_v14 = vmul.f32 %v2753_v35, %v7090_v63  ;;  %v2744_v36 = vunpack.c.l.bf16 %v2640_v55  ;;  %3157 = vmatmul.bf16.vlgmr.msra.gmra.mxu3 %v6805_v24  ;;  %v2944_v18 = vmul.f32 %v2816_v10, %v7082_v0  ;;  %v2945_v53 = vmul.f32 %v2817_v43, %v7090_v63  ;;  %v2668_v24 = vld [vmem:[%s8108_s1 + $0x1a0] sm:$0xff] }
 0x41e   : > { %3118 = vmatpush.bf16.msra.mxu1 %v2529_v4  ;;  %v2808_v56 = vunpack.c.l.bf16 %v2672_v62  ;;  %v2745_v32 = vunpack.c.h.bf16 %v2640_v55  ;;  %3313 = vmatpush.msrb.mxu0 %v2880_v2  ;;  %v2876_v57 = vmul.f32 %v2748_v49, %v7102_v54  ;;  %v2877_v61 = vmul.f32 %v2749_v17, %v7104_v46  ;;  %v2664_v10 = vld [vmem:[%s8108_s1 + $0x180] sm:$0xff] }
 0x41f   : > { %3371 = vmatpush.msrb.mxu2 %v2881_v14  ;;  %v2809_v38 = vunpack.c.h.bf16 %v2672_v62  ;;  %v2740_v47 = vunpack.c.l.bf16 %v2638_v50  ;;  %3400 = vmatpush.msrb.mxu3 %v2945_v53  ;;  %v2940_v45 = vmul.f32 %v2812_v12, %v7102_v54  ;;  %v2941_v20 = vmul.f32 %v2813_v39, %v7104_v46 }
 0x420   : > { %v2804_v13 = vunpack.c.l.bf16 %v2670_v9  ;;  %v2741_v30 = vunpack.c.h.bf16 %v2638_v50  ;;  %v2599_v1 = vunpack.c.h.b16 %v7080_v37  ;;  %3314 = vmatpush.msrb.mxu0 %v2876_v57  ;;  %v2872_v51 = vmul.f32 %v2744_v36, %v7069_v27  ;;  %v2628_v37 = vld [vmem:[%s8108_s1 + $0x60] sm:$0xff] }
 0x421   : > { %3372 = vmatpush.msrb.mxu2 %v2877_v61  ;;  %v2805_v22 = vunpack.c.h.bf16 %v2670_v9  ;;  %v2736_v31 = vunpack.c.l.bf16 %v2636_v42  ;;  %3401 = vmatpush.msrb.mxu3 %v2941_v20  ;;  %v2936_v59 = vmul.f32 %v2808_v56, %v7069_v27  ;;  %v2873_v35 = vmul.f32 %v2745_v32, %v7071_v16  ;;  %v2630_v9 = vld [vmem:[%s8108_s1 + $0x70] sm:$0xff] }
 0x422   : > { %3341 = vmatpush.msrb.mxu1 %v2948_v29  ;;  %v2800_v26 = vunpack.c.l.bf16 %v2668_v24  ;;  %v2737_v25 = vunpack.c.h.bf16 %v2636_v42  ;;  %3315 = vmatpush.msrb.mxu0 %v2872_v51  ;;  %v2937_v28 = vmul.f32 %v2809_v38, %v7071_v16  ;;  %v2868_v60 = vmul.f32 %v2740_v47, %v7073_v41 }
 0x423   : > { %3119 = vmatmul.bf16.vlgmr.msra.gmra.mxu1 %v8435_v8  ;;  %v2801_v4 = vunpack.c.h.bf16 %v2668_v24  ;;  %v2732_v29 = vunpack.c.l.bf16 %v2634_v33  ;;  %3373 = vmatpush.msrb.mxu2 %v2873_v35  ;;  %v2932_v43 = vmul.f32 %v2804_v13, %v7073_v41  ;;  %v2869_v55 = vmul.f32 %v2741_v30, %v7075_v40  ;;  %v2626_v30 = vld [vmem:[%s8108_s1 + $0x50] sm:$0xff] }
 0x424   : > { %3342 = vmatpush.msrb.mxu1 %v2944_v18  ;;  %v2796_v49 = vunpack.c.l.bf16 %v2666_v11  ;;  %v2733_v17 = vunpack.c.h.bf16 %v2634_v33  ;;  %3402 = vmatpush.msrb.mxu3 %v2937_v28  ;;  %v2933_v8 = vmul.f32 %v2805_v22, %v7075_v40  ;;  %v2864_v62 = vmul.f32 %v2736_v31, %v7082_v0  ;;  %v2662_v18 = vld [vmem:[%s8108_s1 + $0x170] sm:$0xff] }
 0x425   : > { %3316 = vmatpush.msrb.mxu0 %v2868_v60  ;;  %v2797_v12 = vunpack.c.h.bf16 %v2666_v11  ;;  %v2728_v39 = vunpack.c.l.bf16 %v2632_v7  ;;  %3374 = vmatpush.msrb.mxu2 %v2869_v55  ;;  %v2928_v50 = vmul.f32 %v2800_v26, %v7082_v0  ;;  %v2865_v2 = vmul.f32 %v2737_v25, %v7090_v63  ;;  %v2658_v33 = vld [vmem:[%s8108_s1 + $0x150] sm:$0xff] }
 0x426   : > { %3343 = vmatpush.msrb.mxu1 %v2940_v45  ;;  %v2792_v14 = vunpack.c.l.bf16 %v2664_v10  ;;  %v2729_v36 = vunpack.c.h.bf16 %v2632_v7  ;;  %v2606_v53 = vpack.c.b16 %v2598_v3, %v2594_v44  ;;  %3403 = vmatpush.msrb.mxu3 %v2933_v8  ;;  %v2929_v56 = vmul.f32 %v2801_v4, %v7090_v63  ;;  %v2660_v3 = vld [vmem:[%s8108_s1 + $0x160] sm:$0xff]  ;;  %v2622_v55 = vld [vmem:[%s8108_s1 + $0x30] sm:$0xff] }
 0x427   : > { %3317 = vmatpush.msrb.mxu0 %v2864_v62  ;;  %v2860_v32 = vmul.f32 %v2732_v29, %v7102_v54  ;;  %v2793_v42 = vunpack.c.h.bf16 %v2664_v10  ;;  %v7177_v57 = vunpack.c.h.bf16 %v7063_v52  ;;  %v7181_v61 = vpack.c.b16 %v2599_v1, %v2595_v21  ;;  %3375 = vmatpush.msrb.mxu2 %v2865_v2  ;;  %v2656_v4 = vld [vmem:[%s8108_s1 + $0x140] sm:$0xff] }
 0x428   : > { %3344 = vmatpush.msrb.mxu1 %v2936_v59  ;;  %v2924_v38 = vmul.f32 %v2796_v49, %v7102_v54  ;;  %v2861_v44 = vmul.f32 %v2733_v17, %v7104_v46  ;;  %3404 = vmatpush.msrb.mxu3 %v2929_v56  ;;  %v2925_v15 = vmul.f32 %v2797_v12, %v7104_v46  ;;  %v2724_v52 = vunpack.c.l.bf16 %v2630_v9  ;;  %v2620_v2 = vld [vmem:[%s8108_s1 + $0x20] sm:$0xff] }
 0x429   : > { %3318 = vmatpush.msrb.mxu0 %v2860_v32  ;;  %v2856_v21 = vmul.f32 %v2728_v39, %v7069_v27  ;;  %v2788_v47 = vunpack.c.l.bf16 %v2662_v18  ;;  %v2920_v24 = vmul.f32 %v2792_v14, %v7069_v27  ;;  %v2857_v45 = vmul.f32 %v2729_v36, %v7071_v16 }
 0x42a   : > { %3345 = vmatpush.msrb.mxu1 %v2932_v43  ;;  %3376 = vmatpush.msrb.mxu2 %v2861_v44  ;;  %v2725_v20 = vunpack.c.h.bf16 %v2630_v9  ;;  %v2789_v13 = vunpack.c.h.bf16 %v2662_v18  ;;  %v7202_v1 = vunpack.c.h.bf16 %v7065_v48  ;;  %v2921_v51 = vmul.f32 %v2793_v42, %v7071_v16  ;;  %v2624_v48 = vld [vmem:[%s8108_s1 + $0x40] sm:$0xff]  ;;  %v2618_v44 = vld [vmem:[%s8108_s1 + $0x10] sm:$0xff] }
 0x42b   : > { %3405 = vmatpush.msrb.mxu3 %v2925_v15  ;;  %3319 = vmatpush.msrb.mxu0 %v2856_v21  ;;  %v2720_v22 = vunpack.c.l.bf16 %v2628_v37  ;;  %v2784_v31 = vunpack.c.l.bf16 %v2660_v3  ;;  %v7205_v11 = vunpack.c.l.bf16 %v2606_v53  ;;  %v7208_v59 = vunpack.c.l.bf16 %v7181_v61 }
 0x42c   : > { %3346 = vmatpush.msrb.mxu1 %v2928_v50  ;;  %3377 = vmatpush.msrb.mxu2 %v2857_v45  ;;  %v2721_v35 = vunpack.c.h.bf16 %v2628_v37  ;;  %v2785_v26 = vunpack.c.h.bf16 %v2660_v3  ;;  %v2852_v25 = vmul.f32 %v2724_v52, %v7073_v41  ;;  %v2916_v7 = vmul.f32 %v2788_v47, %v7073_v41  ;;  %v2650_v52 = vld [vmem:[%s8108_s1 + $0x110] sm:$0xff] }
 0x42d   : > { %3406 = vmatpush.msrb.mxu3 %v2921_v51  ;;  %3105 = vmatmul.bf16.gmra.mxu0 %v7021_v23  ;;  %v2716_v28 = vunpack.c.l.bf16 %v2626_v30  ;;  %v2780_v60 = vunpack.c.l.bf16 %v2658_v33  ;;  %v2853_v29 = vmul.f32 %v2725_v20, %v7075_v40  ;;  %v2917_v10 = vmul.f32 %v2789_v13, %v7075_v40 }
 0x42e   : > { %3347 = vmatpush.msrb.mxu1 %v2924_v38  ;;  %3143 = vmatmul.bf16.gmra.mxu2 %v7023_v58  ;;  %v2717_v43 = vunpack.c.h.bf16 %v2626_v30  ;;  %v2781_v23 = vunpack.c.h.bf16 %v2658_v33  ;;  %v7226_v49 = vunpack.c.h.bf16 %v2606_v53  ;;  %v2848_v17 = vmul.f32 %v2720_v22, %v7082_v0  ;;  %v2652_v53 = vld [vmem:[%s8108_s1 + $0x120] sm:$0xff] }
 0x42f   : > { %3162 = vmatmul.bf16.gmra.mxu3 %v7025_v34  ;;  %3320 = vmatpush.msrb.mxu0 %v2852_v25  ;;  %v2912_v58 = vmul.f32 %v2784_v31, %v7082_v0  ;;  %v2712_v8 = vunpack.c.l.bf16 %v2624_v48  ;;  %v2654_v34 = vld [vmem:[%s8108_s1 + $0x130] sm:$0xff]  ;;  %v2849_v62 = vmul.f32 %v2721_v35, %v7090_v63  ;;  %v2913_v12 = vmul.f32 %v2785_v26, %v7090_v63  ;;  %v2648_v22 = vld [vmem:[%s8108_s1 + $0x100] sm:$0xff] }
 0x430   : > { %3348 = vmatpush.msrb.mxu1 %v2920_v24  ;;  %3378 = vmatpush.msrb.mxu2 %v2853_v29  ;;  %v2776_v39 = vunpack.c.l.bf16 %v2656_v4  ;;  %v2713_v50 = vunpack.c.h.bf16 %v2624_v48  ;;  %v2844_v14 = vmul.f32 %v2716_v28, %v7102_v54  ;;  %v2908_v36 = vmul.f32 %v2780_v60, %v7102_v54 }
 0x431   : > { %3407 = vmatpush.msrb.mxu3 %v2917_v10  ;;  %3321 = vmatpush.msrb.mxu0 %v2848_v17  ;;  %v2777_v9 = vunpack.c.h.bf16 %v2656_v4  ;;  %v2708_v18 = vunpack.c.l.bf16 %v2622_v55  ;;  %v2845_v56 = vmul.f32 %v2717_v43, %v7104_v46  ;;  %v2909_v32 = vmul.f32 %v2781_v23, %v7104_v46 }
 0x432   : > { %3349 = vmatpush.msrb.mxu1 %v2916_v7  ;;  %3379 = vmatpush.msrb.mxu2 %v2849_v62  ;;  %v2772_v42 = vunpack.c.l.bf16 %v2654_v34  ;;  %v2709_v38 = vunpack.c.h.bf16 %v2622_v55  ;;  %v7249_v37 = vunpack.c.h.bf16 %v7181_v61  ;;  %v2840_v3 = vmul.f32 %v2712_v8, %v7069_v27  ;;  %v2616_v61 = vld [vmem:[%s8108_s1] sm:$0xff] }
 0x433   : > { %3408 = vmatpush.msrb.mxu3 %v2913_v12  ;;  %3322 = vmatpush.msrb.mxu0 %v2844_v14  ;;  %v2773_v15 = vunpack.c.h.bf16 %v2654_v34  ;;  %v2704_v21 = vunpack.c.l.bf16 %v2620_v2  ;;  %v2904_v47 = vmul.f32 %v2776_v39, %v7069_v27  ;;  %v2841_v24 = vmul.f32 %v2713_v50, %v7071_v16 }
 0x434   : > { %3350 = vmatpush.msrb.mxu1 %v2912_v58  ;;  %3380 = vmatpush.msrb.mxu2 %v2845_v56  ;;  %v2768_v45 = vunpack.c.l.bf16 %v2652_v53  ;;  %v2705_v20 = vunpack.c.h.bf16 %v2620_v2  ;;  %v2905_v13 = vmul.f32 %v2777_v9, %v7071_v16  ;;  %v2836_v30 = vmul.f32 %v2708_v18, %v7073_v41 }
 0x435   : > { %3409 = vmatpush.msrb.mxu3 %v2909_v32  ;;  %3124 = vmatmul.bf16.gmra.mxu1 %v7044_v5  ;;  %v2769_v33 = vunpack.c.h.bf16 %v2652_v53  ;;  %v2700_v51 = vunpack.c.l.bf16 %v2618_v44  ;;  %v2900_v31 = vmul.f32 %v2772_v42, %v7073_v41  ;;  %v2837_v35 = vmul.f32 %v2709_v38, %v7075_v40  ;;  %v2647_v5 = vld [vmem:[%s8108_s1 + $0xf8] sm:$0xff] }
 0x436   : > { %3351 = vmatpush.msrb.mxu1 %v2908_v36  ;;  %3323 = vmatpush.msrb.mxu0 %v2840_v3  ;;  %v2764_v26 = vunpack.c.l.bf16 %v2650_v52  ;;  %v2701_v48 = vunpack.c.h.bf16 %v2618_v44  ;;  %v2901_v25 = vmul.f32 %v2773_v15, %v7075_v40  ;;  %v2832_v7 = vmul.f32 %v2704_v21, %v7082_v0  ;;  %v2679_v41 = vld [vmem:[%s8108_s1 + $0x1f8] sm:$0xff]  ;;  %v2645_v40 = vld [vmem:[%s8108_s1 + $0xe8] sm:$0xff] }
 0x437   : > { %3381 = vmatpush.msrb.mxu2 %v2841_v24  ;;  %3410 = vmatpush.msrb.mxu3 %v2905_v13  ;;  %v2765_v28 = vunpack.c.h.bf16 %v2650_v52  ;;  %v2696_v60 = vunpack.c.l.bf16 %v2616_v61  ;;  %v2896_v4 = vmul.f32 %v2768_v45, %v7082_v0  ;;  %v2833_v29 = vmul.f32 %v2705_v20, %v7090_v63  ;;  %v2677_v0 = vld [vmem:[%s8108_s1 + $0x1e8] sm:$0xff]  ;;  %v2671_v20 = vld [vmem:[%s8108_s1 + $0x1b8] sm:$0xff] }
 0x438   : > { %3352 = vmatpush.msrb.mxu1 %v2904_v47  ;;  %3324 = vmatpush.msrb.mxu0 %v2836_v30  ;;  %v2760_v10 = vunpack.c.l.bf16 %v2648_v22  ;;  %v2697_v43 = vunpack.c.h.bf16 %v2616_v61  ;;  %v2897_v23 = vmul.f32 %v2769_v33, %v7090_v63  ;;  %v2828_v55 = vmul.f32 %v2700_v51, %v7102_v54  ;;  %v2643_v63 = vld [vmem:[%s8108_s1 + $0xd8] sm:$0xff]  ;;  %v2637_v51 = vld [vmem:[%s8108_s1 + $0xa8] sm:$0xff] }
 0x439   : > { %3382 = vmatpush.msrb.mxu2 %v2837_v35  ;;  %3411 = vmatpush.msrb.mxu3 %v2901_v25  ;;  %v2761_v17 = vunpack.c.h.bf16 %v2648_v22  ;;  %v2758_v58 = vunpack.c.l.bf16 %v2647_v5  ;;  %v2892_v8 = vmul.f32 %v2764_v26, %v7102_v54  ;;  %v2829_v34 = vmul.f32 %v2701_v48, %v7104_v46  ;;  %v2675_v54 = vld [vmem:[%s8108_s1 + $0x1d8] sm:$0xff]  ;;  %v2669_v48 = vld [vmem:[%s8108_s1 + $0x1a8] sm:$0xff] }
 0x43a   : > { %3353 = vmatpush.msrb.mxu1 %v2900_v31  ;;  %3325 = vmatpush.msrb.mxu0 %v2832_v7  ;;  %v2822_v62 = vunpack.c.l.bf16 %v2679_v41  ;;  %v2759_v12 = vunpack.c.h.bf16 %v2647_v5  ;;  %v2893_v39 = vmul.f32 %v2765_v28, %v7104_v46  ;;  %v2824_v50 = vmul.f32 %v2696_v60, %v7069_v27  ;;  %v2641_v46 = vld [vmem:[%s8108_s1 + $0xc8] sm:$0xff]  ;;  %v2635_v60 = vld [vmem:[%s8108_s1 + $0x98] sm:$0xff] }
 0x43b   : > { %3383 = vmatpush.msrb.mxu2 %v2833_v29  ;;  %3412 = vmatpush.msrb.mxu3 %v2897_v23  ;;  %v2823_v2 = vunpack.c.h.bf16 %v2679_v41  ;;  %v2754_v14 = vunpack.c.l.bf16 %v2645_v40  ;;  %v2888_v36 = vmul.f32 %v2760_v10, %v7069_v27  ;;  %v2825_v9 = vmul.f32 %v2697_v43, %v7071_v16  ;;  %v2673_v27 = vld [vmem:[%s8108_s1 + $0x1c8] sm:$0xff]  ;;  %v2667_v43 = vld [vmem:[%s8108_s1 + $0x198] sm:$0xff] }
 0x43c   : > { %3354 = vmatpush.msrb.mxu1 %v2896_v4  ;;  %3326 = vmatpush.msrb.mxu0 %v2828_v55  ;;  %v2818_v18 = vunpack.c.l.bf16 %v2677_v0  ;;  %v2755_v53 = vunpack.c.h.bf16 %v2645_v40  ;;  %v2889_v56 = vmul.f32 %v2761_v17, %v7071_v16  ;;  %v2886_v32 = vmul.f32 %v2758_v58, %v7226_v49  ;;  %v2639_v16 = vld [vmem:[%s8108_s1 + $0xb8] sm:$0xff]  ;;  %v2633_v58 = vld [vmem:[%s8108_s1 + $0x88] sm:$0xff] }
 0x43d   : > { %3384 = vmatpush.msrb.mxu2 %v2829_v34  ;;  %3413 = vmatpush.msrb.mxu3 %v2893_v39  ;;  %v2819_v42 = vunpack.c.h.bf16 %v2677_v0  ;;  %v2750_v38 = vunpack.c.l.bf16 %v2643_v63  ;;  %v2950_v44 = vmul.f32 %v2822_v62, %v7226_v49  ;;  %v2887_v3 = vmul.f32 %v2759_v12, %v7249_v37  ;;  %v2665_v12 = vld [vmem:[%s8108_s1 + $0x188] sm:$0xff] }
 0x43e   : > { %3355 = vmatpush.msrb.mxu1 %v2892_v8  ;;  %3327 = vmatpush.msrb.mxu0 %v2824_v50  ;;  %v2814_v15 = vunpack.c.l.bf16 %v2675_v54  ;;  %v2751_v21 = vunpack.c.h.bf16 %v2643_v63  ;;  %v2951_v52 = vmul.f32 %v2823_v2, %v7249_v37  ;;  %v2882_v47 = vmul.f32 %v2754_v14, %v7205_v11  ;;  %v2631_v14 = vld [vmem:[%s8108_s1 + $0x78] sm:$0xff] }
 0x43f   : > { %3385 = vmatpush.msrb.mxu2 %v2825_v9  ;;  %3414 = vmatpush.msrb.mxu3 %v2889_v56  ;;  %v2815_v24 = vunpack.c.h.bf16 %v2675_v54  ;;  %v2746_v45 = vunpack.c.l.bf16 %v2641_v46  ;;  %v2946_v61 = vmul.f32 %v2818_v18, %v7205_v11  ;;  %v2883_v13 = vmul.f32 %v2755_v53, %v7208_v59  ;;  %v2663_v53 = vld [vmem:[%s8108_s1 + $0x178] sm:$0xff] }
 0x440   : > { %3356 = vmatpush.msrb.mxu1 %v2888_v36  ;;  %3428 = vmatpush.msra.mxu0 %v2886_v32  ;;  %v2810_v30 = vunpack.c.l.bf16 %v2673_v27  ;;  %v2747_v33 = vunpack.c.h.bf16 %v2641_v46  ;;  %v2947_v22 = vmul.f32 %v2819_v42, %v7208_v59  ;;  %v2878_v31 = vmul.f32 %v2750_v38, %v7177_v57  ;;  %v2629_v38 = vld [vmem:[%s8108_s1 + $0x68] sm:$0xff] }
 0x441   : > { %3486 = vmatpush.msra.mxu2 %v2887_v3  ;;  %3515 = vmatpush.msra.mxu3 %v2951_v52  ;;  %v2811_v35 = vunpack.c.h.bf16 %v2673_v27  ;;  %v2742_v26 = vunpack.c.l.bf16 %v2639_v16  ;;  %v2942_v5 = vmul.f32 %v2814_v15, %v7177_v57  ;;  %v2879_v25 = vmul.f32 %v2751_v21, %v7202_v1  ;;  %v2661_v21 = vld [vmem:[%s8108_s1 + $0x168] sm:$0xff] }
 0x442   : > { %3457 = vmatpush.msra.mxu1 %v2950_v44  ;;  %3429 = vmatpush.msra.mxu0 %v2882_v47  ;;  %v2806_v7 = vunpack.c.l.bf16 %v2671_v20  ;;  %v2743_v28 = vunpack.c.h.bf16 %v2639_v16  ;;  %v2943_v41 = vmul.f32 %v2815_v24, %v7202_v1  ;;  %v2874_v4 = vmul.f32 %v2746_v45, %v7110_v19  ;;  %v2627_v45 = vld [vmem:[%s8108_s1 + $0x58] sm:$0xff] }
 0x443   : > { %3487 = vmatpush.msra.mxu2 %v2883_v13  ;;  %3516 = vmatpush.msra.mxu3 %v2947_v22  ;;  %v2807_v29 = vunpack.c.h.bf16 %v2671_v20  ;;  %v2738_v10 = vunpack.c.l.bf16 %v2637_v51  ;;  %v2938_v40 = vmul.f32 %v2810_v30, %v7110_v19  ;;  %v2875_v23 = vmul.f32 %v2747_v33, %v7113_v6  ;;  %v2659_v33 = vld [vmem:[%s8108_s1 + $0x158] sm:$0xff] }
 0x444   : > { %3458 = vmatpush.msra.mxu1 %v2946_v61  ;;  %3430 = vmatpush.msra.mxu0 %v2878_v31  ;;  %v2802_v55 = vunpack.c.l.bf16 %v2669_v48  ;;  %v2739_v17 = vunpack.c.h.bf16 %v2637_v51  ;;  %v2939_v0 = vmul.f32 %v2811_v35, %v7113_v6  ;;  %v2870_v8 = vmul.f32 %v2742_v26, %v7226_v49  ;;  %v2625_v26 = vld [vmem:[%s8108_s1 + $0x48] sm:$0xff] }
 0x445   : > { %3488 = vmatpush.msra.mxu2 %v2879_v25  ;;  %3517 = vmatpush.msra.mxu3 %v2943_v41  ;;  %v2803_v34 = vunpack.c.h.bf16 %v2669_v48  ;;  %v2734_v62 = vunpack.c.l.bf16 %v2635_v60  ;;  %v2934_v63 = vmul.f32 %v2806_v7, %v7226_v49  ;;  %v2871_v39 = vmul.f32 %v2743_v28, %v7249_v37  ;;  %v2657_v28 = vld [vmem:[%s8108_s1 + $0x148] sm:$0xff] }
 0x446   : > { %3459 = vmatpush.msra.mxu1 %v2942_v5  ;;  %3431 = vmatpush.msra.mxu0 %v2874_v4  ;;  %v2798_v50 = vunpack.c.l.bf16 %v2667_v43  ;;  %v2735_v2 = vunpack.c.h.bf16 %v2635_v60  ;;  %v2935_v54 = vmul.f32 %v2807_v29, %v7249_v37  ;;  %v2866_v36 = vmul.f32 %v2738_v10, %v7205_v11  ;;  %v2623_v10 = vld [vmem:[%s8108_s1 + $0x38] sm:$0xff] }
 0x447   : > { %3489 = vmatpush.msra.mxu2 %v2875_v23  ;;  %3518 = vmatpush.msra.mxu3 %v2939_v0  ;;  %v2799_v9 = vunpack.c.h.bf16 %v2667_v43  ;;  %v2730_v18 = vunpack.c.l.bf16 %v2633_v58  ;;  %v2930_v46 = vmul.f32 %v2802_v55, %v7205_v11  ;;  %v2867_v56 = vmul.f32 %v2739_v17, %v7208_v59  ;;  %v2655_v17 = vld [vmem:[%s8108_s1 + $0x138] sm:$0xff] }
 0x448   : > { %3460 = vmatpush.msra.mxu1 %v2938_v40  ;;  %3432 = vmatpush.msra.mxu0 %v2870_v8  ;;  %v2794_v32 = vunpack.c.l.bf16 %v2665_v12  ;;  %v2731_v42 = vunpack.c.h.bf16 %v2633_v58  ;;  %v2931_v27 = vmul.f32 %v2803_v34, %v7208_v59  ;;  %v2862_v44 = vmul.f32 %v2734_v62, %v7177_v57  ;;  %v2621_v62 = vld [vmem:[%s8108_s1 + $0x28] sm:$0xff] }
 0x449   : > { %3490 = vmatpush.msra.mxu2 %v2871_v39  ;;  %3519 = vmatpush.msra.mxu3 %v2935_v54  ;;  %v2795_v3 = vunpack.c.h.bf16 %v2665_v12  ;;  %v2726_v15 = vunpack.c.l.bf16 %v2631_v14  ;;  %v2926_v16 = vmul.f32 %v2798_v50, %v7177_v57  ;;  %v2863_v52 = vmul.f32 %v2735_v2, %v7202_v1  ;;  %v2653_v2 = vld [vmem:[%s8108_s1 + $0x128] sm:$0xff] }
 0x44a   : > { %3461 = vmatpush.msra.mxu1 %v2934_v63  ;;  %3433 = vmatpush.msra.mxu0 %v2866_v36  ;;  %v2790_v47 = vunpack.c.l.bf16 %v2663_v53  ;;  %v2727_v24 = vunpack.c.h.bf16 %v2631_v14  ;;  %v2927_v20 = vmul.f32 %v2799_v9, %v7202_v1  ;;  %v2858_v61 = vmul.f32 %v2730_v18, %v7110_v19  ;;  %v2619_v18 = vld [vmem:[%s8108_s1 + $0x18] sm:$0xff] }
 0x44b   : > { %3491 = vmatpush.msra.mxu2 %v2867_v56  ;;  %3520 = vmatpush.msra.mxu3 %v2931_v27  ;;  %v2791_v13 = vunpack.c.h.bf16 %v2663_v53  ;;  %v2722_v30 = vunpack.c.l.bf16 %v2629_v38  ;;  %v2922_v51 = vmul.f32 %v2794_v32, %v7110_v19  ;;  %v2859_v22 = vmul.f32 %v2731_v42, %v7113_v6  ;;  %v2651_v42 = vld [vmem:[%s8108_s1 + $0x118] sm:$0xff] }
 0x44c   : > { %3462 = vmatpush.msra.mxu1 %v2930_v46  ;;  %3434 = vmatpush.msra.mxu0 %v2862_v44  ;;  %v2786_v31 = vunpack.c.l.bf16 %v2661_v21  ;;  %v2723_v35 = vunpack.c.h.bf16 %v2629_v38  ;;  %v2923_v48 = vmul.f32 %v2795_v3, %v7113_v6  ;;  %v2854_v5 = vmul.f32 %v2726_v15, %v7226_v49  ;;  %v2617_v15 = vld [vmem:[%s8108_s1 + $0x8] sm:$0xff] }
 0x44d   : > { %3492 = vmatpush.msra.mxu2 %v2863_v52  ;;  %3521 = vmatpush.msra.mxu3 %v2927_v20  ;;  %v2787_v25 = vunpack.c.h.bf16 %v2661_v21  ;;  %v2718_v7 = vunpack.c.l.bf16 %v2627_v45  ;;  %v2918_v60 = vmul.f32 %v2790_v47, %v7226_v49  ;;  %v2855_v41 = vmul.f32 %v2727_v24, %v7249_v37  ;;  %v2649_v24 = vld [vmem:[%s8108_s1 + $0x108] sm:$0xff] }
 0x44e   : > { %3463 = vmatpush.msra.mxu1 %v2926_v16  ;;  %3435 = vmatpush.msra.mxu0 %v2858_v61  ;;  %v2782_v4 = vunpack.c.l.bf16 %v2659_v33  ;;  %v2719_v29 = vunpack.c.h.bf16 %v2627_v45  ;;  %v2919_v43 = vmul.f32 %v2791_v13, %v7249_v37  ;;  %v2850_v40 = vmul.f32 %v2722_v30, %v7205_v11 }
 0x44f   : > { %3493 = vmatpush.msra.mxu2 %v2859_v22  ;;  %3522 = vmatpush.msra.mxu3 %v2923_v48  ;;  %v2783_v23 = vunpack.c.h.bf16 %v2659_v33  ;;  %v2714_v55 = vunpack.c.l.bf16 %v2625_v26  ;;  %v2914_v58 = vmul.f32 %v2786_v31, %v7205_v11  ;;  %v2851_v0 = vmul.f32 %v2723_v35, %v7208_v59 }
 0x450   : > { %3464 = vmatpush.msra.mxu1 %v2922_v51  ;;  %3436 = vmatpush.msra.mxu0 %v2854_v5  ;;  %v2778_v8 = vunpack.c.l.bf16 %v2657_v28  ;;  %v2715_v34 = vunpack.c.h.bf16 %v2625_v26  ;;  %v2915_v12 = vmul.f32 %v2787_v25, %v7208_v59  ;;  %v2846_v63 = vmul.f32 %v2718_v7, %v7177_v57 }
 0x451   : > { %3494 = vmatpush.msra.mxu2 %v2855_v41  ;;  %3523 = vmatpush.msra.mxu3 %v2919_v43  ;;  %v2779_v39 = vunpack.c.h.bf16 %v2657_v28  ;;  %v2710_v50 = vunpack.c.l.bf16 %v2623_v10  ;;  %v2910_v14 = vmul.f32 %v2782_v4, %v7177_v57  ;;  %v2847_v54 = vmul.f32 %v2719_v29, %v7202_v1 }
 0x452   : > { %3465 = vmatpush.msra.mxu1 %v2918_v60  ;;  %3437 = vmatpush.msra.mxu0 %v2850_v40  ;;  %v2774_v36 = vunpack.c.l.bf16 %v2655_v17  ;;  %v2711_v9 = vunpack.c.h.bf16 %v2623_v10  ;;  %v2911_v53 = vmul.f32 %v2783_v23, %v7202_v1  ;;  %v2842_v46 = vmul.f32 %v2714_v55, %v7110_v19 }
 0x453   : > { %3495 = vmatpush.msra.mxu2 %v2851_v0  ;;  %3524 = vmatpush.msra.mxu3 %v2915_v12  ;;  %v2775_v56 = vunpack.c.h.bf16 %v2655_v17  ;;  %v2706_v32 = vunpack.c.l.bf16 %v2621_v62  ;;  %v2906_v38 = vmul.f32 %v2778_v8, %v7110_v19  ;;  %v2843_v27 = vmul.f32 %v2715_v34, %v7113_v6 }
 0x454   : > { %3466 = vmatpush.msra.mxu1 %v2914_v58  ;;  %3438 = vmatpush.msra.mxu0 %v2846_v63  ;;  %v2770_v44 = vunpack.c.l.bf16 %v2653_v2  ;;  %v2707_v3 = vunpack.c.h.bf16 %v2621_v62  ;;  %v2907_v21 = vmul.f32 %v2779_v39, %v7113_v6  ;;  %v2838_v16 = vmul.f32 %v2710_v50, %v7226_v49  ;;  %v3170_v62 = vld [vmem:[%s8110_s3 + $0x10] sm:$0xff] }
 0x455   : > { %3496 = vmatpush.msra.mxu2 %v2847_v54  ;;  %3525 = vmatpush.msra.mxu3 %v2911_v53  ;;  %v2771_v52 = vunpack.c.h.bf16 %v2653_v2  ;;  %v2702_v47 = vunpack.c.l.bf16 %v2619_v18  ;;  %v2902_v45 = vmul.f32 %v2774_v36, %v7226_v49  ;;  %v2839_v20 = vmul.f32 %v2711_v9, %v7249_v37  ;;  %v3172_v9 = vld [vmem:[%s8110_s3 + $0x20] sm:$0xff] }
 0x456   : > { %3467 = vmatpush.msra.mxu1 %v2910_v14  ;;  %3439 = vmatpush.msra.mxu0 %v2842_v46  ;;  %v2766_v61 = vunpack.c.l.bf16 %v2651_v42  ;;  %v2703_v13 = vunpack.c.h.bf16 %v2619_v18  ;;  %v2903_v30 = vmul.f32 %v2775_v56, %v7249_v37  ;;  %v2834_v33 = vmul.f32 %v2706_v32, %v7205_v11 }
 0x457   : > { %3497 = vmatpush.msra.mxu2 %v2843_v27  ;;  %3526 = vmatpush.msra.mxu3 %v2907_v21  ;;  %v2767_v51 = vunpack.c.h.bf16 %v2651_v42  ;;  %v2698_v22 = vunpack.c.l.bf16 %v2617_v15  ;;  %v2898_v31 = vmul.f32 %v2770_v44, %v7205_v11  ;;  %v2835_v35 = vmul.f32 %v2707_v3, %v7208_v59  ;;  %v3174_v27 = vld [vmem:[%s8110_s3 + $0x30] sm:$0xff] }
 0x458   : > { %3468 = vmatpush.msra.mxu1 %v2906_v38  ;;  %3440 = vmatpush.msra.mxu0 %v2838_v16  ;;  %v2762_v26 = vunpack.c.l.bf16 %v2649_v24  ;;  %v2699_v49 = vunpack.c.h.bf16 %v2617_v15  ;;  %v2899_v48 = vmul.f32 %v2771_v52, %v7208_v59  ;;  %v2830_v5 = vmul.f32 %v2702_v47, %v7177_v57 }
 0x459   : > { %3498 = vmatpush.msra.mxu2 %v2839_v20  ;;  %3527 = vmatpush.msra.mxu3 %v2903_v30  ;;  %v2763_v25 = vunpack.c.h.bf16 %v2649_v24  ;;  %v2894_v37 = vmul.f32 %v2766_v61, %v7177_v57  ;;  %v2831_v7 = vmul.f32 %v2703_v13, %v7202_v1  ;;  %v2895_v11 = vmul.f32 %v2767_v51, %v7202_v1 }
 0x45a   : > { %3469 = vmatpush.msra.mxu1 %v2902_v45  ;;  %3441 = vmatpush.msra.mxu0 %v2834_v33  ;;  %v2826_v28 = vmul.f32 %v2698_v22, %v7110_v19  ;;  %v2890_v60 = vmul.f32 %v2762_v26, %v7110_v19  ;;  %v2827_v59 = vmul.f32 %v2699_v49, %v7113_v6  ;;  %v3168_v19 = vld [vmem:[%s8110_s3] sm:$0xff]  ;;  %v3169_v45 = vld [vmem:[%s8110_s3 + $0x8] sm:$0xff] }
 0x45b   : > { %3499 = vmatpush.msra.mxu2 %v2835_v35  ;;  %3528 = vmatpush.msra.mxu3 %v2899_v48  ;;  %v2891_v41 = vmul.f32 %v2763_v25, %v7113_v6  ;;  %v3171_v35 = vld [vmem:[%s8110_s3 + $0x18] sm:$0xff] }
 0x45c   : > { %3470 = vmatpush.msra.mxu1 %v2898_v31  ;;  %3442 = vmatpush.msra.mxu0 %v2830_v5 }
 0x45d   : > { %3500 = vmatpush.msra.mxu2 %v2831_v7  ;;  %3529 = vmatpush.msra.mxu3 %v2895_v11 }
 0x45e   : > { %3471 = vmatpush.msra.mxu1 %v2894_v37  ;;  %3443 = vmatpush.msra.mxu0 %v2826_v28  ;;  %v3173_v28 = vld [vmem:[%s8110_s3 + $0x28] sm:$0xff] }
 0x45f   : > { %3501 = vmatpush.msra.mxu2 %v2827_v59  ;;  %3530 = vmatpush.msra.mxu3 %v2891_v41 }
 0x460   : > { %3472 = vmatpush.msra.mxu1 %v2890_v60 }
 0x462   : > { %v3025_v57 = vpop.f32.mrf.mxu0 }
 0x463   : > { %v3082_v29 = vpop.f32.mrf.mxu3 }
 0x46a   : > { %v3027_v43 = vpop.f32.mrf.mxu0 }
 0x46b   : > { %v3063_v4 = vpop.f32.mrf.mxu2  ;;  %v3084_v6 = vpop.f32.mrf.mxu3 }
 0x473   : > { %v3065_v58 = vpop.f32.mrf.mxu2 }
 0x47c   : > { %v3044_v10 = vpop.f32.mrf.mxu1 }
 0x47d   : > { %v3045_v1 = vadd.f32 %v3044_v10, %v3025_v57 }
 0x47f   : > { %v3064_v40 = vadd.f32 %v3063_v4, %v3045_v1 }
 0x481   : > { %v3083_v23 = vadd.f32 %v3082_v29, %v3064_v40 }
 0x483   : > { %v3176_v55 = vmul.f32 %v3168_v19, %v3083_v23 }
 0x484   : > { %v3046_v17 = vpop.f32.mrf.mxu1 }
 0x485   : > { %v3047_v0 = vadd.f32 %v3046_v17, %v3027_v43  ;;  %3328 = vmatmul.f32.vlgmr.msrb.gmra.mxu0 %v3176_v55  ;;  %3386 = vmatmul.f32.vlgmr.msrb.gmra.mxu2 %v3176_v55  ;;  %v3175_v43 = vld [vmem:[%s8110_s3 + $0x38] sm:$0xff] }
 0x487   : > { %v3066_v8 = vadd.f32 %v3065_v58, %v3047_v0 }
 0x488   : > { %v3030_v34 = vpop.f32.mrf.mxu0 }
 0x489   : > { %v3085_v12 = vadd.f32 %v3084_v6, %v3066_v8 }
 0x48b   : > { %v3178_v63 = vmul.f32 %v3170_v62, %v3085_v12 }
 0x48d   : > { %3331 = vmatmul.f32.gmra.mxu0 %v3178_v63  ;;  %3389 = vmatmul.f32.gmra.mxu2 %v3178_v63 }
 0x48f   : > { %v3049_v39 = vpop.f32.mrf.mxu1  ;;  %v3068_v2 = vpop.f32.mrf.mxu2 }
 0x490   : > { %v3050_v50 = vadd.f32 %v3049_v39, %v3030_v34  ;;  %v3087_v14 = vpop.f32.mrf.mxu3  ;;  %v3032_v36 = vpop.f32.mrf.mxu0 }
 0x492   : > { %v3069_v54 = vadd.f32 %v3068_v2, %v3050_v50 }
 0x494   : > { %v3088_v18 = vadd.f32 %v3087_v14, %v3069_v54 }
 0x496   : > { %v3180_v53 = vmul.f32 %v3172_v9, %v3088_v18 }
 0x497   : > { %v3051_v46 = vpop.f32.mrf.mxu1  ;;  %v3070_v32 = vpop.f32.mrf.mxu2 }
 0x498   : > { %v3052_v56 = vadd.f32 %v3051_v46, %v3032_v36  ;;  %3334 = vmatmul.f32.gmra.mxu0 %v3180_v53  ;;  %3392 = vmatmul.f32.gmra.mxu2 %v3180_v53  ;;  %v3089_v42 = vpop.f32.mrf.mxu3 }
 0x499   : > { %v3101_v44 = vpop.f32.mrf.mxu0 }
 0x49a   : > { %v3071_v38 = vadd.f32 %v3070_v32, %v3052_v56 }
 0x49c   : > { %v3090_v3 = vadd.f32 %v3089_v42, %v3071_v38 }
 0x49e   : > { %v3182_v15 = vmul.f32 %v3174_v27, %v3090_v3 }
 0x49f   : > { %v3139_v16 = vpop.f32.mrf.mxu2 }
 0x4a0   : > { %v3120_v21 = vpop.f32.mrf.mxu1  ;;  %3337 = vmatmul.f32.gmra.mxu0 %v3182_v15  ;;  %3395 = vmatmul.f32.gmra.mxu2 %v3182_v15  ;;  %v3158_v47 = vpop.f32.mrf.mxu3 }
 0x4a1   : > { %v3121_v52 = vadd.f32 %v3120_v21, %v3101_v44  ;;  %v3103_v61 = vpop.f32.mrf.mxu0 }
 0x4a3   : > { %v3140_v24 = vadd.f32 %v3139_v16, %v3121_v52 }
 0x4a5   : > { %v3159_v20 = vadd.f32 %v3158_v47, %v3140_v24 }
 0x4a7   : > { %v3177_v13 = vmul.f32 %v3169_v45, %v3159_v20  ;;  %v3141_v33 = vpop.f32.mrf.mxu2 }
 0x4a8   : > { %v3122_v30 = vpop.f32.mrf.mxu1  ;;  %3444 = vmatmul.f32.vlgmr.msra.gmra.mxu0 %v3176_v55  ;;  %3502 = vmatmul.f32.vlgmr.msra.gmra.mxu2 %v3176_v55  ;;  %v3160_v22 = vpop.f32.mrf.mxu3 }
 0x4a9   : > { %v3123_v51 = vadd.f32 %v3122_v30, %v3103_v61  ;;  %3357 = vmatmul.f32.vlgmr.msrb.gmra.mxu1 %v3177_v13  ;;  %3415 = vmatmul.f32.vlgmr.msrb.gmra.mxu3 %v3177_v13 }
 0x4aa   : > { %v3106_v48 = vpop.f32.mrf.mxu0 }
 0x4ab   : > { %v3142_v31 = vadd.f32 %v3141_v33, %v3123_v51 }
 0x4ad   : > { %v3161_v26 = vadd.f32 %v3160_v22, %v3142_v31 }
 0x4af   : > { %v3179_v49 = vmul.f32 %v3171_v35, %v3161_v26 }
 0x4b0   : > { %3447 = vmatmul.f32.gmra.mxu0 %v3178_v63  ;;  %3505 = vmatmul.f32.gmra.mxu2 %v3178_v63 }
 0x4b1   : > { %v3144_v5 = vpop.f32.mrf.mxu2  ;;  %3360 = vmatmul.f32.gmra.mxu1 %v3179_v49  ;;  %3418 = vmatmul.f32.gmra.mxu3 %v3179_v49 }
 0x4b2   : > { %v3125_v25 = vpop.f32.mrf.mxu1  ;;  %v3163_v7 = vpop.f32.mrf.mxu3 }
 0x4b3   : > { %v3126_v37 = vadd.f32 %v3125_v25, %v3106_v48  ;;  %v3108_v41 = vpop.f32.mrf.mxu0 }
 0x4b5   : > { %v3145_v11 = vadd.f32 %v3144_v5, %v3126_v37 }
 0x4b7   : > { %v3164_v60 = vadd.f32 %v3163_v7, %v3145_v11 }
 0x4b8   : > { %3450 = vmatmul.f32.gmra.mxu0 %v3180_v53  ;;  %3508 = vmatmul.f32.gmra.mxu2 %v3180_v53 }
 0x4b9   : > { %v3181_v59 = vmul.f32 %v3173_v28, %v3164_v60  ;;  %v3146_v4 = vpop.f32.mrf.mxu2 }
 0x4ba   : > { %v3127_v57 = vpop.f32.mrf.mxu1  ;;  %v3165_v1 = vpop.f32.mrf.mxu3 }
 0x4bb   : > { %v3128_v29 = vadd.f32 %v3127_v57, %v3108_v41  ;;  %3363 = vmatmul.f32.gmra.mxu1 %v3181_v59  ;;  %3421 = vmatmul.f32.gmra.mxu3 %v3181_v59 }
 0x4bd   : > { %v3147_v10 = vadd.f32 %v3146_v4, %v3128_v29 }
 0x4bf   : > { %v3166_v40 = vadd.f32 %v3165_v1, %v3147_v10 }
 0x4c0   : > { %3453 = vmatmul.f32.gmra.mxu0 %v3182_v15  ;;  %3511 = vmatmul.f32.gmra.mxu2 %v3182_v15 }
 0x4c1   : > { %v3183_v19 = vmul.f32 %v3175_v43, %v3166_v40 }
 0x4c3   : > { %3366 = vmatmul.f32.gmra.mxu1 %v3183_v19  ;;  %3424 = vmatmul.f32.gmra.mxu3 %v3183_v19 }
 0x4cb   : > { %3473 = vmatmul.f32.vlgmr.msra.gmra.mxu1 %v3177_v13  ;;  %3531 = vmatmul.f32.vlgmr.msra.gmra.mxu3 %v3177_v13 }
 0x4d3   : > { %3476 = vmatmul.f32.gmra.mxu1 %v3179_v49  ;;  %3534 = vmatmul.f32.gmra.mxu3 %v3179_v49 }
 0x4db   : > { %3479 = vmatmul.f32.gmra.mxu1 %v3181_v59  ;;  %3537 = vmatmul.f32.gmra.mxu3 %v3181_v59 }
 0x4e3   : > { %3482 = vmatmul.f32.gmra.mxu1 %v3183_v19  ;;  %3540 = vmatmul.f32.gmra.mxu3 %v3183_v19 }
 0x502   : > { %v3329_v23 = vpop.f32.mrf.mxu0 }
 0x508   : > { %v3387_v55 = vpop.f32.mrf.mxu2 }
 0x50a   : > { %v3332_v17 = vpop.f32.mrf.mxu0 }
 0x510   : > { %v3390_v0 = vpop.f32.mrf.mxu2 }
 0x515   : > { %v3335_v8 = vpop.f32.mrf.mxu0 }
 0x51b   : > { %v3393_v62 = vpop.f32.mrf.mxu2 }
 0x51d   : > { %v3338_v63 = vpop.f32.mrf.mxu0 }
 0x523   : > { %v3396_v9 = vpop.f32.mrf.mxu2 }
 0x525   : > { %v3445_v21 = vpop.f32.mrf.mxu0 }
 0x526   : > { %v3358_v58 = vpop.f32.mrf.mxu1 }
 0x527   : > { %v3359_v14 = vadd.f32 %v3358_v58, %v3329_v23 }
 0x529   : > { %v3544_v18 = vmax.f32 %v3359_v14, 0.0 }
 0x52b   : > { %v3560_v15 = vmin.f32 %v3544_v18, 4.0  ;;  %v3503_v26 = vpop.f32.mrf.mxu2 }
 0x52c   : > { %v3416_v6 = vpop.f32.mrf.mxu3 }
 0x52d   : > { %v3417_v42 = vadd.f32 %v3416_v6, %v3387_v55  ;;  %v3576_v13 = vadd.f32 0.5, %v3560_v15  ;;  %v3448_v57 = vpop.f32.mrf.mxu0 }
 0x52e   : > { %v3361_v34 = vpop.f32.mrf.mxu1 }
 0x52f   : > { %v3362_v50 = vadd.f32 %v3361_v34, %v3332_v17  ;;  %v3545_v24 = vmax.f32 %v3417_v42, 0.0  ;;  %v3592_v7 = vfloor.f32 %v3576_v13  ;;  %v7468_v34 = vld [vmem:[%s8113_s6] sm:$0xff] }
 0x531   : > { %v3548_v36 = vmax.f32 %v3362_v50, 0.0  ;;  %v3561_v35 = vmin.f32 %v3545_v24, 4.0  ;;  %v3608_v40 = vmul.f32 0.5, %v3592_v7 }
 0x533   : > { %v3564_v27 = vmin.f32 %v3548_v36, 4.0  ;;  %v3577_v41 = vadd.f32 0.5, %v3561_v35 }
 0x534   : > { %v3419_v12 = vpop.f32.mrf.mxu3 }
 0x535   : > { %v3420_v46 = vadd.f32 %v3419_v12, %v3390_v0  ;;  %v3580_v45 = vadd.f32 0.5, %v3564_v27  ;;  %v3593_v17 = vfloor.f32 %v3577_v41 }
 0x537   : > { %v3549_v16 = vmax.f32 %v3420_v46, 0.0  ;;  %v3596_v48 = vfloor.f32 %v3580_v45 }
 0x538   : > { %v3364_v39 = vpop.f32.mrf.mxu1 }
 0x539   : > { %v3365_v2 = vadd.f32 %v3364_v39, %v3335_v8  ;;  %v3565_v33 = vmin.f32 %v3549_v16, 4.0  ;;  %v3612_v4 = vmul.f32 0.5, %v3596_v48  ;;  %v3506_v8 = vpop.f32.mrf.mxu2  ;;  %v3451_v39 = vpop.f32.mrf.mxu0 }
 0x53b   : > { %v3552_v54 = vmax.f32 %v3365_v2, 0.0  ;;  %v3581_v11 = vadd.f32 0.5, %v3565_v33  ;;  %v3624_v6 = vpack.c.bf16 %v3612_v4, %v3608_v40 }
 0x53d   : > { %v3568_v56 = vmin.f32 %v3552_v54, 4.0  ;;  %v3597_v19 = vfloor.f32 %v3581_v11 }
 0x53e   : > { %v3422_v53 = vpop.f32.mrf.mxu3 }
 0x53f   : > { %v3423_v32 = vadd.f32 %v3422_v53, %v3393_v62  ;;  %v3584_v52 = vadd.f32 0.5, %v3568_v56  ;;  %v3613_v62 = vmul.f32 0.5, %v3597_v19 }
 0x540   : > { %v3367_v38 = vpop.f32.mrf.mxu1 }
 0x541   : > { %v3553_v44 = vmax.f32 %v3423_v32, 0.0  ;;  %v3368_v3 = vadd.f32 %v3367_v38, %v3338_v63  ;;  %v3600_v51 = vfloor.f32 %v3584_v52  ;;  %v3609_v63 = vmul.f32 0.5, %v3593_v17  ;;  %v3509_v53 = vpop.f32.mrf.mxu2 }
 0x543   : > { %v3556_v47 = vmax.f32 %v3368_v3, 0.0  ;;  %v3569_v20 = vmin.f32 %v3553_v44, 4.0  ;;  %v3616_v28 = vmul.f32 0.5, %v3600_v51  ;;  %v3625_v2 = vpack.c.bf16 %v3613_v62, %v3609_v63  ;;  %v3454_v44 = vpop.f32.mrf.mxu0 }
 0x545   : > { %v3572_v61 = vmin.f32 %v3556_v47, 4.0  ;;  %v3585_v5 = vadd.f32 0.5, %v3569_v20 }
 0x546   : > { %v3425_v30 = vpop.f32.mrf.mxu3 }
 0x547   : > { %v3588_v22 = vadd.f32 0.5, %v3572_v61  ;;  %v3426_v31 = vadd.f32 %v3425_v30, %v3396_v9  ;;  %v3601_v29 = vfloor.f32 %v3585_v5 }
 0x548   : > { %v3474_v49 = vpop.f32.mrf.mxu1 }
 0x549   : > { %v3604_v25 = vfloor.f32 %v3588_v22  ;;  %v3557_v37 = vmax.f32 %v3426_v31, 0.0  ;;  %v3617_v58 = vmul.f32 0.5, %v3601_v29  ;;  %v3475_v9 = vadd.f32 %v3474_v49, %v3445_v21  ;;  %v4975_v21 = vld [vmem:[%s8113_s6 + $0x8] sm:$0xff]  ;;  %v3512_v22 = vpop.f32.mrf.mxu2 }
 0x54b   : > { %v3620_v60 = vmul.f32 0.5, %v3604_v25  ;;  %v3573_v59 = vmin.f32 %v3557_v37, 4.0  ;;  %v3546_v56 = vmax.f32 %v3475_v9, 0.0  ;;  %v7489_v9 = vpop.permute.xlu2 %3642 }
 0x54d   : > { %v3628_v10 = vpack.c.bf16 %v3620_v60, %v3616_v28  ;;  %v3589_v1 = vadd.f32 0.5, %v3573_v59  ;;  %v3562_v24 = vmin.f32 %v3546_v56, 4.0  ;;  %v5046_v56 = vld [vmem:[%s5324_s27 + $0x20] sm:$0xff] }
 0x54e   : > { %v3532_v43 = vpop.f32.mrf.mxu3 }
 0x54f   : > { %v3605_v23 = vfloor.f32 %v3589_v1  ;;  %3682 = vmatpush.bf16.msrb.mxu0 %v3628_v10  ;;  %v3533_v3 = vadd.f32 %v3532_v43, %v3503_v26  ;;  %v3578_v31 = vadd.f32 0.5, %v3562_v24 }
 0x550   : > { %v3477_v55 = vpop.f32.mrf.mxu1 }
 0x551   : > { %v3621_v0 = vmul.f32 0.5, %v3605_v23  ;;  %v3478_v54 = vadd.f32 %v3477_v55, %v3448_v57  ;;  %v3547_v13 = vmax.f32 %v3533_v3, 0.0  ;;  %v3594_v60 = vfloor.f32 %v3578_v31  ;;  %v5051_v31 = vld [vmem:[%s5324_s27 + $0x8] sm:$0xff] }
 0x553   : > { %v3629_v12 = vpack.c.bf16 %v3621_v0, %v3617_v58  ;;  %3683 = vmatpush.bf16.msrb.mxu0 %v3624_v6  ;;  %v3550_v46 = vmax.f32 %v3478_v54, 0.0  ;;  %v3563_v25 = vmin.f32 %v3547_v13, 4.0  ;;  %v3610_v19 = vmul.f32 0.5, %v3594_v60 }
 0x555   : > { %3701 = vmatpush.bf16.msrb.mxu1 %v3629_v12  ;;  %v3566_v16 = vmin.f32 %v3550_v46, 4.0  ;;  %v3579_v29 = vadd.f32 0.5, %v3563_v25 }
 0x556   : > { %v3535_v50 = vpop.f32.mrf.mxu3  ;;  %4882 = vmatmul.msk.bf16.vlgmr.msrb.gmra.mxu0 %vm655_vm0, %v7468_v34 }
 0x557   : > { %v3536_v42 = vadd.f32 %v3535_v50, %v3506_v8  ;;  %v3582_v30 = vadd.f32 0.5, %v3566_v16  ;;  %v3595_v17 = vfloor.f32 %v3579_v29  ;;  %v7485_v50 = vpop.permute.xlu1 %3652 }
 0x558   : > { %v3480_v14 = vpop.f32.mrf.mxu1 }
 0x559   : > { %v3481_v36 = vadd.f32 %v3480_v14, %v3451_v39  ;;  %3702 = vmatpush.bf16.msrb.mxu1 %v3625_v2  ;;  %v3551_v45 = vmax.f32 %v3536_v42, 0.0  ;;  %v3598_v37 = vfloor.f32 %v3582_v30  ;;  %v3611_v12 = vmul.f32 0.5, %v3595_v17  ;;  %v5047_v42 = vld [vmem:[%s5324_s27 + $0x40] sm:$0xff] }
 0x55b   : > { %v3554_v18 = vmax.f32 %v3481_v36, 0.0  ;;  %v3567_v26 = vmin.f32 %v3551_v45, 4.0  ;;  %v3614_v10 = vmul.f32 0.5, %v3598_v37 }
 0x55c   : > { %4884 = vmatmul.msk.bf16.vlgmr.msrb.gmra.mxu1 %vm655_vm0, %v7468_v34 }
 0x55d   : > { %v3570_v38 = vmin.f32 %v3554_v18, 4.0  ;;  %v3583_v59 = vadd.f32 0.5, %v3567_v26  ;;  %v3626_v6 = vpack.c.bf16 %v3614_v10, %v3610_v19 }
 0x55e   : > { %v3538_v32 = vpop.f32.mrf.mxu3 }
 0x55f   : > { %v3539_v27 = vadd.f32 %v3538_v32, %v3509_v53  ;;  %v3586_v20 = vadd.f32 0.5, %v3570_v38  ;;  %v3599_v23 = vfloor.f32 %v3583_v59  ;;  %v7487_v54 = vpop.permute.xlu1 %3647 }
 0x560   : > { %v3483_v15 = vpop.f32.mrf.mxu1 }
 0x561   : > { %v3555_v52 = vmax.f32 %v3539_v27, 0.0  ;;  %v3484_v47 = vadd.f32 %v3483_v15, %v3454_v44  ;;  %v3602_v49 = vfloor.f32 %v3586_v20  ;;  %v3615_v8 = vmul.f32 0.5, %v3599_v23  ;;  %v5048_v27 = vld [vmem:[%s5324_s27] sm:$0xff] }
 0x563   : > { %v3558_v61 = vmax.f32 %v3484_v47, 0.0  ;;  %v3571_v33 = vmin.f32 %v3555_v52, 4.0  ;;  %v3618_v41 = vmul.f32 0.5, %v3602_v49  ;;  %v3627_v63 = vpack.c.bf16 %v3615_v8, %v3611_v12 }
 0x565   : > { %v3574_v51 = vmin.f32 %v3558_v61, 4.0  ;;  %v3587_v7 = vadd.f32 0.5, %v3571_v33  ;;  %v5049_v61 = vld [vmem:[%s5324_s27 + $0x28] sm:$0xff] }
 0x566   : > { %v3541_v35 = vpop.f32.mrf.mxu3  ;;  %4883 = vmatmul.msk.bf16.gmra.mxu0 %vm655_vm0, %v4975_v21  ;;  %v5050_v33 = vld [vmem:[%s5324_s27 + $0x48] sm:$0xff] }
 0x567   : > { %v3590_v48 = vadd.f32 0.5, %v3574_v51  ;;  %v3542_v5 = vadd.f32 %v3541_v35, %v3512_v22  ;;  %v3603_v1 = vfloor.f32 %v3587_v7 }
 0x569   : > { %v3606_v11 = vfloor.f32 %v3590_v48  ;;  %v3559_v28 = vmax.f32 %v3542_v5, 0.0  ;;  %v3619_v58 = vmul.f32 0.5, %v3603_v1  ;;  %v5052_v48 = vld [vmem:[%s5324_s27 + $0x60] sm:$0xff] }
 0x56b   : > { %v3622_v57 = vmul.f32 0.5, %v3606_v11  ;;  %v3575_v4 = vmin.f32 %v3559_v28, 4.0 }
 0x56c   : > { %4885 = vmatmul.msk.bf16.gmra.mxu1 %vm655_vm0, %v4975_v21 }
 0x56d   : > { %v3630_v43 = vpack.c.bf16 %v3622_v57, %v3618_v41  ;;  %v3591_v40 = vadd.f32 0.5, %v3575_v4 }
 0x56f   : > { %v3607_v55 = vfloor.f32 %v3591_v40  ;;  %3720 = vmatpush.bf16.msrb.mxu2 %v3630_v43  ;;  %v5053_v40 = vld [vmem:[%s5324_s27 + $0x68] sm:$0xff] }
 0x571   : > { %v3623_v0 = vmul.f32 0.5, %v3607_v55 }
 0x573   : > { %v3631_v62 = vpack.c.bf16 %v3623_v0, %v3619_v58  ;;  %3721 = vmatpush.bf16.msrb.mxu2 %v3626_v6 }
 0x575   : > { %3739 = vmatpush.bf16.msrb.mxu3 %v3631_v62 }
 0x576   : > { %4886 = vmatmul.msk.bf16.vlgmr.msrb.gmra.mxu2 %vm655_vm0, %v7468_v34 }
 0x579   : > { %3740 = vmatpush.bf16.msrb.mxu3 %v3627_v63 }
 0x57c   : > { %4888 = vmatmul.msk.bf16.vlgmr.msrb.gmra.mxu3 %vm655_vm0, %v7468_v34 }
 0x586   : > { %4887 = vmatmul.msk.bf16.gmra.mxu2 %vm655_vm0, %v4975_v21 }
 0x58c   : > { %4889 = vmatmul.msk.bf16.gmra.mxu3 %vm655_vm0, %v4975_v21  ;;  %v7508_v21 = vpop.permute.xlu0 %3657 }
 0x5d3   : > { %v3685_v39 = vpop.f32.mrf.mxu0 }
 0x5d4   : > { %v3686_v34 = vadd.f32 %v3685_v39, %v7489_v9 }
 0x5d6   : > { %v7501_v44 = vadd.f32 %v5048_v27, %v3686_v34 }
 0x5d8   : > { %8460 = vst [vmem:[#allocation27_spill] sm:$0xff] %v7501_v44  ;;  %v3768_v45 = vmax.f32 %v7501_v44, 0.0 }
 0x5d9   : > { %v3704_v2 = vpop.f32.mrf.mxu1 }
 0x5da   : > { %v3705_v16 = vadd.f32 %v3704_v2, %v7489_v9  ;;  %v3784_v25 = vmin.f32 %v3768_v45, 4.0 }
 0x5db   : > { %v3687_v14 = vpop.f32.mrf.mxu0 }
 0x5dc   : > { %v3688_v18 = vadd.f32 %v3687_v14, %v7487_v54  ;;  %v7519_v35 = vadd.f32 %v5051_v31, %v3705_v16  ;;  %v3800_v29 = vadd.f32 0.5, %v3784_v25  ;;  %v5055_v25 = vld [vmem:[%s5324_s27 + $0x50] sm:$0xff] }
 0x5de   : > { %v7495_v32 = vadd.f32 %v5046_v56, %v3688_v18  ;;  %8463 = vst [vmem:[#allocation31_spill] sm:$0xff] %v7519_v35  ;;  %v3769_v28 = vmax.f32 %v7519_v35, 0.0  ;;  %v3816_v6 = vfloor.f32 %v3800_v29 }
 0x5e0   : > { %8458 = vst [vmem:[#allocation16_spill] sm:$0xff] %v7495_v32  ;;  %v3772_v47 = vmax.f32 %v7495_v32, 0.0  ;;  %v3785_v23 = vmin.f32 %v3769_v28, 4.0  ;;  %v3832_v56 = vmul.f32 0.25, %v3816_v6  ;;  %v5060_v6 = vld [vmem:[%s5324_s27 + $0x70] sm:$0xff] }
 0x5e1   : > { %v3706_v36 = vpop.f32.mrf.mxu1 }
 0x5e2   : > { %v3707_v3 = vadd.f32 %v3706_v36, %v7487_v54  ;;  %v3788_v26 = vmin.f32 %v3772_v47, 4.0  ;;  %v3801_v39 = vadd.f32 0.5, %v3785_v23  ;;  %v5058_v23 = vld [vmem:[%s5324_s27 + $0x58] sm:$0xff] }
 0x5e3   : > { %v3690_v53 = vpop.f32.mrf.mxu0 }
 0x5e4   : > { %v3691_v46 = vadd.f32 %v3690_v53, %v7485_v50  ;;  %v7512_v13 = vadd.f32 %v5049_v61, %v3707_v3  ;;  %v3804_v59 = vadd.f32 0.5, %v3788_v26 }
 0x5e6   : > { %v7498_v38 = vadd.f32 %v5047_v42, %v3691_v46  ;;  %8461 = vst [vmem:[#allocation21_spill] sm:$0xff] %v7512_v13  ;;  %v3773_v37 = vmax.f32 %v7512_v13, 0.0  ;;  %v3820_v55 = vfloor.f32 %v3804_v59  ;;  %v3817_v42 = vfloor.f32 %v3801_v39 }
 0x5e8   : > { %8459 = vst [vmem:[#allocation17_spill] sm:$0xff] %v7498_v38  ;;  %v3776_v15 = vmax.f32 %v7498_v38, 0.0  ;;  %v3789_v10 = vmin.f32 %v3773_v37, 4.0  ;;  %v3836_v34 = vmul.f32 0.25, %v3820_v55 }
 0x5e9   : > { %v3709_v52 = vpop.f32.mrf.mxu1 }
 0x5ea   : > { %v3710_v24 = vadd.f32 %v3709_v52, %v7485_v50  ;;  %v3792_v30 = vmin.f32 %v3776_v15, 4.0  ;;  %v3805_v8 = vadd.f32 0.5, %v3789_v10  ;;  %v3848_v15 = vpack.c.bf16 %v3836_v34, %v3832_v56  ;;  %v7536_v52 = vld [vmem:[%s8115_s8] sm:$0xff] }
 0x5eb   : > { %v3692_v20 = vpop.f32.mrf.mxu0 }
 0x5ec   : > { %v7515_v51 = vadd.f32 %v5050_v33, %v3710_v24  ;;  %v3693_v22 = vadd.f32 %v3692_v20, %v7508_v21  ;;  %v3808_v7 = vadd.f32 0.5, %v3792_v30  ;;  %v3821_v53 = vfloor.f32 %v3805_v8 }
 0x5ed   : > { %v3833_v20 = vmul.f32 0.25, %v3817_v42 }
 0x5ee   : > { %8462 = vst [vmem:[#allocation53_spill] sm:$0xff] %v7515_v51  ;;  %v3777_v49 = vmax.f32 %v7515_v51, 0.0  ;;  %v7523_v5 = vadd.f32 %v5052_v48, %v3693_v22  ;;  %v3824_v1 = vfloor.f32 %v3808_v7  ;;  %v3837_v24 = vmul.f32 0.25, %v3821_v53  ;;  %v5056_v7 = vld [vmem:[%s5324_s27 + $0x10] sm:$0xff] }
 0x5f0   : > { %8464 = vst [vmem:[#allocation51_spill] sm:$0xff] %v7523_v5  ;;  %v3780_v11 = vmax.f32 %v7523_v5, 0.0  ;;  %v3793_v41 = vmin.f32 %v3777_v49, 4.0  ;;  %v3840_v62 = vmul.f32 0.25, %v3824_v1  ;;  %v3849_v61 = vpack.c.bf16 %v3837_v24, %v3833_v20  ;;  %v5054_v49 = vld [vmem:[%s5324_s27 + $0x30] sm:$0xff] }
 0x5f1   : > { %v3711_v60 = vpop.f32.mrf.mxu1 }
 0x5f2   : > { %v3796_v57 = vmin.f32 %v3780_v11, 4.0  ;;  %v3712_v4 = vadd.f32 %v3711_v60, %v7508_v21  ;;  %v3809_v17 = vadd.f32 0.5, %v3793_v41 }
 0x5f4   : > { %v3812_v43 = vadd.f32 0.5, %v3796_v57  ;;  %v7530_v19 = vadd.f32 %v5053_v40, %v3712_v4  ;;  %v3825_v14 = vfloor.f32 %v3809_v17  ;;  %v7560_v57 = vld [vmem:[%s8115_s8 + $0x8] sm:$0xff]  ;;  %v5059_v17 = vld [vmem:[%s5324_s27 + $0x18] sm:$0xff] }
 0x5f6   : > { %8465 = vst [vmem:[#allocation50_spill] sm:$0xff] %v7530_v19  ;;  %v3828_v58 = vfloor.f32 %v3812_v43  ;;  %v3781_v0 = vmax.f32 %v7530_v19, 0.0  ;;  %v3841_v27 = vmul.f32 0.25, %v3825_v14  ;;  %v5057_v43 = vld [vmem:[%s5324_s27 + $0x38] sm:$0xff] }
 0x5f8   : > { %v3844_v12 = vmul.f32 0.25, %v3828_v58  ;;  %v3797_v63 = vmin.f32 %v3781_v0, 4.0 }
 0x5f9   : > { %v3723_v2 = vpop.f32.mrf.mxu2 }
 0x5fa   : > { %v3813_v36 = vadd.f32 0.5, %v3797_v63  ;;  %v3852_v18 = vpack.c.bf16 %v3844_v12, %v3840_v62  ;;  %v3724_v22 = vadd.f32 %v3723_v2, %v7489_v9 }
 0x5fc   : > { %v3829_v46 = vfloor.f32 %v3813_v36  ;;  %4038 = vmatpush.bf16.msra.mxu0 %v3852_v18  ;;  %v7552_v11 = vadd.f32 %v5056_v7, %v3724_v22 }
 0x5fe   : > { %v3845_v3 = vmul.f32 0.25, %v3829_v46  ;;  %8468 = vst [vmem:[#allocation60_spill] sm:$0xff] %v7552_v11  ;;  %v3770_v10 = vmax.f32 %v7552_v11, 0.0 }
 0x5ff   : > { %v3742_v16 = vpop.f32.mrf.mxu3 }
 0x600   : > { %4039 = vmatpush.bf16.msra.mxu0 %v3848_v15  ;;  %v3853_v47 = vpack.c.bf16 %v3845_v3, %v3841_v27  ;;  %v3743_v59 = vadd.f32 %v3742_v16, %v7489_v9  ;;  %v3786_v62 = vmin.f32 %v3770_v10, 4.0  ;;  %v5061_v3 = vld [vmem:[%s5324_s27 + $0x78] sm:$0xff] }
 0x601   : > { %v3725_v45 = vpop.f32.mrf.mxu2 }
 0x602   : > { %4087 = vmatpush.bf16.msra.mxu1 %v3853_v47  ;;  %v3726_v33 = vadd.f32 %v3725_v45, %v7487_v54  ;;  %v7573_v58 = vadd.f32 %v5059_v17, %v3743_v59  ;;  %v3802_v46 = vadd.f32 0.5, %v3786_v62  ;;  %v4979_v17 = vld [vmem:[%s8115_s8 + $0x18] sm:$0xff] }
 0x603   : > { %4922 = vmatmul.msk.bf16.vlgmr.msra.gmra.mxu0 %vm655_vm0, %v7536_v52 }
 0x604   : > { %v7546_v48 = vadd.f32 %v5054_v49, %v3726_v33  ;;  %8471 = vst [vmem:[#allocation15_spill] sm:$0xff] %v7573_v58  ;;  %v3771_v2 = vmax.f32 %v7573_v58, 0.0 }
 0x606   : > { %4088 = vmatpush.bf16.msra.mxu1 %v3849_v61  ;;  %8466 = vst [vmem:[#allocation30_spill] sm:$0xff] %v7546_v48  ;;  %v3774_v4 = vmax.f32 %v7546_v48, 0.0  ;;  %v3787_v16 = vmin.f32 %v3771_v2, 4.0  ;;  %v3818_v61 = vfloor.f32 %v3802_v46 }
 0x607   : > { %v3744_v30 = vpop.f32.mrf.mxu3 }
 0x608   : > { %v3745_v28 = vadd.f32 %v3744_v30, %v7487_v54  ;;  %v3790_v0 = vmin.f32 %v3774_v4, 4.0 }
 0x609   : > { %v3728_v31 = vpop.f32.mrf.mxu2  ;;  %4930 = vmatmul.msk.bf16.vlgmr.msra.gmra.mxu1 %vm655_vm0, %v7536_v52 }
 0x60a   : > { %v3729_v26 = vadd.f32 %v3728_v31, %v7485_v50  ;;  %v7566_v54 = vadd.f32 %v5057_v43, %v3745_v28  ;;  %v3806_v36 = vadd.f32 0.5, %v3790_v0  ;;  %v3803_v31 = vadd.f32 0.5, %v3787_v16  ;;  %v4980_v0 = vld [vmem:[%s8115_s8 + $0x20] sm:$0xff] }
 0x60c   : > { %v7549_v37 = vadd.f32 %v5055_v25, %v3729_v26  ;;  %8469 = vst [vmem:[#allocation59_spill] sm:$0xff] %v7566_v54  ;;  %v3775_v12 = vmax.f32 %v7566_v54, 0.0  ;;  %v3822_v47 = vfloor.f32 %v3806_v36  ;;  %v4978_v26 = vld [vmem:[%s8115_s8 + $0x10] sm:$0xff]  ;;  %v3819_v4 = vfloor.f32 %v3803_v31 }
 0x60e   : > { %8467 = vst [vmem:[#allocation35_spill] sm:$0xff] %v7549_v37  ;;  %v3778_v60 = vmax.f32 %v7549_v37, 0.0  ;;  %v3791_v56 = vmin.f32 %v3775_v12, 4.0  ;;  %v3838_v28 = vmul.f32 0.25, %v3822_v47  ;;  %v7640_v12 = vpop.permute.xlu1 %3950 }
 0x60f   : > { %v3747_v41 = vpop.f32.mrf.mxu3 }
 0x610   : > { %v3748_v29 = vadd.f32 %v3747_v41, %v7485_v50  ;;  %v3794_v40 = vmin.f32 %v3778_v60, 4.0  ;;  %v3807_v30 = vadd.f32 0.5, %v3791_v56  ;;  %v3834_v41 = vmul.f32 0.25, %v3818_v61 }
 0x611   : > { %v3730_v1 = vpop.f32.mrf.mxu2 }
 0x612   : > { %v7569_v9 = vadd.f32 %v5058_v23, %v3748_v29  ;;  %v3731_v55 = vadd.f32 %v3730_v1, %v7508_v21  ;;  %v3810_v63 = vadd.f32 0.5, %v3794_v40  ;;  %v3823_v60 = vfloor.f32 %v3807_v30 }
 0x613   : > { %4923 = vmatmul.msk.bf16.gmra.mxu0 %vm655_vm0, %v7560_v57  ;;  %v3850_v1 = vpack.c.bf16 %v3838_v28, %v3834_v41  ;;  %v3835_v23 = vmul.f32 0.25, %v3819_v4 }
 0x614   : > { %8470 = vst [vmem:[#allocation14_spill] sm:$0xff] %v7569_v9  ;;  %v3779_v50 = vmax.f32 %v7569_v9, 0.0  ;;  %v7579_v8 = vadd.f32 %v5060_v6, %v3731_v55  ;;  %v3826_v42 = vfloor.f32 %v3810_v63  ;;  %v3839_v40 = vmul.f32 0.25, %v3823_v60  ;;  %v7633_v6 = vpop.permute.xlu0 %3960 }
 0x616   : > { %8472 = vst [vmem:[#allocation26_spill] sm:$0xff] %v7579_v8  ;;  %v3782_v39 = vmax.f32 %v7579_v8, 0.0  ;;  %v3795_v18 = vmin.f32 %v3779_v50, 4.0  ;;  %v3842_v33 = vmul.f32 0.25, %v3826_v42  ;;  %v3851_v55 = vpack.c.bf16 %v3839_v40, %v3835_v23  ;;  %v4983_v50 = vld [vmem:[%s8115_s8 + $0x38] sm:$0xff] }
 0x617   : > { %v3749_v14 = vpop.f32.mrf.mxu3 }
 0x618   : > { %v3798_v34 = vmin.f32 %v3782_v39, 4.0  ;;  %v3750_v53 = vadd.f32 %v3749_v14, %v7508_v21  ;;  %v3811_v24 = vadd.f32 0.5, %v3795_v18  ;;  %v7645_v14 = vpop.permute.xlu1 %3945  ;;  %v7648_v18 = vpop.permute.xlu2 %3965 }
 0x619   : > { %4931 = vmatmul.msk.bf16.gmra.mxu1 %vm655_vm0, %v7560_v57 }
 0x61a   : > { %v3814_v27 = vadd.f32 0.5, %v3798_v34  ;;  %v7588_v15 = vadd.f32 %v5061_v3, %v3750_v53  ;;  %v3827_v49 = vfloor.f32 %v3811_v24 }
 0x61c   : > { %8473 = vst [vmem:[#allocation18_spill] sm:$0xff] %v7588_v15  ;;  %v3830_v45 = vfloor.f32 %v3814_v27  ;;  %v3783_v20 = vmax.f32 %v7588_v15, 0.0  ;;  %v3843_v29 = vmul.f32 0.25, %v3827_v49  ;;  %v7638_v62 = vpop.permute.xlu0 %3955 }
 0x61e   : > { %v3846_v21 = vmul.f32 0.25, %v3830_v45  ;;  %v3799_v22 = vmin.f32 %v3783_v20, 4.0 }
 0x620   : > { %v3815_v25 = vadd.f32 0.5, %v3799_v22  ;;  %v3854_v7 = vpack.c.bf16 %v3846_v21, %v3842_v33  ;;  %v7653_v56 = vpop.permute.xlu1 %3920  ;;  %v7655_v42 = vpop.permute.xlu2 %3940 }
 0x622   : > { %v3831_v59 = vfloor.f32 %v3815_v25  ;;  %4136 = vmatpush.bf16.msra.mxu2 %v3854_v7 }
 0x623   : > { %4924 = vmatmul.msk.bf16.gmra.mxu0 %vm655_vm0, %v4978_v26 }
 0x624   : > { %v3847_v10 = vmul.f32 0.25, %v3831_v59  ;;  %v7643_v39 = vpop.permute.xlu0 %3930 }
 0x626   : > { %4137 = vmatpush.bf16.msra.mxu2 %v3850_v1  ;;  %v3855_v43 = vpack.c.bf16 %v3847_v10, %v3843_v29 }
 0x628   : > { %4185 = vmatpush.bf16.msra.mxu3 %v3855_v43  ;;  %v7660_v47 = vpop.permute.xlu1 %3915  ;;  %v7662_v45 = vpop.permute.xlu2 %3935 }
 0x629   : > { %4932 = vmatmul.msk.bf16.gmra.mxu1 %vm655_vm0, %v4978_v26  ;;  %4938 = vmatmul.msk.bf16.vlgmr.msra.gmra.mxu2 %vm655_vm0, %v7536_v52  ;;  %8474 = vst [vmem:[#allocation46_spill] sm:$0xff] %v7662_v45 }
 0x62c   : > { %4186 = vmatpush.bf16.msra.mxu3 %v3851_v55  ;;  %v7650_v53 = vpop.permute.xlu0 %3925 }
 0x62f   : > { %4946 = vmatmul.msk.bf16.vlgmr.msra.gmra.mxu3 %vm655_vm0, %v7536_v52  ;;  %v4981_v52 = vld [vmem:[%s8115_s8 + $0x28] sm:$0xff] }
 0x630   : > { %v7670_v33 = vpop.permute.xlu1 %3890  ;;  %v7675_v49 = vpop.permute.xlu2 %3910 }
 0x633   : > { %4925 = vmatmul.msk.bf16.gmra.mxu0 %vm655_vm0, %v4979_v17 }
 0x634   : > { %v7657_v16 = vpop.permute.xlu0 %3900 }
 0x639   : > { %4933 = vmatmul.msk.bf16.gmra.mxu1 %vm655_vm0, %v4979_v17  ;;  %4939 = vmatmul.msk.bf16.gmra.mxu2 %vm655_vm0, %v7560_v57 }
 0x63c   : > { %v7667_v61 = vpop.permute.xlu0 %3895 }
 0x63f   : > { %4947 = vmatmul.msk.bf16.gmra.mxu3 %vm655_vm0, %v7560_v57  ;;  %v4982_v57 = vld [vmem:[%s8115_s8 + $0x30] sm:$0xff] }
 0x643   : > { %4926 = vmatmul.msk.bf16.gmra.mxu0 %vm655_vm0, %v4980_v0 }
 0x649   : > { %4934 = vmatmul.msk.bf16.gmra.mxu1 %vm655_vm0, %v4980_v0  ;;  %4940 = vmatmul.msk.bf16.gmra.mxu2 %vm655_vm0, %v4978_v26 }
 0x64f   : > { %4948 = vmatmul.msk.bf16.gmra.mxu3 %vm655_vm0, %v4978_v26 }
 0x653   : > { %4927 = vmatmul.msk.bf16.gmra.mxu0 %vm655_vm0, %v4981_v52 }
 0x659   : > { %4935 = vmatmul.msk.bf16.gmra.mxu1 %vm655_vm0, %v4981_v52  ;;  %4941 = vmatmul.msk.bf16.gmra.mxu2 %vm655_vm0, %v4979_v17 }
 0x65f   : > { %4949 = vmatmul.msk.bf16.gmra.mxu3 %vm655_vm0, %v4979_v17  ;;  %v7685_v17 = vpop.permute.xlu2 %3905 }
 0x663   : > { %4928 = vmatmul.msk.bf16.gmra.mxu0 %vm655_vm0, %v4982_v57 }
 0x669   : > { %4936 = vmatmul.msk.bf16.gmra.mxu1 %vm655_vm0, %v4982_v57  ;;  %4942 = vmatmul.msk.bf16.gmra.mxu2 %vm655_vm0, %v4980_v0 }
 0x66f   : > { %4950 = vmatmul.msk.bf16.gmra.mxu3 %vm655_vm0, %v4980_v0 }
 0x673   : > { %4929 = vmatmul.msk.bf16.gmra.mxu0 %vm655_vm0, %v4983_v50 }
 0x679   : > { %4937 = vmatmul.msk.bf16.gmra.mxu1 %vm655_vm0, %v4983_v50  ;;  %4943 = vmatmul.msk.bf16.gmra.mxu2 %vm655_vm0, %v4981_v52 }
 0x67f   : > { %4951 = vmatmul.msk.bf16.gmra.mxu3 %vm655_vm0, %v4981_v52 }
 0x680   : > { %v4041_v63 = vpop.f32.mrf.mxu0 }
 0x681   : > { %v4042_v21 = vadd.f32 %v4041_v63, %v7670_v33 }
 0x683   : > { %v4228_v25 = vmax.f32 %v4042_v21, 0.0 }
 0x685   : > { %v4292_v41 = vmin.f32 %v4228_v25, 4.0 }
 0x686   : > { %v4090_v2 = vpop.f32.mrf.mxu1 }
 0x687   : > { %v4091_v28 = vadd.f32 %v4090_v2, %v7670_v33  ;;  %v4356_v40 = vadd.f32 0.5, %v4292_v41 }
 0x688   : > { %v4043_v36 = vpop.f32.mrf.mxu0 }
 0x689   : > { %4944 = vmatmul.msk.bf16.gmra.mxu2 %vm655_vm0, %v4982_v57  ;;  %v4044_v30 = vadd.f32 %v4043_v36, %v7667_v61  ;;  %v4229_v10 = vmax.f32 %v4091_v28, 0.0  ;;  %v4420_v63 = vfloor.f32 %v4356_v40 }
 0x68b   : > { %v4232_v31 = vmax.f32 %v4044_v30, 0.0  ;;  %v4293_v0 = vmin.f32 %v4229_v10, 4.0 }
 0x68d   : > { %v4296_v60 = vmin.f32 %v4232_v31, 4.0  ;;  %v4357_v30 = vadd.f32 0.5, %v4293_v0 }
 0x68e   : > { %v4092_v34 = vpop.f32.mrf.mxu1 }
 0x68f   : > { %4952 = vmatmul.msk.bf16.gmra.mxu3 %vm655_vm0, %v4982_v57  ;;  %v4093_v7 = vadd.f32 %v4092_v34, %v7667_v61  ;;  %v4360_v1 = vadd.f32 0.5, %v4296_v60 }
 0x690   : > { %v4046_v46 = vpop.f32.mrf.mxu0 }
 0x691   : > { %v4233_v4 = vmax.f32 %v4093_v7, 0.0  ;;  %v4424_v52 = vfloor.f32 %v4360_v1  ;;  %v4047_v36 = vadd.f32 %v4046_v46, %v7657_v16  ;;  %v7693_v7 = vmul.f32 0.25, %v4420_v63 }
 0x693   : > { %v4297_v23 = vmin.f32 %v4233_v4, 4.0  ;;  %v7691_v21 = vmul.f32 0.25, %v4424_v52  ;;  %8476 = vst [vmem:[#allocation48_spill] sm:$0xff] %v7693_v7  ;;  %v4236_v60 = vmax.f32 %v4047_v36, 0.0 }
 0x695   : > { %v4361_v2 = vadd.f32 0.5, %v4297_v23  ;;  %8475 = vst [vmem:[#allocation45_spill] sm:$0xff] %v7691_v21  ;;  %v4300_v0 = vmin.f32 %v4236_v60, 4.0 }
 0x696   : > { %v4095_v27 = vpop.f32.mrf.mxu1 }
 0x697   : > { %v4425_v28 = vfloor.f32 %v4361_v2  ;;  %v4096_v10 = vadd.f32 %v4095_v27, %v7657_v16 }
 0x698   : > { %v4048_v3 = vpop.f32.mrf.mxu0 }
 0x699   : > { %4945 = vmatmul.msk.bf16.gmra.mxu2 %vm655_vm0, %v4983_v50  ;;  %v4049_v57 = vadd.f32 %v4048_v3, %v7685_v17  ;;  %v4421_v3 = vfloor.f32 %v4357_v30  ;;  %v7703_v23 = vmul.f32 0.25, %v4425_v28  ;;  %v4364_v30 = vadd.f32 0.5, %v4300_v0 }
 0x69b   : > { %v4240_v31 = vmax.f32 %v4049_v57, 0.0  ;;  %8477 = vst [vmem:[#allocation47_spill] sm:$0xff] %v7703_v23  ;;  %v7707_v63 = vmul.f32 0.25, %v4421_v3  ;;  %v4428_v8 = vfloor.f32 %v4364_v30 }
 0x69d   : > { %v4304_v1 = vmin.f32 %v4240_v31, 4.0  ;;  %8478 = vst [vmem:[#allocation36_spill] sm:$0xff] %v7707_v63  ;;  %v7726_v15 = vmul.f32 0.25, %v4428_v8 }
 0x69e   : > { %v4097_v24 = vpop.f32.mrf.mxu1 }
 0x69f   : > { %4953 = vmatmul.msk.bf16.gmra.mxu3 %vm655_vm0, %v4983_v50  ;;  %v4098_v41 = vadd.f32 %v4097_v24, %v7685_v17  ;;  %v4237_v24 = vmax.f32 %v4096_v10, 0.0  ;;  %v4368_v2 = vadd.f32 0.5, %v4304_v1 }
 0x6a0   : > { %v7665_v20 = vpop.f32.mrf.mxu0 }
 0x6a1   : > { %v4241_v52 = vmax.f32 %v4098_v41, 0.0  ;;  %v4301_v40 = vmin.f32 %v4237_v24, 4.0  ;;  %v4432_v28 = vfloor.f32 %v4368_v2  ;;  %v4052_v10 = vadd.f32 %v7665_v20, %v7675_v49 }
 0x6a3   : > { %v4305_v27 = vmin.f32 %v4241_v52, 4.0  ;;  %v4365_v0 = vadd.f32 0.5, %v4301_v40  ;;  %v7722_v52 = vmul.f32 0.25, %v4432_v28  ;;  %v4244_v2 = vmax.f32 %v4052_v10, 0.0 }
 0x6a5   : > { %v4369_v3 = vadd.f32 0.5, %v4305_v27  ;;  %v4429_v20 = vfloor.f32 %v4365_v0  ;;  %v4308_v8 = vmin.f32 %v4244_v2, 4.0 }
 0x6a6   : > { %v7673_v22 = vpop.f32.mrf.mxu1 }
 0x6a7   : > { %v4433_v24 = vfloor.f32 %v4369_v3  ;;  %v4101_v30 = vadd.f32 %v7673_v22, %v7675_v49  ;;  %v4372_v0 = vadd.f32 0.5, %v4308_v8 }
 0x6a8   : > { %v4053_v26 = vpop.f32.mrf.mxu0 }
 0x6a9   : > { %v4054_v60 = vadd.f32 %v4053_v26, %v7660_v47  ;;  %v7737_v28 = vmul.f32 0.25, %v4433_v24  ;;  %v4245_v10 = vmax.f32 %v4101_v30, 0.0  ;;  %v4436_v8 = vfloor.f32 %v4372_v0 }
 0x6ab   : > { %v4248_v9 = vmax.f32 %v4054_v60, 0.0  ;;  %8479 = vst [vmem:[#allocation40_spill] sm:$0xff] %v7737_v28  ;;  %v4309_v2 = vmin.f32 %v4245_v10, 4.0  ;;  %v7767_v32 = vmul.f32 0.25, %v4436_v8 }
 0x6ac   : > { %v7679_v59 = vpop.f32.mrf.mxu2 }
 0x6ad   : > { %v4312_v27 = vmin.f32 %v4248_v9, 4.0  ;;  %v4140_v9 = vadd.f32 %v7679_v59, %v7670_v33  ;;  %v4373_v10 = vadd.f32 0.5, %v4309_v2 }
 0x6ae   : > { %v4102_v29 = vpop.f32.mrf.mxu1 }
 0x6af   : > { %v4103_v26 = vadd.f32 %v4102_v29, %v7660_v47  ;;  %v7741_v29 = vmul.f32 0.25, %v4429_v20  ;;  %v4376_v58 = vadd.f32 0.5, %v4312_v27 }
 0x6b0   : > { %v7681_v43 = vpop.f32.mrf.mxu0 }
 0x6b1   : > { %v4249_v60 = vmax.f32 %v4103_v26, 0.0  ;;  %8480 = vst [vmem:[#allocation33_spill] sm:$0xff] %v7741_v29  ;;  %v4440_v30 = vfloor.f32 %v4376_v58  ;;  %v4057_v5 = vadd.f32 %v7681_v43, %v7653_v56 }
 0x6b2   : > { %v7683_v55 = vpop.f32.mrf.mxu3 }
 0x6b3   : > { %v4313_v19 = vmin.f32 %v4249_v60, 4.0  ;;  %v4189_v59 = vadd.f32 %v7683_v55, %v7670_v33  ;;  %v7763_v58 = vmul.f32 0.25, %v4440_v30  ;;  %v4252_v13 = vmax.f32 %v4057_v5, 0.0 }
 0x6b4   : > { %v4141_v50 = vpop.f32.mrf.mxu2 }
 0x6b5   : > { %v4142_v11 = vadd.f32 %v4141_v50, %v7667_v61  ;;  %v4230_v50 = vmax.f32 %v4140_v9, 0.0  ;;  %v4377_v60 = vadd.f32 0.5, %v4313_v19  ;;  %v4231_v43 = vmax.f32 %v4189_v59, 0.0 }
 0x6b6   : > { %v7689_v34 = vpop.f32.mrf.mxu1 }
 0x6b7   : > { %v4234_v20 = vmax.f32 %v4142_v11, 0.0  ;;  %v4294_v9 = vmin.f32 %v4230_v50, 4.0  ;;  %v4441_v33 = vfloor.f32 %v4377_v60  ;;  %v4106_v0 = vadd.f32 %v7689_v34, %v7653_v56 }
 0x6b8   : > { %v4058_v25 = vpop.f32.mrf.mxu0  ;;  %v4316_v50 = vmin.f32 %v4252_v13, 4.0  ;;  %v4295_v59 = vmin.f32 %v4231_v43, 4.0 }
 0x6b9   : > { %v4059_v26 = vadd.f32 %v4058_v25, %v7650_v53  ;;  %v4298_v11 = vmin.f32 %v4234_v20, 4.0 }
 0x6ba   : > { %v7696_v4 = vpop.f32.mrf.mxu3 }
 0x6bb   : > { %v4191_v51 = vadd.f32 %v7696_v4, %v7667_v61  ;;  %v4256_v25 = vmax.f32 %v4059_v26, 0.0  ;;  %v4437_v4 = vfloor.f32 %v4373_v10  ;;  %v4362_v30 = vadd.f32 0.5, %v4298_v11 }
 0x6bc   : > { %v7699_v46 = vpop.f32.mrf.mxu2 }
 0x6bd   : > { %v4235_v55 = vmax.f32 %v4191_v51, 0.0  ;;  %v4320_v2 = vmin.f32 %v4256_v25, 4.0  ;;  %v4145_v26 = vadd.f32 %v7699_v46, %v7657_v16  ;;  %v4358_v51 = vadd.f32 0.5, %v4294_v9 }
 0x6be   : > { %v7705_v57 = vpop.f32.mrf.mxu1  ;;  %v7785_v34 = vmul.f32 0.25, %v4437_v4  ;;  %v4253_v25 = vmax.f32 %v4106_v0, 0.0  ;;  %v4426_v11 = vfloor.f32 %v4362_v30 }
 0x6bf   : > { %v4108_v19 = vadd.f32 %v7705_v57, %v7650_v53  ;;  %v7781_v57 = vmul.f32 0.25, %v4441_v33  ;;  %v4299_v8 = vmin.f32 %v4235_v55, 4.0  ;;  %v4384_v35 = vadd.f32 0.5, %v4320_v2 }
 0x6c0   : > { %v7709_v36 = vpop.f32.mrf.mxu0  ;;  %v4238_v46 = vmax.f32 %v4145_v26, 0.0  ;;  %v4422_v33 = vfloor.f32 %v4358_v51  ;;  %v4380_v55 = vadd.f32 0.5, %v4316_v50  ;;  %v4317_v26 = vmin.f32 %v4253_v25, 4.0 }
 0x6c1   : > { %v4257_v60 = vmax.f32 %v4108_v19, 0.0  ;;  %v4062_v44 = vadd.f32 %v7709_v36, %v7643_v39  ;;  %v4359_v19 = vadd.f32 0.5, %v4295_v59  ;;  %v4363_v4 = vadd.f32 0.5, %v4299_v8 }
 0x6c2   : > { %v7711_v31 = vpop.f32.mrf.mxu3  ;;  %v7801_v30 = vmul.f32 0.25, %v4426_v11  ;;  %v4444_v59 = vfloor.f32 %v4380_v55 }
 0x6c3   : > { %v4194_v9 = vadd.f32 %v7711_v31, %v7657_v16  ;;  %v4321_v20 = vmin.f32 %v4257_v60, 4.0  ;;  %v4448_v16 = vfloor.f32 %v4384_v35  ;;  %v4302_v31 = vmin.f32 %v4238_v46, 4.0 }
 0x6c4   : > { %v7716_v41 = vpop.f32.mrf.mxu2  ;;  %8481 = vst [vmem:[#allocation32_spill] sm:$0xff] %v7801_v30  ;;  %v4423_v8 = vfloor.f32 %v4359_v19  ;;  %v7809_v60 = vmul.f32 0.25, %v4422_v33  ;;  %v4427_v25 = vfloor.f32 %v4363_v4  ;;  %v7817_v29 = vmul.f32 0.25, %v4444_v59 }
 0x6c5   : > { %v4147_v13 = vadd.f32 %v7716_v41, %v7685_v17  ;;  %v4260_v41 = vmax.f32 %v4062_v44, 0.0  ;;  %v4239_v63 = vmax.f32 %v4194_v9, 0.0  ;;  %v4385_v35 = vadd.f32 0.5, %v4321_v20 }
 0x6c6   : > { %v7720_v1 = vpop.f32.mrf.mxu1  ;;  %8482 = vst [vmem:[#allocation28_spill] sm:$0xff] %v7809_v60  ;;  %v4381_v44 = vadd.f32 0.5, %v4317_v26  ;;  %v7813_v9 = vmul.f32 0.25, %v4448_v16  ;;  %v7821_v4 = vmul.f32 0.25, %v4427_v25 }
 0x6c7   : > { %v4242_v51 = vmax.f32 %v4147_v13, 0.0  ;;  %v4366_v13 = vadd.f32 0.5, %v4302_v31  ;;  %v4324_v36 = vmin.f32 %v4260_v41, 4.0  ;;  %v4303_v55 = vmin.f32 %v4239_v63, 4.0 }
 0x6c8   : > { %v7724_v37 = vpop.f32.mrf.mxu0  ;;  %8484 = vst [vmem:[#allocation42_spill] sm:$0xff] %v7821_v4  ;;  %v4445_v63 = vfloor.f32 %v4381_v44 }
 0x6c9   : > { %v4306_v19 = vmin.f32 %v4242_v51, 4.0  ;;  %v4430_v41 = vfloor.f32 %v4366_v13  ;;  %v4111_v51 = vadd.f32 %v7720_v1, %v7643_v39 }
 0x6ca   : > { %v7729_v54 = vpop.f32.mrf.mxu3 }
 0x6cb   : > { %v4196_v0 = vadd.f32 %v7729_v54, %v7685_v17  ;;  %v4064_v54 = vadd.f32 %v7724_v37, %v7662_v45 }
 0x6cc   : > { %v7733_v48 = vpop.f32.mrf.mxu2 }
 0x6cd   : > { %v4150_v17 = vadd.f32 %v7733_v48, %v7675_v49  ;;  %v4243_v46 = vmax.f32 %v4196_v0, 0.0  ;;  %v7819_v48 = vmul.f32 0.25, %v4423_v8  ;;  %v4264_v33 = vmax.f32 %v4064_v54, 0.0 }
 0x6ce   : > { %v7739_v3 = vpop.f32.mrf.mxu1  ;;  %v4449_v0 = vfloor.f32 %v4385_v35  ;;  %v7831_v8 = vadd.f32 0.5, %v4324_v36  ;;  %v4367_v54 = vadd.f32 0.5, %v4303_v55  ;;  %v4261_v36 = vmax.f32 %v4111_v51, 0.0 }
 0x6cf   : > { %8483 = vst [vmem:[#allocation24_spill] sm:$0xff] %v7819_v48  ;;  %v4246_v20 = vmax.f32 %v4150_v17, 0.0  ;;  %v4307_v26 = vmin.f32 %v4243_v46, 4.0  ;;  %v4370_v17 = vadd.f32 0.5, %v4306_v19  ;;  %v4113_v44 = vadd.f32 %v7739_v3, %v7662_v45 }
 0x6d0   : > { %v7744_v22 = vpop.f32.mrf.mxu0  ;;  %v7839_v13 = vmul.f32 0.25, %v4449_v0  ;;  %v4431_v3 = vfloor.f32 %v4367_v54 }
 0x6d1   : > { %v4067_v16 = vadd.f32 %v7744_v22, %v7655_v42  ;;  %v4328_v22 = vmin.f32 %v4264_v33, 4.0  ;;  %v4310_v46 = vmin.f32 %v4246_v20, 4.0  ;;  %v4371_v1 = vadd.f32 0.5, %v4307_v26 }
 0x6d2   : > { %v7748_v40 = vpop.f32.mrf.mxu3  ;;  %v7847_v33 = vmul.f32 0.25, %v4430_v41  ;;  %v4434_v0 = vfloor.f32 %v4370_v17  ;;  %v4265_v30 = vmax.f32 %v4113_v44, 0.0  ;;  %v7858_v41 = vmin.f32 %v4261_v36, 4.0 }
 0x6d3   : > { %v4199_v59 = vadd.f32 %v7748_v40, %v7675_v49  ;;  %v4268_v37 = vmax.f32 %v4067_v16, 0.0  ;;  %v7843_v40 = vmul.f32 0.25, %v4445_v63  ;;  %v7850_v26 = vadd.f32 0.5, %v4328_v22 }
 0x6d4   : > { %v7753_v27 = vpop.f32.mrf.mxu2  ;;  %8485 = vst [vmem:[#allocation34_spill] sm:$0xff] %v7847_v33  ;;  %v4374_v16 = vadd.f32 0.5, %v4310_v46  ;;  %v4435_v63 = vfloor.f32 %v4371_v1  ;;  %v7862_v46 = vmul.f32 0.25, %v4431_v3  ;;  %v7864_v44 = vmul.f32 0.25, %v4434_v0 }
 0x6d5   : > { %v4247_v55 = vmax.f32 %v4199_v59, 0.0  ;;  %v4152_v19 = vadd.f32 %v7753_v27, %v7660_v47  ;;  %v4332_v48 = vmin.f32 %v4268_v37, 4.0 }
 0x6d6   : > { %v7761_v24 = vpop.f32.mrf.mxu1  ;;  %8487 = vst [vmem:[#allocation49_spill] sm:$0xff] %v7862_v46  ;;  %v4438_v27 = vfloor.f32 %v4374_v16 }
 0x6d7   : > { %v4311_v54 = vmin.f32 %v4247_v55, 4.0  ;;  %v4250_v17 = vmax.f32 %v4152_v19, 0.0  ;;  %8488 = vst [vmem:[#allocation44_spill] sm:$0xff] %v7864_v44  ;;  %v4116_v37 = vadd.f32 %v7761_v24, %v7655_v42  ;;  %v7877_v19 = vmin.f32 %v4265_v30, 4.0 }
 0x6d8   : > { %v7765_v38 = vpop.f32.mrf.mxu0  ;;  %v7879_v3 = vadd.f32 0.5, %v4332_v48 }
 0x6d9   : > { %v4069_v36 = vadd.f32 %v7765_v38, %v7645_v14  ;;  %v4314_v20 = vmin.f32 %v4250_v17, 4.0  ;;  %v4269_v1 = vmax.f32 %v4116_v37, 0.0 }
 0x6da   : > { %v7771_v61 = vpop.f32.mrf.mxu3 }
 0x6db   : > { %v4201_v55 = vadd.f32 %v7771_v61, %v7660_v47  ;;  %v7887_v61 = vmul.f32 0.25, %v4438_v27  ;;  %v4272_v30 = vmax.f32 %v4069_v36, 0.0  ;;  %v4333_v36 = vmin.f32 %v4269_v1, 4.0 }
 0x6dc   : > { %v7777_v5 = vpop.f32.mrf.mxu2 }
 0x6dd   : > { %v4251_v48 = vmax.f32 %v4201_v55, 0.0 }
 0x6de   : > { %v7783_v10 = vpop.f32.mrf.mxu1 }
 0x6df   : > { %v4118_v27 = vadd.f32 %v7783_v10, %v7645_v14 }
 0x6e0   : > { %v7793_v43 = vpop.f32.mrf.mxu0 }
 0x6e1   : > { %v4072_v22 = vadd.f32 %v7793_v43, %v7640_v12  ;;  %v7875_v43 = vmul.f32 0.25, %v4435_v63  ;;  %v4273_v1 = vmax.f32 %v4118_v27, 0.0 }
 0x6e2   : > { %v7797_v2 = vpop.f32.mrf.mxu3 }
 0x6e3   : > { %v4276_v4 = vmax.f32 %v4072_v22, 0.0  ;;  %v4337_v27 = vmin.f32 %v4273_v1, 4.0  ;;  %v4204_v1 = vadd.f32 %v7797_v2, %v7653_v56  ;;  %v4393_v2 = vadd.f32 0.5, %v7877_v19 }
 0x6e4   : > { %v7803_v50 = vpop.f32.mrf.mxu2 }
 0x6e6   : > { %v7811_v11 = vpop.f32.mrf.mxu1 }
 0x6e7   : > { %v4121_v63 = vadd.f32 %v7811_v11, %v7640_v12 }
 0x6e8   : > { %v4073_v23 = vpop.f32.mrf.mxu0 }
 0x6e9   : > { %v4074_v51 = vadd.f32 %v4073_v23, %v7638_v62 }
 0x6ea   : > { %v7825_v31 = vpop.f32.mrf.mxu3 }
 0x6eb   : > { %v4280_v0 = vmax.f32 %v4074_v51, 0.0  ;;  %v4336_v51 = vmin.f32 %v4272_v30, 4.0 }
 0x6ec   : > { %v7833_v25 = vpop.f32.mrf.mxu2 }
 0x6ee   : > { %v4122_v60 = vpop.f32.mrf.mxu1 }
 0x6ef   : > { %v4123_v38 = vadd.f32 %v4122_v60, %v7638_v62 }
 0x6f0   : > { %v4076_v35 = vpop.f32.mrf.mxu0 }
 0x6f1   : > { %v4077_v49 = vadd.f32 %v4076_v35, %v7633_v6  ;;  %v4281_v55 = vmax.f32 %v4123_v38, 0.0 }
 0x6f2   : > { %v7854_v59 = vpop.f32.mrf.mxu3 }
 0x6f3   : > { %8486 = vst [vmem:[#allocation52_spill] sm:$0xff] %v7854_v59  ;;  %v4284_v23 = vmax.f32 %v4077_v49, 0.0  ;;  %v7881_v49 = vadd.f32 0.5, %v4311_v54  ;;  %v4344_v54 = vmin.f32 %v4280_v0, 4.0  ;;  %v4315_v0 = vmin.f32 %v4251_v48, 4.0 }
 0x6f4   : > { %v7868_v35 = vpop.f32.mrf.mxu2 }
 0x6f5   : > { %8489 = vst [vmem:[#allocation61_spill] sm:$0xff] %v7868_v35  ;;  %v4348_v28 = vmin.f32 %v4284_v23, 4.0  ;;  %v4378_v23 = vadd.f32 0.5, %v4314_v20  ;;  %v4408_v44 = vadd.f32 0.5, %v4344_v54 }
 0x6f6   : > { %v4125_v24 = vpop.f32.mrf.mxu1 }
 0x6f7   : > { %v4126_v16 = vadd.f32 %v4125_v24, %v7633_v6  ;;  %v4340_v24 = vmin.f32 %v4276_v4, 4.0  ;;  %v4412_v47 = vadd.f32 0.5, %v4348_v28  ;;  %v4442_v4 = vfloor.f32 %v4378_v23 }
 0x6f8   : > { %v4078_v59 = vpop.f32.mrf.mxu0  ;;  %v4157_v28 = vadd.f32 %v7803_v50, %v7650_v53 }
 0x6f9   : > { %v4285_v17 = vmax.f32 %v4126_v16, 0.0  ;;  %v4079_v22 = vadd.f32 %v4078_v59, %v7648_v18  ;;  %v4155_v59 = vadd.f32 %v7777_v5, %v7653_v56  ;;  %v4277_v16 = vmax.f32 %v4121_v63, 0.0 }
 0x6fa   : > { %v7893_v37 = vpop.f32.mrf.mxu3  ;;  %v4404_v38 = vadd.f32 0.5, %v4340_v24  ;;  %v4476_v30 = vfloor.f32 %v4412_v47  ;;  %v4400_v5 = vadd.f32 0.5, %v4336_v51  ;;  %v4379_v63 = vadd.f32 0.5, %v4315_v0 }
 0x6fb   : > { %8490 = vst [vmem:[#allocation58_spill] sm:$0xff] %v7893_v37  ;;  %v4288_v33 = vmax.f32 %v4079_v22, 0.0  ;;  %v4349_v37 = vmin.f32 %v4285_v17, 4.0  ;;  %v4345_v22 = vmin.f32 %v4281_v55, 4.0  ;;  %v4254_v54 = vmax.f32 %v4155_v59, 0.0 }
 0x6fc   : > { %v7898_v11 = vpop.f32.mrf.mxu2  ;;  %v4341_v17 = vmin.f32 %v4277_v16, 4.0  ;;  %v7909_v23 = vmul.f32 0.25, %v4442_v4  ;;  %v4468_v24 = vfloor.f32 %v4404_v38  ;;  %v4258_v50 = vmax.f32 %v4157_v28, 0.0 }
 0x6fd   : > { %v4352_v60 = vmin.f32 %v4288_v33, 4.0  ;;  %v4472_v33 = vfloor.f32 %v4408_v44  ;;  %v4413_v21 = vadd.f32 0.5, %v4349_v37  ;;  %v4409_v55 = vadd.f32 0.5, %v4345_v22 }
 0x6fe   : > { %v4127_v20 = vpop.f32.mrf.mxu1  ;;  %v4540_v47 = vmul.f32 0.25, %v4476_v30  ;;  %v4464_v51 = vfloor.f32 %v4400_v5  ;;  %v4443_v0 = vfloor.f32 %v4379_v63  ;;  %v4405_v59 = vadd.f32 0.5, %v4341_v17 }
 0x6ff   : > { %v4416_v48 = vadd.f32 0.5, %v4352_v60  ;;  %v4128_v7 = vadd.f32 %v4127_v20, %v7648_v18  ;;  %v4206_v44 = vadd.f32 %v7825_v31, %v7650_v53  ;;  %v4477_v37 = vfloor.f32 %v4413_v21 }
 0x700   : > { %v4322_v38 = vmin.f32 %v4258_v50, 4.0  ;;  %v4532_v28 = vmul.f32 0.25, %v4468_v24  ;;  %v4473_v22 = vfloor.f32 %v4409_v55  ;;  %v4528_v5 = vmul.f32 0.25, %v4464_v51 }
 0x701   : > { %v4480_v35 = vfloor.f32 %v4416_v48  ;;  %v4289_v45 = vmax.f32 %v4128_v7, 0.0  ;;  %v4536_v7 = vmul.f32 0.25, %v4472_v33  ;;  %v4397_v48 = vadd.f32 0.5, %v4333_v36 }
 0x702   : > { %v7907_v10 = vpop.f32.mrf.mxu3  ;;  %v7919_v63 = vmul.f32 0.25, %v4443_v0  ;;  %v4318_v53 = vmin.f32 %v4254_v54, 4.0  ;;  %v4259_v21 = vmax.f32 %v4206_v44, 0.0  ;;  %v4469_v31 = vfloor.f32 %v4405_v59 }
 0x703   : > { %v4544_v60 = vmul.f32 0.25, %v4480_v35  ;;  %v4353_v46 = vmin.f32 %v4289_v45, 4.0  ;;  %v4558_v45 = vpack.c.bf16 %v7909_v23, %v7887_v61  ;;  %v4401_v35 = vadd.f32 0.5, %v4337_v27  ;;  %v8519_v61 = vld [vmem:[#allocation49_spill] sm:$0xff] }
 0x704   : > { %v7911_v20 = vpop.f32.mrf.mxu2  ;;  %v4572_v56 = vpack.c.bf16 %v4536_v7, %v4532_v28  ;;  %v8491_v33 = vfloor.f32 %v7879_v3  ;;  %v8492_v24 = vfloor.f32 %v7881_v49  ;;  %v4386_v55 = vadd.f32 0.5, %v4322_v38 }
 0x705   : > { %v4576_v16 = vpack.c.bf16 %v4544_v60, %v4540_v47  ;;  %v4417_v4 = vadd.f32 0.5, %v4353_v46  ;;  %v4541_v46 = vmul.f32 0.25, %v4477_v37  ;;  %v4465_v47 = vfloor.f32 %v4401_v35 }
 0x706   : > { %v4524_v27 = vmul.f32 0.25, %v8491_v33  ;;  %v7928_v50 = vmul.f32 0.25, %v8492_v24  ;;  %v4255_v60 = vmax.f32 %v4204_v1, 0.0  ;;  %v4537_v54 = vmul.f32 0.25, %v4473_v22 }
 0x707   : > { %v4481_v30 = vfloor.f32 %v4417_v4  ;;  %4620 = vmatpush.bf16.msrb.mxu0 %v4576_v16  ;;  %v4389_v59 = vadd.f32 0.5, %v7858_v41  ;;  %v8493_v44 = vfloor.f32 %v7850_v26  ;;  %v4461_v19 = vfloor.f32 %v4397_v48 }
 0x708   : > { %v4382_v37 = vadd.f32 0.5, %v4318_v53  ;;  %v4533_v3 = vmul.f32 0.25, %v4469_v31  ;;  %v4323_v16 = vmin.f32 %v4259_v21, 4.0  ;;  %v4568_v49 = vpack.c.bf16 %v4528_v5, %v4524_v27 }
 0x709   : > { %v4545_v36 = vmul.f32 0.25, %v4481_v30  ;;  %v4520_v7 = vmul.f32 0.25, %v8493_v44  ;;  %v4559_v4 = vpack.c.bf16 %v7919_v63, %v7928_v50  ;;  %v8494_v1 = vfloor.f32 %v7831_v8  ;;  %v4591_v63 = vpop.permute.xlu2 %4590 }
 0x70a   : > { %v7921_v17 = vpop.f32.mrf.mxu3  ;;  %v4450_v35 = vfloor.f32 %v4386_v55  ;;  %v4457_v28 = vfloor.f32 %v4393_v2  ;;  %v4529_v22 = vmul.f32 0.25, %v4465_v47  ;;  %v4319_v30 = vmin.f32 %v4255_v60, 4.0 }
 0x70b   : > { %v4577_v51 = vpack.c.bf16 %v4545_v36, %v4541_v46  ;;  %4621 = vmatpush.bf16.msrb.mxu0 %v4572_v56  ;;  %v4516_v38 = vmul.f32 0.25, %v8494_v1  ;;  %v4573_v41 = vpack.c.bf16 %v4537_v54, %v4533_v3  ;;  %v4446_v26 = vfloor.f32 %v4382_v37 }
 0x70c   : > { %v4169_v0 = vpop.f32.mrf.mxu2  ;;  %v4453_v46 = vfloor.f32 %v4389_v59  ;;  %v4525_v48 = vmul.f32 0.25, %v4461_v19  ;;  %v4387_v53 = vadd.f32 0.5, %v4323_v16  ;;  %v7937_v5 = vmul.f32 0.25, %v4450_v35 }
 0x70d   : > { %4639 = vmatpush.bf16.msrb.mxu1 %v4577_v51  ;;  %v4564_v31 = vpack.c.bf16 %v4520_v7, %v4516_v38  ;;  %v4521_v36 = vmul.f32 0.25, %v4457_v28  ;;  %v4383_v56 = vadd.f32 0.5, %v4319_v30  ;;  %v7939_v27 = vmul.f32 0.25, %v4446_v26  ;;  %v8501_v30 = vld [vmem:[#allocation61_spill] sm:$0xff] }
 0x70e   : > { %v4569_v33 = vpack.c.bf16 %v4529_v22, %v4525_v48  ;;  %v4517_v2 = vmul.f32 0.25, %v4453_v46  ;;  %v4451_v24 = vfloor.f32 %v4387_v53  ;;  %v8495_v60 = vpack.c.bf16 %v7813_v9, %v7817_v29 }
 0x70f   : > { %4622 = vmatpush.bf16.msrb.mxu0 %v4568_v49  ;;  %v4562_v55 = vpack.c.bf16 %v7937_v5, %v7939_v27  ;;  %v4447_v47 = vfloor.f32 %v4383_v56  ;;  %v8496_v7 = vpack.c.bf16 %v7763_v58, %v7767_v32  ;;  %v4170_v16 = vadd.f32 %v4169_v0, %v7640_v12  ;;  %v8516_v5 = vld [vmem:[#allocation32_spill] sm:$0xff] }
 0x710   : > { %v4565_v54 = vpack.c.bf16 %v4521_v36, %v4517_v2  ;;  %v7946_v51 = vmul.f32 0.25, %v4451_v24  ;;  %v8497_v29 = vpack.c.bf16 %v7839_v13, %v7843_v40  ;;  %v4160_v49 = vadd.f32 %v7833_v25, %v7643_v39  ;;  %v8506_v2 = vld [vmem:[#allocation40_spill] sm:$0xff] }
 0x711   : > { %4640 = vmatpush.bf16.msrb.mxu1 %v4573_v41  ;;  %v7948_v44 = vmul.f32 0.25, %v4447_v47  ;;  %v4167_v32 = vadd.f32 %v7911_v20, %v7645_v14  ;;  %v8498_v58 = vpack.c.bf16 %v7722_v52, %v7726_v15  ;;  %v4165_v0 = vadd.f32 %v7898_v11, %v7655_v42  ;;  %v7978_v15 = vld [vmem:[%s8117_s10] sm:$0xff]  ;;  %v8517_v27 = vld [vmem:[#allocation28_spill] sm:$0xff] }
 0x712   : > { %v4218_v21 = vpop.f32.mrf.mxu3  ;;  %v4278_v13 = vmax.f32 %v4170_v16, 0.0  ;;  %v8499_v40 = vpack.c.bf16 %v7781_v57, %v7785_v34  ;;  %v4262_v28 = vmax.f32 %v4160_v49, 0.0  ;;  %v8500_v52 = vld [vmem:[#allocation46_spill] sm:$0xff]  ;;  %v8502_v57 = vld [vmem:[#allocation45_spill] sm:$0xff]  ;;  %v8503_v34 = vld [vmem:[#allocation48_spill] sm:$0xff]  ;;  %v8520_v23 = vpack.c.bf16 %v7875_v43, %v8519_v61 }
 0x713   : > { %4623 = vmatpush.bf16.msrb.mxu0 %v4564_v31  ;;  %v4563_v9 = vpack.c.bf16 %v7946_v51, %v7948_v44  ;;  %v4162_v11 = vadd.f32 %v8501_v30, %v8500_v52  ;;  %v4274_v41 = vmax.f32 %v4167_v32, 0.0  ;;  %v4219_v26 = vadd.f32 %v4218_v21, %v7640_v12  ;;  %v8507_v12 = vld [vmem:[#allocation33_spill] sm:$0xff]  ;;  %v8509_v16 = vld [vmem:[#allocation58_spill] sm:$0xff]  ;;  %v8522_v51 = vld [vmem:[#allocation24_spill] sm:$0xff] }
 0x714   : > { %v4171_v8 = vpop.f32.mrf.mxu2  ;;  %v8504_v46 = vpack.c.bf16 %v8502_v57, %v8503_v34  ;;  %v4270_v56 = vmax.f32 %v4165_v0, 0.0  ;;  %v8508_v21 = vpack.c.bf16 %v8506_v2, %v8507_v12  ;;  %v4326_v24 = vmin.f32 %v4262_v28, 4.0  ;;  %v8538_v61 = vld [vmem:[#allocation14_spill] sm:$0xff] }
 0x715   : > { %4641 = vmatpush.bf16.msrb.mxu1 %v4569_v33  ;;  %v4172_v37 = vadd.f32 %v4171_v8, %v7638_v62  ;;  %v4216_v8 = vadd.f32 %v7921_v17, %v7645_v14  ;;  %v4342_v33 = vmin.f32 %v4278_v13, 4.0 }
 0x716   : > { %v4334_v49 = vmin.f32 %v4270_v56, 4.0 }
 0x717   : > { %4624 = vmatpush.bf16.msrb.mxu0 %v8495_v60  ;;  %v4282_v38 = vmax.f32 %v4172_v37, 0.0  ;;  %v4406_v32 = vadd.f32 0.5, %v4342_v33 }
 0x718   : > { %v4398_v57 = vadd.f32 0.5, %v4334_v49 }
 0x719   : > { %4642 = vmatpush.bf16.msrb.mxu1 %v4565_v54 }
 0x71a   : > { %v4220_v59 = vpop.f32.mrf.mxu3 }
 0x71b   : > { %4625 = vmatpush.bf16.msrb.mxu0 %v8496_v7  ;;  %v4221_v25 = vadd.f32 %v4220_v59, %v7638_v62  ;;  %v8505_v62 = vld [vmem:[#allocation52_spill] sm:$0xff]  ;;  %v4214_v59 = vadd.f32 %v7907_v10, %v7655_v42  ;;  %v4338_v7 = vmin.f32 %v4274_v41, 4.0 }
 0x71c   : > { %v4174_v19 = vpop.f32.mrf.mxu2  ;;  %v7988_v53 = vadd.f32 %v8505_v62, %v7643_v39  ;;  %v4266_v39 = vmax.f32 %v4162_v11, 0.0 }
 0x71d   : > { %v4175_v3 = vadd.f32 %v4174_v19, %v7633_v6  ;;  %4643 = vmatpush.bf16.msrb.mxu1 %v8497_v29  ;;  %v4283_v47 = vmax.f32 %v4221_v25, 0.0  ;;  %v4279_v19 = vmax.f32 %v4219_v26, 0.0  ;;  %v4211_v29 = vadd.f32 %v8509_v16, %v8500_v52 }
 0x71e   : > { %v4263_v37 = vmax.f32 %v7988_v53, 0.0  ;;  %v4330_v28 = vmin.f32 %v4266_v39, 4.0  ;;  %v4271_v25 = vmax.f32 %v4214_v59, 0.0 }
 0x71f   : > { %v4286_v1 = vmax.f32 %v4175_v3, 0.0  ;;  %4626 = vmatpush.bf16.msrb.mxu0 %v8498_v58  ;;  %v8510_v58 = vld [vmem:[#allocation47_spill] sm:$0xff]  ;;  %v4267_v26 = vmax.f32 %v4211_v29, 0.0 }
 0x721   : > { %4644 = vmatpush.bf16.msrb.mxu1 %v8499_v40  ;;  %v4350_v22 = vmin.f32 %v4286_v1, 4.0  ;;  %v4275_v1 = vmax.f32 %v4216_v8, 0.0  ;;  %v4347_v40 = vmin.f32 %v4283_v47, 4.0  ;;  %v4331_v47 = vmin.f32 %v4267_v26, 4.0 }
 0x722   : > { %v4223_v35 = vpop.f32.mrf.mxu3 }
 0x723   : > { %v4224_v20 = vadd.f32 %v4223_v35, %v7633_v6  ;;  %4627 = vmatpush.bf16.msrb.mxu0 %v8504_v46  ;;  %v4346_v6 = vmin.f32 %v4282_v38, 4.0  ;;  %v4414_v60 = vadd.f32 0.5, %v4350_v22  ;;  %v8511_v38 = vld [vmem:[#allocation36_spill] sm:$0xff]  ;;  %v4402_v22 = vadd.f32 0.5, %v4338_v7 }
 0x724   : > { %v4176_v48 = vpop.f32.mrf.mxu2  ;;  %v8512_v0 = vpack.c.bf16 %v8510_v58, %v8511_v38  ;;  %v4339_v34 = vmin.f32 %v4275_v1, 4.0  ;;  %v4470_v46 = vfloor.f32 %v4406_v32  ;;  %v4395_v58 = vadd.f32 0.5, %v4331_v47  ;;  %v4601_v47 = vpop.permute.xlu0 %4600 }
 0x725   : > { %v4287_v31 = vmax.f32 %v4224_v20, 0.0  ;;  %v4177_v36 = vadd.f32 %v4176_v48, %v7648_v18  ;;  %4645 = vmatpush.bf16.msrb.mxu1 %v8508_v21  ;;  %v4410_v14 = vadd.f32 0.5, %v4346_v6  ;;  %v4478_v42 = vfloor.f32 %v4414_v60 }
 0x726   : > { %4628 = vmatmul.bf16.vlgmr.msrb.gmra.mxu0 %v7978_v15  ;;  %v4343_v20 = vmin.f32 %v4279_v19, 4.0  ;;  %v4411_v48 = vadd.f32 0.5, %v4347_v40  ;;  %v4390_v21 = vadd.f32 0.5, %v4326_v24  ;;  %v4462_v60 = vfloor.f32 %v4398_v57  ;;  %v4985_v19 = vld [vmem:[%s8117_s10 + $0x8] sm:$0xff] }
 0x727   : > { %v4290_v54 = vmax.f32 %v4177_v36, 0.0  ;;  %v4351_v17 = vmin.f32 %v4287_v31, 4.0  ;;  %v4474_v30 = vfloor.f32 %v4410_v14  ;;  %v4542_v62 = vmul.f32 0.25, %v4478_v42 }
 0x728   : > { %v4394_v31 = vadd.f32 0.5, %v4330_v28  ;;  %v4466_v36 = vfloor.f32 %v4402_v22  ;;  %v4407_v56 = vadd.f32 0.5, %v4343_v20  ;;  %v4534_v39 = vmul.f32 0.25, %v4470_v46 }
 0x729   : > { %v4354_v3 = vmin.f32 %v4290_v54, 4.0  ;;  %4646 = vmatpush.bf16.msrb.mxu1 %v8512_v0  ;;  %v4415_v11 = vadd.f32 0.5, %v4351_v17  ;;  %v4538_v8 = vmul.f32 0.25, %v4474_v30  ;;  %v4403_v54 = vadd.f32 0.5, %v4339_v34 }
 0x72a   : > { %v4225_v13 = vpop.f32.mrf.mxu3  ;;  %v4475_v59 = vfloor.f32 %v4411_v48  ;;  %v4327_v14 = vmin.f32 %v4263_v37, 4.0  ;;  %v4458_v17 = vfloor.f32 %v4394_v31  ;;  %v4530_v16 = vmul.f32 0.25, %v4466_v36  ;;  %v8513_v48 = vld [vmem:[#allocation44_spill] sm:$0xff]  ;;  %v8526_v36 = vld [vmem:[#allocation31_spill] sm:$0xff] }
 0x72b   : > { %v4418_v10 = vadd.f32 0.5, %v4354_v3  ;;  %v4226_v35 = vadd.f32 %v4225_v13, %v7648_v18  ;;  %v4335_v18 = vmin.f32 %v4271_v25, 4.0  ;;  %v4479_v33 = vfloor.f32 %v4415_v11 }
 0x72c   : > { %4647 = vmatmul.bf16.vlgmr.msrb.gmra.mxu1 %v7978_v15  ;;  %v4471_v29 = vfloor.f32 %v4407_v56  ;;  %v4574_v32 = vpack.c.bf16 %v4538_v8, %v4534_v39  ;;  %v4454_v24 = vfloor.f32 %v4390_v21  ;;  %v4526_v38 = vmul.f32 0.25, %v4462_v60 }
 0x72d   : > { %v4482_v52 = vfloor.f32 %v4418_v10  ;;  %v4291_v41 = vmax.f32 %v4226_v35, 0.0  ;;  %v4399_v3 = vadd.f32 0.5, %v4335_v18  ;;  %v4543_v49 = vmul.f32 0.25, %v4479_v33  ;;  %v4596_v18 = vpop.permute.xlu1 %4595  ;;  %v8527_v33 = vld [vmem:[#allocation16_spill] sm:$0xff] }
 0x72e   : > { %v4467_v0 = vfloor.f32 %v4403_v54  ;;  %v4539_v13 = vmul.f32 0.25, %v4475_v59  ;;  %v4391_v42 = vadd.f32 0.5, %v4327_v14  ;;  %v4522_v10 = vmul.f32 0.25, %v4458_v17  ;;  %v8528_v54 = vld [vmem:[#allocation21_spill] sm:$0xff] }
 0x72f   : > { %v4546_v53 = vmul.f32 0.25, %v4482_v52  ;;  %v4355_v6 = vmin.f32 %v4291_v41, 4.0  ;;  %v4463_v35 = vfloor.f32 %v4399_v3  ;;  %v4535_v28 = vmul.f32 0.25, %v4471_v29  ;;  %v4606_v3 = vpop.permute.xlu2 %4605  ;;  %v8530_v29 = vld [vmem:[#allocation53_spill] sm:$0xff] }
 0x730   : > { %v4570_v37 = vpack.c.bf16 %v4530_v16, %v4526_v38  ;;  %v4518_v25 = vmul.f32 0.25, %v4454_v24  ;;  %v4459_v22 = vfloor.f32 %v4395_v58  ;;  %v4531_v20 = vmul.f32 0.25, %v4467_v0  ;;  %v8532_v0 = vld [vmem:[#allocation50_spill] sm:$0xff] }
 0x731   : > { %v4578_v2 = vpack.c.bf16 %v4546_v53, %v4542_v62  ;;  %v4419_v12 = vadd.f32 0.5, %v4355_v6  ;;  %v4575_v30 = vpack.c.bf16 %v4539_v13, %v4535_v28  ;;  %v4455_v11 = vfloor.f32 %v4391_v42  ;;  %v8514_v62 = vld [vmem:[#allocation34_spill] sm:$0xff] }
 0x732   : > { %v4527_v52 = vmul.f32 0.25, %v4463_v35  ;;  %v4566_v41 = vpack.c.bf16 %v4522_v10, %v4518_v25  ;;  %v4523_v26 = vmul.f32 0.25, %v4459_v22  ;;  %v8515_v53 = vpack.c.bf16 %v8513_v48, %v8514_v62  ;;  %v8533_v10 = vld [vmem:[#allocation60_spill] sm:$0xff]  ;;  %v8534_v22 = vld [vmem:[#allocation15_spill] sm:$0xff] }
 0x733   : > { %v4483_v7 = vfloor.f32 %v4419_v12  ;;  %4658 = vmatpush.bf16.msrb.mxu2 %v4578_v2  ;;  %v4519_v34 = vmul.f32 0.25, %v4455_v11  ;;  %v8535_v11 = vld [vmem:[#allocation30_spill] sm:$0xff]  ;;  %v8537_v62 = vld [vmem:[#allocation35_spill] sm:$0xff] }
 0x734   : > { %v4571_v57 = vpack.c.bf16 %v4531_v20, %v4527_v52 }
 0x735   : > { %v4547_v1 = vmul.f32 0.25, %v4483_v7  ;;  %v4567_v46 = vpack.c.bf16 %v4523_v26, %v4519_v34  ;;  %v8529_v7 = vld [vmem:[#allocation17_spill] sm:$0xff]  ;;  %v8536_v34 = vld [vmem:[#allocation59_spill] sm:$0xff] }
 0x736   : > { %4633 = vmatmul.bf16.gmra.mxu0 %v4985_v19 }
 0x737   : > { %v4579_v40 = vpack.c.bf16 %v4547_v1, %v4543_v49  ;;  %4659 = vmatpush.bf16.msrb.mxu2 %v4574_v32  ;;  %v8531_v32 = vld [vmem:[#allocation51_spill] sm:$0xff] }
 0x739   : > { %4677 = vmatpush.bf16.msrb.mxu3 %v4579_v40 }
 0x73b   : > { %4660 = vmatpush.bf16.msrb.mxu2 %v4570_v37 }
 0x73c   : > { %4652 = vmatmul.bf16.gmra.mxu1 %v4985_v19 }
 0x73d   : > { %4678 = vmatpush.bf16.msrb.mxu3 %v4575_v30 }
 0x73f   : > { %4661 = vmatpush.bf16.msrb.mxu2 %v4566_v41 }
 0x741   : > { %4679 = vmatpush.bf16.msrb.mxu3 %v4571_v57 }
 0x743   : > { %4662 = vmatpush.bf16.msrb.mxu2 %v4562_v55  ;;  %v8518_v55 = vpack.c.bf16 %v8516_v5, %v8517_v27 }
 0x745   : > { %4680 = vmatpush.bf16.msrb.mxu3 %v4567_v46 }
 0x747   : > { %4663 = vmatpush.bf16.msrb.mxu2 %v4558_v45  ;;  %v8521_v45 = vld [vmem:[#allocation42_spill] sm:$0xff] }
 0x748   : > { %v8523_v44 = vpack.c.bf16 %v8521_v45, %v8522_v51  ;;  %v8539_v51 = vld [vmem:[#allocation26_spill] sm:$0xff] }
 0x749   : > { %4681 = vmatpush.bf16.msrb.mxu3 %v4563_v9  ;;  %v8524_v9 = vld [vmem:[#allocation27_spill] sm:$0xff] }
 0x74b   : > { %4664 = vmatpush.bf16.msrb.mxu2 %v8515_v53 }
 0x74d   : > { %4682 = vmatpush.bf16.msrb.mxu3 %v4559_v4 }
 0x74f   : > { %4665 = vmatpush.bf16.msrb.mxu2 %v8518_v55 }
 0x751   : > { %4683 = vmatpush.bf16.msrb.mxu3 %v8520_v23 }
 0x752   : > { %4666 = vmatmul.bf16.vlgmr.msrb.gmra.mxu2 %v7978_v15 }
 0x755   : > { %4684 = vmatpush.bf16.msrb.mxu3 %v8523_v44 }
 0x758   : > { %4685 = vmatmul.bf16.vlgmr.msrb.gmra.mxu3 %v7978_v15 }
 0x762   : > { %4671 = vmatmul.bf16.gmra.mxu2 %v4985_v19 }
 0x768   : > { %4690 = vmatmul.bf16.gmra.mxu3 %v4985_v19 }
 0x7a3   : > { %v4629_v50 = vpop.f32.mrf.mxu0 }
 0x7a4   : > { %v4630_v4 = vadd.f32 %v4629_v50, %v4591_v63 }
 0x7a6   : > { %v4696_v6 = vadd.f32 %v4630_v4, %v8524_v9  ;;  %v8541_v4 = vld [vmem:[#allocation18_spill] sm:$0xff] }
 0x7a8   : > { %4712 = vst [vmem:[%s8039_s13] sm:$0xff] %v4696_v6 }
 0x7a9   : > { %v4648_v43 = vpop.f32.mrf.mxu1 }
 0x7aa   : > { %v4649_v31 = vadd.f32 %v4648_v43, %v4591_v63 }
 0x7ab   : > { %v4631_v15 = vpop.f32.mrf.mxu0 }
 0x7ac   : > { %v4697_v56 = vadd.f32 %v4649_v31, %v8526_v36  ;;  %v4632_v8 = vadd.f32 %v4631_v15, %v4596_v18 }
 0x7ae   : > { %4713 = vst [vmem:[%s8039_s13 + $0x8] sm:$0xff] %v4697_v56  ;;  %v4700_v2 = vadd.f32 %v4632_v8, %v8527_v33 }
 0x7b0   : > { %4716 = vst [vmem:[%s8039_s13 + $0x20] sm:$0xff] %v4700_v2 }
 0x7b1   : > { %v4650_v12 = vpop.f32.mrf.mxu1 }
 0x7b2   : > { %v4651_v21 = vadd.f32 %v4650_v12, %v4596_v18 }
 0x7b3   : > { %v4634_v60 = vpop.f32.mrf.mxu0 }
 0x7b4   : > { %v4701_v39 = vadd.f32 %v4651_v21, %v8528_v54  ;;  %v4635_v59 = vadd.f32 %v4634_v60, %v4601_v47 }
 0x7b6   : > { %4717 = vst [vmem:[%s8039_s13 + $0x28] sm:$0xff] %v4701_v39  ;;  %v4704_v19 = vadd.f32 %v4635_v59, %v8529_v7 }
 0x7b8   : > { %4720 = vst [vmem:[%s8039_s13 + $0x40] sm:$0xff] %v4704_v19 }
 0x7b9   : > { %v4653_v14 = vpop.f32.mrf.mxu1 }
 0x7ba   : > { %v4654_v17 = vadd.f32 %v4653_v14, %v4601_v47 }
 0x7bb   : > { %v4636_v16 = vpop.f32.mrf.mxu0 }
 0x7bc   : > { %v4705_v49 = vadd.f32 %v4654_v17, %v8530_v29  ;;  %v4637_v1 = vadd.f32 %v4636_v16, %v4606_v3 }
 0x7be   : > { %4721 = vst [vmem:[%s8039_s13 + $0x48] sm:$0xff] %v4705_v49  ;;  %v4708_v24 = vadd.f32 %v4637_v1, %v8531_v32 }
 0x7c0   : > { %4724 = vst [vmem:[%s8039_s13 + $0x60] sm:$0xff] %v4708_v24 }
 0x7c1   : > { %v4655_v58 = vpop.f32.mrf.mxu1 }
 0x7c2   : > { %v4656_v38 = vadd.f32 %v4655_v58, %v4606_v3 }
 0x7c4   : > { %v4709_v13 = vadd.f32 %v4656_v38, %v8532_v0 }
 0x7c6   : > { %4725 = vst [vmem:[%s8039_s13 + $0x68] sm:$0xff] %v4709_v13 }
 0x7d5   : > { %v4667_v40 = vpop.f32.mrf.mxu2 }
 0x7d6   : > { %v4668_v42 = vadd.f32 %v4667_v40, %v4591_v63 }
 0x7d8   : > { %v4698_v35 = vadd.f32 %v4668_v42, %v8533_v10 }
 0x7da   : > { %4714 = vst [vmem:[%s8039_s13 + $0x10] sm:$0xff] %v4698_v35 }
 0x7db   : > { %v4686_v28 = vpop.f32.mrf.mxu3 }
 0x7dc   : > { %v4687_v37 = vadd.f32 %v4686_v28, %v4591_v63 }
 0x7dd   : > { %v4669_v25 = vpop.f32.mrf.mxu2 }
 0x7de   : > { %v4699_v20 = vadd.f32 %v4687_v37, %v8534_v22  ;;  %v4670_v30 = vadd.f32 %v4669_v25, %v4596_v18 }
 0x7e0   : > { %4715 = vst [vmem:[%s8039_s13 + $0x18] sm:$0xff] %v4699_v20  ;;  %v4702_v52 = vadd.f32 %v4670_v30, %v8535_v11 }
 0x7e2   : > { %4718 = vst [vmem:[%s8039_s13 + $0x30] sm:$0xff] %v4702_v52 }
 0x7e3   : > { %v4688_v41 = vpop.f32.mrf.mxu3 }
 0x7e4   : > { %v4689_v26 = vadd.f32 %v4688_v41, %v4596_v18 }
 0x7e5   : > { %v4672_v57 = vpop.f32.mrf.mxu2 }
 0x7e6   : > { %v4703_v46 = vadd.f32 %v4689_v26, %v8536_v34  ;;  %v4673_v48 = vadd.f32 %v4672_v57, %v4601_v47 }
 0x7e8   : > { %4719 = vst [vmem:[%s8039_s13 + $0x38] sm:$0xff] %v4703_v46  ;;  %v4706_v53 = vadd.f32 %v4673_v48, %v8537_v62 }
 0x7ea   : > { %4722 = vst [vmem:[%s8039_s13 + $0x50] sm:$0xff] %v4706_v53 }
 0x7eb   : > { %v4691_v5 = vpop.f32.mrf.mxu3 }
 0x7ec   : > { %v4692_v27 = vadd.f32 %v4691_v5, %v4601_v47 }
 0x7ed   : > { %v4674_v55 = vpop.f32.mrf.mxu2 }
 0x7ee   : > { %v4707_v23 = vadd.f32 %v4692_v27, %v8538_v61  ;;  %v4675_v45 = vadd.f32 %v4674_v55, %v4606_v3 }
 0x7f0   : > { %4723 = vst [vmem:[%s8039_s13 + $0x58] sm:$0xff] %v4707_v23  ;;  %v4710_v44 = vadd.f32 %v4675_v45, %v8539_v51 }
 0x7f2   : > { %4726 = vst [vmem:[%s8039_s13 + $0x70] sm:$0xff] %v4710_v44 }
 0x7f3   : > { %v4693_v63 = vpop.f32.mrf.mxu3 }
 0x7f4   : > { %v4694_v50 = vadd.f32 %v4693_v63, %v4606_v3 }
 0x7f6   : > { %v4711_v9 = vadd.f32 %v4694_v50, %v8541_v4 }
 0x7f8   : > { %4727 = vst [vmem:[%s8039_s13 + $0x78] sm:$0xff] %v4711_v9 }
 0x7f9   : > { %5119 = shalt.err (!%p5116_p7)
}
 0x7fa   : > { %s5167_s18 = smov 512   ;;  %s5168_s13 = smov 1024  }
 0x7fb   : > { %4989 = dma.vmem_to_hbm [thread:$0]  (%p5284_p11), %s4742_s23, 2048, %s4744_s30, %s4729_s25, %s5167_s18, %s5168_s13, %s5164_s26  }
 0x7fc PF: > { %s8542_s15 = sld [smem:[#allocation8_spill]]  ;;  %p4996_p8 = pnand %p4819_p9, %p5288_p12 }
 0x7fe   : > { %p4997_p10 = pneg %p4996_p8 }
 0x802   : > { %s4758_s20 = sand.u32 1, %s8542_s15  }
 0x803   : > { %s4759_s14 = scalar_lea.sflag [#allocation4], %s4758_s20 }
 0x804   : > { %5141 = dma.done.wait (%p4997_p10), %s4759_s14, 2048  }
 0x805   : > { %5143 = vsyncadd (%p4997_p10), %s4759_s14, 4294965248  ;;  %s8544_s24 = sld [smem:[#allocation10_spill]]  ;;  %s8547_s21 = smov %s5150_s22 }
 0x806   : > { %s8545_s16 = sld [smem:[#allocation9_spill]] }
 0x807   : > { %s8546_s23 = sld [smem:[#allocation11_spill]] }
 0x80b   : > { %p25_p1 = scmp.ge.s32.totalorder %s8544_s24, 4  }
 0x80c   : > { %s8548_s22 = smov %s8545_s16 }
 0x80d   :  { %27 = sbr.rel (!%p25_p1) target bundleno = 5 (0x5), region = 113 }
 0x812   :  { %4765 = vsyncpa [#allocation3], 1 }
 0x813   :  { %4767 = vsyncpa [#allocation3 + $0x1], 1 }
 0x814   :  { %4768 = vsyncpa [#allocation4], 1 }
 0x815   :  { %4770 = vsyncpa [#allocation4 + $0x1], 1 }

</bundles_post_ra>
